<compile_context>
chip_gen: v5e
topology: v5e:2x2
jax: 0.10.0
libtpu: 0.0.40
codegen_flags: <defaults>
</compile_context>

<pallas_src>
import jax
import jax.numpy as jnp
import numpy as np
from jax.experimental import pallas as pl
from jax.experimental.pallas import tpu as pltpu


# --------------------------------------------------------------------------- #
# Kernel
# --------------------------------------------------------------------------- #
def _lstm_ae_kernel(x_ref, wie_ref, whe_ref, be_ref, wdi_ref, bdi_ref,
                    whd_ref, out_ref):
    T, TB, D = x_ref.shape           # time-major input tile: (T, batch_tile, D_pad)
    H = whe_ref.shape[0]             # padded encoder hidden size (multiple of 128)
    Hd = whd_ref.shape[0]            # padded decoder hidden size (== D_pad)
    f32 = jnp.float32

    def lstm_step(gates, c, Hsz):
        # Gate layout (i, f, o | g): one contiguous sigmoid over the first
        # 3*Hsz lanes + one tanh over the last Hsz lanes.  Hsz is a multiple of
        # 128, so every slice below is a whole, lane-0-aligned vreg block.
        sg = jax.nn.sigmoid(gates[:, :3 * Hsz])
        gg = jnp.tanh(gates[:, 3 * Hsz:])
        i = sg[:, :Hsz]
        f = sg[:, Hsz:2 * Hsz]
        o = sg[:, 2 * Hsz:3 * Hsz]
        c_new = f * c + i * gg
        h_new = o * jnp.tanh(c_new)
        return h_new, c_new

    # ---- encoder: hoisted input projection -> one big MXU matmul, bias folded
    wie = wie_ref[...]
    mm_dt = wie.dtype                # matmul input dtype (f32 or bf16)
    x_flat = x_ref[...].reshape(T * TB, D)
    gates_x = (jnp.dot(x_flat, wie, preferred_element_type=f32)
               + be_ref[...].astype(f32)).reshape(T, TB, 4 * H)

    whe = whe_ref[...]
    h = jnp.zeros((TB, H), f32)
    c = jnp.zeros((TB, H), f32)
    for t in range(T):               # T is static & small -> full unroll
        g = gates_x[t] if t == 0 else (
            gates_x[t]
            + jnp.dot(h.astype(mm_dt), whe, preferred_element_type=f32))
        h, c = lstm_step(g, c, H)

    # ---- fused encoder_fc @ decoder_fc @ decoder-input-projection ----------
    # (the wrapper pre-multiplied the three linear maps; the decoder input is
    #  constant across time, so this term is computed exactly once)
    x_term = (jnp.dot(h.astype(mm_dt), wdi_ref[...], preferred_element_type=f32)
              + bdi_ref[...].astype(f32))

    # ---- decoder recurrence -------------------------------------------------
    whd = whd_ref[...]
    hd = jnp.zeros((TB, Hd), f32)
    cd = jnp.zeros((TB, Hd), f32)
    outs = []
    for t in range(T):
        g = x_term if t == 0 else (
            x_term
            + jnp.dot(hd.astype(mm_dt), whd, preferred_element_type=f32))
        hd, cd = lstm_step(g, cd, Hd)
        outs.append(hd)

    # Single lane-dense store of the whole (TB, T*Hd) decoder output slab.
    out_ref[...] = jnp.concatenate(outs, axis=-1).astype(out_ref.dtype)


# --------------------------------------------------------------------------- #
# Wrapper (fusion / padding / layout plumbing + pallas_call)
# --------------------------------------------------------------------------- #
def _round_up(n, m):
    return (n + m - 1) // m * m


def _pad_rows(w, rows_pad):
    if w.shape[0] == rows_pad:
        return w
    return jnp.pad(w, ((0, rows_pad - w.shape[0]), (0, 0)))


def _pad_reorder_gates(w, h, h_pad):
    """Split the 4H gate axis (PyTorch order i,f,g,o), zero-pad each gate from
    h to h_pad lanes, and re-order to (i, f, o, g) so the kernel can apply one
    contiguous sigmoid over [0:3*h_pad] and one tanh over [3*h_pad:4*h_pad]."""
    i, f, g, o = jnp.split(w, 4, axis=-1)
    if h_pad != h:
        pad = [(0, 0)] * (w.ndim - 1) + [(0, h_pad - h)]
        i, f, g, o = (jnp.pad(b, pad) for b in (i, f, g, o))
    return jnp.concatenate([i, f, o, g], axis=-1)


def _vmem_cap_bytes():
    """Generation-aware scoped-VMEM cap: v5*/v6* have 128 MiB physical VMEM,
    v7x only 64 MiB, so stay conservative unless we know we're on v5/v6."""
    try:
        kind = jax.devices()[0].device_kind.lower()
    except Exception:
        kind = ""
    big = ("v5" in kind) or ("v6" in kind)
    return (100 if big else 48) * 1024 * 1024


def lstm_autoencoder(x, params, *, batch_tile=None, param_dtype=jnp.float32):
    B, T, D = x.shape
    H = params["whe"].shape[0]

    # Hardware-friendly padded sizes: each gate block is a whole number of
    # 128-lane vregs, batch is padded to full sublanes.  Zero padding is exact
    # for the LSTM math (padded gates -> padded h, c stay 0).
    D_pad = _round_up(D, 128)
    H_pad = _round_up(H, 128)
    B_min = _round_up(B, 8)
    if batch_tile is None:
        # 256 rows fill the 256x256 MXU on v6e/v7x; split into >=2 tiles when
        # the batch allows, so the parallel grid axis can occupy both v7x TCs.
        batch_tile = min(B_min, 256)
        if B_min >= 16 and B_min // batch_tile < 2:
            batch_tile = _round_up(B_min // 2, 8)
    batch_tile = _round_up(batch_tile, 8)
    B_pad = _round_up(B_min, batch_tile)
    nb = B_pad // batch_tile

    p = {k: v.astype(jnp.float32) for k, v in params.items()}

    # Fuse encoder_fc -> decoder_fc -> decoder-LSTM input projection.  This is
    # exact: all three maps are linear with no nonlinearity in between, and the
    # decoder's input sequence is the same vector repeated T times.
    #   x_term = ((h_enc @ wfe + bfe) @ wfd + bfd) @ wid + bd
    w_dec = p["wfe"] @ p["wfd"] @ p["wid"]                          # (H, 4D)
    b_dec = (p["bfe"] @ p["wfd"] + p["bfd"]) @ p["wid"] + p["bd"]   # (1, 4D)

    wie = _pad_reorder_gates(_pad_rows(p["wie"], D_pad), H, H_pad)
    whe = _pad_reorder_gates(_pad_rows(p["whe"], H_pad), H, H_pad)
    be = _pad_reorder_gates(p["be"], H, H_pad)
    wdi = _pad_reorder_gates(_pad_rows(w_dec, H_pad), D, D_pad)
    bdi = _pad_reorder_gates(b_dec, D, D_pad)
    whd = _pad_reorder_gates(_pad_rows(p["whd"], D_pad), D, D_pad)
    weights = [w.astype(param_dtype) for w in (wie, whe, be, wdi, bdi, whd)]

    # Pad input and present it time-major (T, B_pad, D_pad) so the kernel reads
    # each step's pre-projected gate rows with a leading-axis index.
    xp = jnp.pad(x.astype(jnp.float32),
                 ((0, B_pad - B), (0, 0), (0, D_pad - D)))
    x_tm = jnp.transpose(xp, (1, 0, 2)).astype(param_dtype)

    # VMEM budget: double-buffered x/out tiles + weights + live gates buffer,
    # clamped to a generation-aware cap (v7x has only 64 MiB physical VMEM).
    itemsize = jnp.dtype(param_dtype).itemsize
    weight_bytes = sum(int(np.prod(w.shape)) * itemsize for w in weights)
    x_tile = T * batch_tile * D_pad * itemsize
    out_tile = batch_tile * T * D_pad * 4
    gates_live = T * batch_tile * 4 * H_pad * 4
    est = 2 * (x_tile + out_tile) + 2 * weight_bytes + gates_live + (2 << 20)
    vmem_limit = int(min(_vmem_cap_bytes(), max(32 * 1024 * 1024, 2 * est)))

    out2d = pl.pallas_call(
        _lstm_ae_kernel,
        grid=(nb,),
        in_specs=[pl.BlockSpec((T, batch_tile, D_pad), lambda i: (0, i, 0))]
                 + [pl.BlockSpec(w.shape, lambda i: (0, 0)) for w in weights],
        out_specs=pl.BlockSpec((batch_tile, T * D_pad), lambda i: (i, 0)),
        out_shape=jax.ShapeDtypeStruct((B_pad, T * D_pad), jnp.float32),
        compiler_params=pltpu.CompilerParams(
            dimension_semantics=("parallel",),
            vmem_limit_bytes=vmem_limit,
        ),
    )(x_tm, *weights)

    # Undo the lane-dense slab layout and strip padding.
    return out2d.reshape(B_pad, T, D_pad)[:B, :, :D]


# --------------------------------------------------------------------------- #
# Parameter init (PyTorch-style uniform, stored pre-transposed) and reference
# --------------------------------------------------------------------------- #
def init_params(key, input_dim, hidden_dim, latent_dim):
    D, H, L = input_dim, hidden_dim, latent_dim
    ks = jax.random.split(key, 12)

    def u(k, shape, fan):
        bound = 1.0 / float(np.sqrt(fan))
        return jax.random.uniform(k, shape, jnp.float32, -bound, bound)

    return dict(
        # encoder LSTM: PyTorch W_ih (4H, D), W_hh (4H, H) -> stored transposed
        wie=u(ks[0], (D, 4 * H), H),
        whe=u(ks[1], (H, 4 * H), H),
        be=u(ks[2], (1, 4 * H), H) + u(ks[3], (1, 4 * H), H),   # b_ih + b_hh
        # encoder_fc: Linear(H, L)
        wfe=u(ks[4], (H, L), H),
        bfe=u(ks[5], (1, L), H),
        # decoder_fc: Linear(L, H)
        wfd=u(ks[6], (L, H), L),
        bfd=u(ks[7], (1, H), L),
        # decoder LSTM: nn.LSTM(H, D) -> W_ih (4D, H), W_hh (4D, D) -> transposed
        wid=u(ks[8], (H, 4 * D), D),
        whd=u(ks[9], (D, 4 * D), D),
        bd=u(ks[10], (1, 4 * D), D) + u(ks[11], (1, 4 * D), D),
    )


def reference(x, p):
    """Pure-JAX reference with PyTorch nn.LSTM semantics (gate order i,f,g,o)."""
    B, T, D = x.shape

    def lstm(x_seq, w_ih_T, w_hh_T, b, Hsz):
        h = jnp.zeros((B, Hsz), jnp.float32)
        c = jnp.zeros((B, Hsz), jnp.float32)
        outs = []
        for t in range(T):
            gates = x_seq[:, t, :] @ w_ih_T + h @ w_hh_T + b
            i = jax.nn.sigmoid(gates[:, 0:Hsz])
            f = jax.nn.sigmoid(gates[:, Hsz:2 * Hsz])
            g = jnp.tanh(gates[:, 2 * Hsz:3 * Hsz])
            o = jax.nn.sigmoid(gates[:, 3 * Hsz:4 * Hsz])
            c = f * c + i * g
            h = o * jnp.tanh(c)
            outs.append(h)
        return jnp.stack(outs, axis=1), h

    H = p["whe"].shape[0]
    _, h_enc = lstm(x, p["wie"], p["whe"], p["be"][0], H)
    latent = h_enc @ p["wfe"] + p["bfe"][0]
    dec_in = latent @ p["wfd"] + p["bfd"][0]
    dec_seq = jnp.repeat(dec_in[:, None, :], T, axis=1)
    out, _ = lstm(dec_seq, p["wid"], p["whd"], p["bd"][0], D)
    return out


if __name__ == "__main__":
    B, T, D, H, L = 2, 8, 16, 32, 8   # batch, seq, input_dim, hidden_dim, latent_dim
    key = jax.random.PRNGKey(0)
    kx, kp = jax.random.split(key)
    x = jax.random.normal(kx, (B, T, D), jnp.float32)
    params = init_params(kp, D, H, L)

    fwd = jax.jit(lambda xx, pp: lstm_autoencoder(xx, pp))
    out = jax.block_until_ready(fwd(x, params))
    ref = jax.block_until_ready(reference(x, params))

    assert out.shape == (B, T, D)
    np.testing.assert_allclose(np.asarray(out), np.asarray(ref), rtol=1e-4, atol=1e-4)
    print("KERNEL_OK")
</pallas_src>

<mosaic_0001>
module attributes {stable_mosaic.version = 11 : i64} {
  func.func @_lstm_ae_kernel(%arg0: i32, %arg1: memref<8x8x128xf32, #tpu.memory_space<vmem>>, %arg2: memref<128x512xf32, #tpu.memory_space<vmem>>, %arg3: memref<128x512xf32, #tpu.memory_space<vmem>>, %arg4: memref<1x512xf32, #tpu.memory_space<vmem>>, %arg5: memref<128x512xf32, #tpu.memory_space<vmem>>, %arg6: memref<1x512xf32, #tpu.memory_space<vmem>>, %arg7: memref<128x512xf32, #tpu.memory_space<vmem>>, %arg8: memref<8x1024xf32, #tpu.memory_space<vmem>>) attributes {dimension_semantics = [#tpu.dimension_semantics<parallel>], iteration_bounds = array<i64: 1>, scalar_prefetch = 0 : i64, scratch_operands = 0 : i64, tpu.core_type = #tpu.core_type<tc>, window_params = [{transform_indices = @transform_0, window_bounds = array<i64: 8, 8, 128>}, {pipeline_mode = #tpu.pipeline_mode<synchronous>, transform_indices = @transform_1, window_bounds = array<i64: 128, 512>}, {pipeline_mode = #tpu.pipeline_mode<synchronous>, transform_indices = @transform_2, window_bounds = array<i64: 128, 512>}, {pipeline_mode = #tpu.pipeline_mode<synchronous>, transform_indices = @transform_3, window_bounds = array<i64: 1, 512>}, {pipeline_mode = #tpu.pipeline_mode<synchronous>, transform_indices = @transform_4, window_bounds = array<i64: 128, 512>}, {pipeline_mode = #tpu.pipeline_mode<synchronous>, transform_indices = @transform_5, window_bounds = array<i64: 1, 512>}, {pipeline_mode = #tpu.pipeline_mode<synchronous>, transform_indices = @transform_6, window_bounds = array<i64: 128, 512>}, {transform_indices = @transform_7, window_bounds = array<i64: 8, 1024>}]} {
    %c0 = arith.constant 0 : index
    %c0_0 = arith.constant 0 : index
    %0 = vector.load %arg2[%c0, %c0_0] : memref<128x512xf32, #tpu.memory_space<vmem>>, vector<128x512xf32>
    %c0_1 = arith.constant 0 : index
    %c0_2 = arith.constant 0 : index
    %c0_3 = arith.constant 0 : index
    %1 = vector.load %arg1[%c0_1, %c0_2, %c0_3] : memref<8x8x128xf32, #tpu.memory_space<vmem>>, vector<8x8x128xf32>
    %2 = vector.shape_cast %1 : vector<8x8x128xf32> to vector<64x128xf32>
    %cst = arith.constant dense<0.000000e+00> : vector<64x512xf32>
    %3 = tpu.matmul %2, %0, %cst {dimension_numbers = #tpu.dot_dimension_numbers<[1], [0], [0], [1], [0, 0, 1, 1], [], []>} : vector<64x128xf32>, vector<128x512xf32>, vector<64x512xf32> -> vector<64x512xf32>
    %c0_4 = arith.constant 0 : index
    %c0_5 = arith.constant 0 : index
    %4 = vector.load %arg4[%c0_4, %c0_5] : memref<1x512xf32, #tpu.memory_space<vmem>>, vector<1x512xf32>
    %5 = vector.broadcast %4 : vector<1x512xf32> to vector<64x512xf32>
    %6 = arith.addf %3, %5 : vector<64x512xf32>
    %7 = vector.shape_cast %6 : vector<64x512xf32> to vector<8x8x512xf32>
    %c0_6 = arith.constant 0 : index
    %c0_7 = arith.constant 0 : index
    %8 = vector.load %arg3[%c0_6, %c0_7] : memref<128x512xf32, #tpu.memory_space<vmem>>, vector<128x512xf32>
    %cst_8 = arith.constant 0.000000e+00 : f32
    %9 = vector.broadcast %cst_8 : f32 to vector<8x128xf32>
    %10 = vector.extract_strided_slice %7 {offsets = [0, 0, 0], sizes = [1, 8, 512], strides = [1, 1, 1]} : vector<8x8x512xf32> to vector<1x8x512xf32>
    %11 = vector.shape_cast %10 : vector<1x8x512xf32> to vector<8x512xf32>
    %12 = vector.extract_strided_slice %11 {offsets = [0, 0], sizes = [8, 384], strides = [1, 1]} : vector<8x512xf32> to vector<8x384xf32>
    %13 = arith.negf %12 : vector<8x384xf32>
    %14 = math.exp %13 : vector<8x384xf32>
    %cst_9 = arith.constant 1.000000e+00 : f32
    %15 = vector.broadcast %cst_9 : f32 to vector<8x384xf32>
    %16 = arith.addf %15, %14 : vector<8x384xf32>
    %17 = arith.divf %15, %16 : vector<8x384xf32>
    %18 = vector.extract_strided_slice %11 {offsets = [0, 384], sizes = [8, 128], strides = [1, 1]} : vector<8x512xf32> to vector<8x128xf32>
    %19 = math.tanh %18 : vector<8x128xf32>
    %20 = vector.extract_strided_slice %17 {offsets = [0, 0], sizes = [8, 128], strides = [1, 1]} : vector<8x384xf32> to vector<8x128xf32>
    %21 = vector.extract_strided_slice %17 {offsets = [0, 128], sizes = [8, 128], strides = [1, 1]} : vector<8x384xf32> to vector<8x128xf32>
    %22 = vector.extract_strided_slice %17 {offsets = [0, 256], sizes = [8, 128], strides = [1, 1]} : vector<8x384xf32> to vector<8x128xf32>
    %23 = arith.mulf %21, %9 : vector<8x128xf32>
    %24 = arith.mulf %20, %19 : vector<8x128xf32>
    %25 = arith.addf %23, %24 : vector<8x128xf32>
    %26 = math.tanh %25 : vector<8x128xf32>
    %27 = arith.mulf %22, %26 : vector<8x128xf32>
    %28 = vector.extract_strided_slice %7 {offsets = [1, 0, 0], sizes = [1, 8, 512], strides = [1, 1, 1]} : vector<8x8x512xf32> to vector<1x8x512xf32>
    %29 = vector.shape_cast %28 : vector<1x8x512xf32> to vector<8x512xf32>
    %cst_10 = arith.constant dense<0.000000e+00> : vector<8x512xf32>
    %30 = tpu.matmul %27, %8, %cst_10 {dimension_numbers = #tpu.dot_dimension_numbers<[1], [0], [0], [1], [0, 0, 1, 1], [], []>} : vector<8x128xf32>, vector<128x512xf32>, vector<8x512xf32> -> vector<8x512xf32>
    %31 = arith.addf %29, %30 : vector<8x512xf32>
    %32 = vector.extract_strided_slice %31 {offsets = [0, 0], sizes = [8, 384], strides = [1, 1]} : vector<8x512xf32> to vector<8x384xf32>
    %33 = arith.negf %32 : vector<8x384xf32>
    %34 = math.exp %33 : vector<8x384xf32>
    %cst_11 = arith.constant 1.000000e+00 : f32
    %35 = vector.broadcast %cst_11 : f32 to vector<8x384xf32>
    %36 = arith.addf %35, %34 : vector<8x384xf32>
    %37 = arith.divf %35, %36 : vector<8x384xf32>
    %38 = vector.extract_strided_slice %31 {offsets = [0, 384], sizes = [8, 128], strides = [1, 1]} : vector<8x512xf32> to vector<8x128xf32>
    %39 = math.tanh %38 : vector<8x128xf32>
    %40 = vector.extract_strided_slice %37 {offsets = [0, 0], sizes = [8, 128], strides = [1, 1]} : vector<8x384xf32> to vector<8x128xf32>
    %41 = vector.extract_strided_slice %37 {offsets = [0, 128], sizes = [8, 128], strides = [1, 1]} : vector<8x384xf32> to vector<8x128xf32>
    %42 = vector.extract_strided_slice %37 {offsets = [0, 256], sizes = [8, 128], strides = [1, 1]} : vector<8x384xf32> to vector<8x128xf32>
    %43 = arith.mulf %41, %25 : vector<8x128xf32>
    %44 = arith.mulf %40, %39 : vector<8x128xf32>
    %45 = arith.addf %43, %44 : vector<8x128xf32>
    %46 = math.tanh %45 : vector<8x128xf32>
    %47 = arith.mulf %42, %46 : vector<8x128xf32>
    %48 = vector.extract_strided_slice %7 {offsets = [2, 0, 0], sizes = [1, 8, 512], strides = [1, 1, 1]} : vector<8x8x512xf32> to vector<1x8x512xf32>
    %49 = vector.shape_cast %48 : vector<1x8x512xf32> to vector<8x512xf32>
    %cst_12 = arith.constant dense<0.000000e+00> : vector<8x512xf32>
    %50 = tpu.matmul %47, %8, %cst_12 {dimension_numbers = #tpu.dot_dimension_numbers<[1], [0], [0], [1], [0, 0, 1, 1], [], []>} : vector<8x128xf32>, vector<128x512xf32>, vector<8x512xf32> -> vector<8x512xf32>
    %51 = arith.addf %49, %50 : vector<8x512xf32>
    %52 = vector.extract_strided_slice %51 {offsets = [0, 0], sizes = [8, 384], strides = [1, 1]} : vector<8x512xf32> to vector<8x384xf32>
    %53 = arith.negf %52 : vector<8x384xf32>
    %54 = math.exp %53 : vector<8x384xf32>
    %cst_13 = arith.constant 1.000000e+00 : f32
    %55 = vector.broadcast %cst_13 : f32 to vector<8x384xf32>
    %56 = arith.addf %55, %54 : vector<8x384xf32>
    %57 = arith.divf %55, %56 : vector<8x384xf32>
    %58 = vector.extract_strided_slice %51 {offsets = [0, 384], sizes = [8, 128], strides = [1, 1]} : vector<8x512xf32> to vector<8x128xf32>
    %59 = math.tanh %58 : vector<8x128xf32>
    %60 = vector.extract_strided_slice %57 {offsets = [0, 0], sizes = [8, 128], strides = [1, 1]} : vector<8x384xf32> to vector<8x128xf32>
    %61 = vector.extract_strided_slice %57 {offsets = [0, 128], sizes = [8, 128], strides = [1, 1]} : vector<8x384xf32> to vector<8x128xf32>
    %62 = vector.extract_strided_slice %57 {offsets = [0, 256], sizes = [8, 128], strides = [1, 1]} : vector<8x384xf32> to vector<8x128xf32>
    %63 = arith.mulf %61, %45 : vector<8x128xf32>
    %64 = arith.mulf %60, %59 : vector<8x128xf32>
    %65 = arith.addf %63, %64 : vector<8x128xf32>
    %66 = math.tanh %65 : vector<8x128xf32>
    %67 = arith.mulf %62, %66 : vector<8x128xf32>
    %68 = vector.extract_strided_slice %7 {offsets = [3, 0, 0], sizes = [1, 8, 512], strides = [1, 1, 1]} : vector<8x8x512xf32> to vector<1x8x512xf32>
    %69 = vector.shape_cast %68 : vector<1x8x512xf32> to vector<8x512xf32>
    %cst_14 = arith.constant dense<0.000000e+00> : vector<8x512xf32>
    %70 = tpu.matmul %67, %8, %cst_14 {dimension_numbers = #tpu.dot_dimension_numbers<[1], [0], [0], [1], [0, 0, 1, 1], [], []>} : vector<8x128xf32>, vector<128x512xf32>, vector<8x512xf32> -> vector<8x512xf32>
    %71 = arith.addf %69, %70 : vector<8x512xf32>
    %72 = vector.extract_strided_slice %71 {offsets = [0, 0], sizes = [8, 384], strides = [1, 1]} : vector<8x512xf32> to vector<8x384xf32>
    %73 = arith.negf %72 : vector<8x384xf32>
    %74 = math.exp %73 : vector<8x384xf32>
    %cst_15 = arith.constant 1.000000e+00 : f32
    %75 = vector.broadcast %cst_15 : f32 to vector<8x384xf32>
    %76 = arith.addf %75, %74 : vector<8x384xf32>
    %77 = arith.divf %75, %76 : vector<8x384xf32>
    %78 = vector.extract_strided_slice %71 {offsets = [0, 384], sizes = [8, 128], strides = [1, 1]} : vector<8x512xf32> to vector<8x128xf32>
    %79 = math.tanh %78 : vector<8x128xf32>
    %80 = vector.extract_strided_slice %77 {offsets = [0, 0], sizes = [8, 128], strides = [1, 1]} : vector<8x384xf32> to vector<8x128xf32>
    %81 = vector.extract_strided_slice %77 {offsets = [0, 128], sizes = [8, 128], strides = [1, 1]} : vector<8x384xf32> to vector<8x128xf32>
    %82 = vector.extract_strided_slice %77 {offsets = [0, 256], sizes = [8, 128], strides = [1, 1]} : vector<8x384xf32> to vector<8x128xf32>
    %83 = arith.mulf %81, %65 : vector<8x128xf32>
    %84 = arith.mulf %80, %79 : vector<8x128xf32>
    %85 = arith.addf %83, %84 : vector<8x128xf32>
    %86 = math.tanh %85 : vector<8x128xf32>
    %87 = arith.mulf %82, %86 : vector<8x128xf32>
    %88 = vector.extract_strided_slice %7 {offsets = [4, 0, 0], sizes = [1, 8, 512], strides = [1, 1, 1]} : vector<8x8x512xf32> to vector<1x8x512xf32>
    %89 = vector.shape_cast %88 : vector<1x8x512xf32> to vector<8x512xf32>
    %cst_16 = arith.constant dense<0.000000e+00> : vector<8x512xf32>
    %90 = tpu.matmul %87, %8, %cst_16 {dimension_numbers = #tpu.dot_dimension_numbers<[1], [0], [0], [1], [0, 0, 1, 1], [], []>} : vector<8x128xf32>, vector<128x512xf32>, vector<8x512xf32> -> vector<8x512xf32>
    %91 = arith.addf %89, %90 : vector<8x512xf32>
    %92 = vector.extract_strided_slice %91 {offsets = [0, 0], sizes = [8, 384], strides = [1, 1]} : vector<8x512xf32> to vector<8x384xf32>
    %93 = arith.negf %92 : vector<8x384xf32>
    %94 = math.exp %93 : vector<8x384xf32>
    %cst_17 = arith.constant 1.000000e+00 : f32
    %95 = vector.broadcast %cst_17 : f32 to vector<8x384xf32>
    %96 = arith.addf %95, %94 : vector<8x384xf32>
    %97 = arith.divf %95, %96 : vector<8x384xf32>
    %98 = vector.extract_strided_slice %91 {offsets = [0, 384], sizes = [8, 128], strides = [1, 1]} : vector<8x512xf32> to vector<8x128xf32>
    %99 = math.tanh %98 : vector<8x128xf32>
    %100 = vector.extract_strided_slice %97 {offsets = [0, 0], sizes = [8, 128], strides = [1, 1]} : vector<8x384xf32> to vector<8x128xf32>
    %101 = vector.extract_strided_slice %97 {offsets = [0, 128], sizes = [8, 128], strides = [1, 1]} : vector<8x384xf32> to vector<8x128xf32>
    %102 = vector.extract_strided_slice %97 {offsets = [0, 256], sizes = [8, 128], strides = [1, 1]} : vector<8x384xf32> to vector<8x128xf32>
    %103 = arith.mulf %101, %85 : vector<8x128xf32>
    %104 = arith.mulf %100, %99 : vector<8x128xf32>
    %105 = arith.addf %103, %104 : vector<8x128xf32>
    %106 = math.tanh %105 : vector<8x128xf32>
    %107 = arith.mulf %102, %106 : vector<8x128xf32>
    %108 = vector.extract_strided_slice %7 {offsets = [5, 0, 0], sizes = [1, 8, 512], strides = [1, 1, 1]} : vector<8x8x512xf32> to vector<1x8x512xf32>
    %109 = vector.shape_cast %108 : vector<1x8x512xf32> to vector<8x512xf32>
    %cst_18 = arith.constant dense<0.000000e+00> : vector<8x512xf32>
    %110 = tpu.matmul %107, %8, %cst_18 {dimension_numbers = #tpu.dot_dimension_numbers<[1], [0], [0], [1], [0, 0, 1, 1], [], []>} : vector<8x128xf32>, vector<128x512xf32>, vector<8x512xf32> -> vector<8x512xf32>
    %111 = arith.addf %109, %110 : vector<8x512xf32>
    %112 = vector.extract_strided_slice %111 {offsets = [0, 0], sizes = [8, 384], strides = [1, 1]} : vector<8x512xf32> to vector<8x384xf32>
    %113 = arith.negf %112 : vector<8x384xf32>
    %114 = math.exp %113 : vector<8x384xf32>
    %cst_19 = arith.constant 1.000000e+00 : f32
    %115 = vector.broadcast %cst_19 : f32 to vector<8x384xf32>
    %116 = arith.addf %115, %114 : vector<8x384xf32>
    %117 = arith.divf %115, %116 : vector<8x384xf32>
    %118 = vector.extract_strided_slice %111 {offsets = [0, 384], sizes = [8, 128], strides = [1, 1]} : vector<8x512xf32> to vector<8x128xf32>
    %119 = math.tanh %118 : vector<8x128xf32>
    %120 = vector.extract_strided_slice %117 {offsets = [0, 0], sizes = [8, 128], strides = [1, 1]} : vector<8x384xf32> to vector<8x128xf32>
    %121 = vector.extract_strided_slice %117 {offsets = [0, 128], sizes = [8, 128], strides = [1, 1]} : vector<8x384xf32> to vector<8x128xf32>
    %122 = vector.extract_strided_slice %117 {offsets = [0, 256], sizes = [8, 128], strides = [1, 1]} : vector<8x384xf32> to vector<8x128xf32>
    %123 = arith.mulf %121, %105 : vector<8x128xf32>
    %124 = arith.mulf %120, %119 : vector<8x128xf32>
    %125 = arith.addf %123, %124 : vector<8x128xf32>
    %126 = math.tanh %125 : vector<8x128xf32>
    %127 = arith.mulf %122, %126 : vector<8x128xf32>
    %128 = vector.extract_strided_slice %7 {offsets = [6, 0, 0], sizes = [1, 8, 512], strides = [1, 1, 1]} : vector<8x8x512xf32> to vector<1x8x512xf32>
    %129 = vector.shape_cast %128 : vector<1x8x512xf32> to vector<8x512xf32>
    %cst_20 = arith.constant dense<0.000000e+00> : vector<8x512xf32>
    %130 = tpu.matmul %127, %8, %cst_20 {dimension_numbers = #tpu.dot_dimension_numbers<[1], [0], [0], [1], [0, 0, 1, 1], [], []>} : vector<8x128xf32>, vector<128x512xf32>, vector<8x512xf32> -> vector<8x512xf32>
    %131 = arith.addf %129, %130 : vector<8x512xf32>
    %132 = vector.extract_strided_slice %131 {offsets = [0, 0], sizes = [8, 384], strides = [1, 1]} : vector<8x512xf32> to vector<8x384xf32>
    %133 = arith.negf %132 : vector<8x384xf32>
    %134 = math.exp %133 : vector<8x384xf32>
    %cst_21 = arith.constant 1.000000e+00 : f32
    %135 = vector.broadcast %cst_21 : f32 to vector<8x384xf32>
    %136 = arith.addf %135, %134 : vector<8x384xf32>
    %137 = arith.divf %135, %136 : vector<8x384xf32>
    %138 = vector.extract_strided_slice %131 {offsets = [0, 384], sizes = [8, 128], strides = [1, 1]} : vector<8x512xf32> to vector<8x128xf32>
    %139 = math.tanh %138 : vector<8x128xf32>
    %140 = vector.extract_strided_slice %137 {offsets = [0, 0], sizes = [8, 128], strides = [1, 1]} : vector<8x384xf32> to vector<8x128xf32>
    %141 = vector.extract_strided_slice %137 {offsets = [0, 128], sizes = [8, 128], strides = [1, 1]} : vector<8x384xf32> to vector<8x128xf32>
    %142 = vector.extract_strided_slice %137 {offsets = [0, 256], sizes = [8, 128], strides = [1, 1]} : vector<8x384xf32> to vector<8x128xf32>
    %143 = arith.mulf %141, %125 : vector<8x128xf32>
    %144 = arith.mulf %140, %139 : vector<8x128xf32>
    %145 = arith.addf %143, %144 : vector<8x128xf32>
    %146 = math.tanh %145 : vector<8x128xf32>
    %147 = arith.mulf %142, %146 : vector<8x128xf32>
    %148 = vector.extract_strided_slice %7 {offsets = [7, 0, 0], sizes = [1, 8, 512], strides = [1, 1, 1]} : vector<8x8x512xf32> to vector<1x8x512xf32>
    %149 = vector.shape_cast %148 : vector<1x8x512xf32> to vector<8x512xf32>
    %cst_22 = arith.constant dense<0.000000e+00> : vector<8x512xf32>
    %150 = tpu.matmul %147, %8, %cst_22 {dimension_numbers = #tpu.dot_dimension_numbers<[1], [0], [0], [1], [0, 0, 1, 1], [], []>} : vector<8x128xf32>, vector<128x512xf32>, vector<8x512xf32> -> vector<8x512xf32>
    %151 = arith.addf %149, %150 : vector<8x512xf32>
    %152 = vector.extract_strided_slice %151 {offsets = [0, 0], sizes = [8, 384], strides = [1, 1]} : vector<8x512xf32> to vector<8x384xf32>
    %153 = arith.negf %152 : vector<8x384xf32>
    %154 = math.exp %153 : vector<8x384xf32>
    %cst_23 = arith.constant 1.000000e+00 : f32
    %155 = vector.broadcast %cst_23 : f32 to vector<8x384xf32>
    %156 = arith.addf %155, %154 : vector<8x384xf32>
    %157 = arith.divf %155, %156 : vector<8x384xf32>
    %158 = vector.extract_strided_slice %151 {offsets = [0, 384], sizes = [8, 128], strides = [1, 1]} : vector<8x512xf32> to vector<8x128xf32>
    %159 = math.tanh %158 : vector<8x128xf32>
    %160 = vector.extract_strided_slice %157 {offsets = [0, 0], sizes = [8, 128], strides = [1, 1]} : vector<8x384xf32> to vector<8x128xf32>
    %161 = vector.extract_strided_slice %157 {offsets = [0, 128], sizes = [8, 128], strides = [1, 1]} : vector<8x384xf32> to vector<8x128xf32>
    %162 = vector.extract_strided_slice %157 {offsets = [0, 256], sizes = [8, 128], strides = [1, 1]} : vector<8x384xf32> to vector<8x128xf32>
    %163 = arith.mulf %161, %145 : vector<8x128xf32>
    %164 = arith.mulf %160, %159 : vector<8x128xf32>
    %165 = arith.addf %163, %164 : vector<8x128xf32>
    %166 = math.tanh %165 : vector<8x128xf32>
    %167 = arith.mulf %162, %166 : vector<8x128xf32>
    %c0_24 = arith.constant 0 : index
    %c0_25 = arith.constant 0 : index
    %168 = vector.load %arg5[%c0_24, %c0_25] : memref<128x512xf32, #tpu.memory_space<vmem>>, vector<128x512xf32>
    %cst_26 = arith.constant dense<0.000000e+00> : vector<8x512xf32>
    %169 = tpu.matmul %167, %168, %cst_26 {dimension_numbers = #tpu.dot_dimension_numbers<[1], [0], [0], [1], [0, 0, 1, 1], [], []>} : vector<8x128xf32>, vector<128x512xf32>, vector<8x512xf32> -> vector<8x512xf32>
    %c0_27 = arith.constant 0 : index
    %c0_28 = arith.constant 0 : index
    %170 = vector.load %arg6[%c0_27, %c0_28] : memref<1x512xf32, #tpu.memory_space<vmem>>, vector<1x512xf32>
    %171 = vector.broadcast %170 : vector<1x512xf32> to vector<8x512xf32>
    %172 = arith.addf %169, %171 : vector<8x512xf32>
    %c0_29 = arith.constant 0 : index
    %c0_30 = arith.constant 0 : index
    %173 = vector.load %arg7[%c0_29, %c0_30] : memref<128x512xf32, #tpu.memory_space<vmem>>, vector<128x512xf32>
    %cst_31 = arith.constant 0.000000e+00 : f32
    %174 = vector.broadcast %cst_31 : f32 to vector<8x128xf32>
    %175 = vector.extract_strided_slice %172 {offsets = [0, 0], sizes = [8, 384], strides = [1, 1]} : vector<8x512xf32> to vector<8x384xf32>
    %176 = arith.negf %175 : vector<8x384xf32>
    %177 = math.exp %176 : vector<8x384xf32>
    %cst_32 = arith.constant 1.000000e+00 : f32
    %178 = vector.broadcast %cst_32 : f32 to vector<8x384xf32>
    %179 = arith.addf %178, %177 : vector<8x384xf32>
    %180 = arith.divf %178, %179 : vector<8x384xf32>
    %181 = vector.extract_strided_slice %172 {offsets = [0, 384], sizes = [8, 128], strides = [1, 1]} : vector<8x512xf32> to vector<8x128xf32>
    %182 = math.tanh %181 : vector<8x128xf32>
    %183 = vector.extract_strided_slice %180 {offsets = [0, 0], sizes = [8, 128], strides = [1, 1]} : vector<8x384xf32> to vector<8x128xf32>
    %184 = vector.extract_strided_slice %180 {offsets = [0, 128], sizes = [8, 128], strides = [1, 1]} : vector<8x384xf32> to vector<8x128xf32>
    %185 = vector.extract_strided_slice %180 {offsets = [0, 256], sizes = [8, 128], strides = [1, 1]} : vector<8x384xf32> to vector<8x128xf32>
    %186 = arith.mulf %184, %174 : vector<8x128xf32>
    %187 = arith.mulf %183, %182 : vector<8x128xf32>
    %188 = arith.addf %186, %187 : vector<8x128xf32>
    %189 = math.tanh %188 : vector<8x128xf32>
    %190 = arith.mulf %185, %189 : vector<8x128xf32>
    %cst_33 = arith.constant dense<0.000000e+00> : vector<8x512xf32>
    %191 = tpu.matmul %190, %173, %cst_33 {dimension_numbers = #tpu.dot_dimension_numbers<[1], [0], [0], [1], [0, 0, 1, 1], [], []>} : vector<8x128xf32>, vector<128x512xf32>, vector<8x512xf32> -> vector<8x512xf32>
    %192 = arith.addf %172, %191 : vector<8x512xf32>
    %193 = vector.extract_strided_slice %192 {offsets = [0, 0], sizes = [8, 384], strides = [1, 1]} : vector<8x512xf32> to vector<8x384xf32>
    %194 = arith.negf %193 : vector<8x384xf32>
    %195 = math.exp %194 : vector<8x384xf32>
    %cst_34 = arith.constant 1.000000e+00 : f32
    %196 = vector.broadcast %cst_34 : f32 to vector<8x384xf32>
    %197 = arith.addf %196, %195 : vector<8x384xf32>
    %198 = arith.divf %196, %197 : vector<8x384xf32>
    %199 = vector.extract_strided_slice %192 {offsets = [0, 384], sizes = [8, 128], strides = [1, 1]} : vector<8x512xf32> to vector<8x128xf32>
    %200 = math.tanh %199 : vector<8x128xf32>
    %201 = vector.extract_strided_slice %198 {offsets = [0, 0], sizes = [8, 128], strides = [1, 1]} : vector<8x384xf32> to vector<8x128xf32>
    %202 = vector.extract_strided_slice %198 {offsets = [0, 128], sizes = [8, 128], strides = [1, 1]} : vector<8x384xf32> to vector<8x128xf32>
    %203 = vector.extract_strided_slice %198 {offsets = [0, 256], sizes = [8, 128], strides = [1, 1]} : vector<8x384xf32> to vector<8x128xf32>
    %204 = arith.mulf %202, %188 : vector<8x128xf32>
    %205 = arith.mulf %201, %200 : vector<8x128xf32>
    %206 = arith.addf %204, %205 : vector<8x128xf32>
    %207 = math.tanh %206 : vector<8x128xf32>
    %208 = arith.mulf %203, %207 : vector<8x128xf32>
    %cst_35 = arith.constant dense<0.000000e+00> : vector<8x512xf32>
    %209 = tpu.matmul %208, %173, %cst_35 {dimension_numbers = #tpu.dot_dimension_numbers<[1], [0], [0], [1], [0, 0, 1, 1], [], []>} : vector<8x128xf32>, vector<128x512xf32>, vector<8x512xf32> -> vector<8x512xf32>
    %210 = arith.addf %172, %209 : vector<8x512xf32>
    %211 = vector.extract_strided_slice %210 {offsets = [0, 0], sizes = [8, 384], strides = [1, 1]} : vector<8x512xf32> to vector<8x384xf32>
    %212 = arith.negf %211 : vector<8x384xf32>
    %213 = math.exp %212 : vector<8x384xf32>
    %cst_36 = arith.constant 1.000000e+00 : f32
    %214 = vector.broadcast %cst_36 : f32 to vector<8x384xf32>
    %215 = arith.addf %214, %213 : vector<8x384xf32>
    %216 = arith.divf %214, %215 : vector<8x384xf32>
    %217 = vector.extract_strided_slice %210 {offsets = [0, 384], sizes = [8, 128], strides = [1, 1]} : vector<8x512xf32> to vector<8x128xf32>
    %218 = math.tanh %217 : vector<8x128xf32>
    %219 = vector.extract_strided_slice %216 {offsets = [0, 0], sizes = [8, 128], strides = [1, 1]} : vector<8x384xf32> to vector<8x128xf32>
    %220 = vector.extract_strided_slice %216 {offsets = [0, 128], sizes = [8, 128], strides = [1, 1]} : vector<8x384xf32> to vector<8x128xf32>
    %221 = vector.extract_strided_slice %216 {offsets = [0, 256], sizes = [8, 128], strides = [1, 1]} : vector<8x384xf32> to vector<8x128xf32>
    %222 = arith.mulf %220, %206 : vector<8x128xf32>
    %223 = arith.mulf %219, %218 : vector<8x128xf32>
    %224 = arith.addf %222, %223 : vector<8x128xf32>
    %225 = math.tanh %224 : vector<8x128xf32>
    %226 = arith.mulf %221, %225 : vector<8x128xf32>
    %cst_37 = arith.constant dense<0.000000e+00> : vector<8x512xf32>
    %227 = tpu.matmul %226, %173, %cst_37 {dimension_numbers = #tpu.dot_dimension_numbers<[1], [0], [0], [1], [0, 0, 1, 1], [], []>} : vector<8x128xf32>, vector<128x512xf32>, vector<8x512xf32> -> vector<8x512xf32>
    %228 = arith.addf %172, %227 : vector<8x512xf32>
    %229 = vector.extract_strided_slice %228 {offsets = [0, 0], sizes = [8, 384], strides = [1, 1]} : vector<8x512xf32> to vector<8x384xf32>
    %230 = arith.negf %229 : vector<8x384xf32>
    %231 = math.exp %230 : vector<8x384xf32>
    %cst_38 = arith.constant 1.000000e+00 : f32
    %232 = vector.broadcast %cst_38 : f32 to vector<8x384xf32>
    %233 = arith.addf %232, %231 : vector<8x384xf32>
    %234 = arith.divf %232, %233 : vector<8x384xf32>
    %235 = vector.extract_strided_slice %228 {offsets = [0, 384], sizes = [8, 128], strides = [1, 1]} : vector<8x512xf32> to vector<8x128xf32>
    %236 = math.tanh %235 : vector<8x128xf32>
    %237 = vector.extract_strided_slice %234 {offsets = [0, 0], sizes = [8, 128], strides = [1, 1]} : vector<8x384xf32> to vector<8x128xf32>
    %238 = vector.extract_strided_slice %234 {offsets = [0, 128], sizes = [8, 128], strides = [1, 1]} : vector<8x384xf32> to vector<8x128xf32>
    %239 = vector.extract_strided_slice %234 {offsets = [0, 256], sizes = [8, 128], strides = [1, 1]} : vector<8x384xf32> to vector<8x128xf32>
    %240 = arith.mulf %238, %224 : vector<8x128xf32>
    %241 = arith.mulf %237, %236 : vector<8x128xf32>
    %242 = arith.addf %240, %241 : vector<8x128xf32>
    %243 = math.tanh %242 : vector<8x128xf32>
    %244 = arith.mulf %239, %243 : vector<8x128xf32>
    %cst_39 = arith.constant dense<0.000000e+00> : vector<8x512xf32>
    %245 = tpu.matmul %244, %173, %cst_39 {dimension_numbers = #tpu.dot_dimension_numbers<[1], [0], [0], [1], [0, 0, 1, 1], [], []>} : vector<8x128xf32>, vector<128x512xf32>, vector<8x512xf32> -> vector<8x512xf32>
    %246 = arith.addf %172, %245 : vector<8x512xf32>
    %247 = vector.extract_strided_slice %246 {offsets = [0, 0], sizes = [8, 384], strides = [1, 1]} : vector<8x512xf32> to vector<8x384xf32>
    %248 = arith.negf %247 : vector<8x384xf32>
    %249 = math.exp %248 : vector<8x384xf32>
    %cst_40 = arith.constant 1.000000e+00 : f32
    %250 = vector.broadcast %cst_40 : f32 to vector<8x384xf32>
    %251 = arith.addf %250, %249 : vector<8x384xf32>
    %252 = arith.divf %250, %251 : vector<8x384xf32>
    %253 = vector.extract_strided_slice %246 {offsets = [0, 384], sizes = [8, 128], strides = [1, 1]} : vector<8x512xf32> to vector<8x128xf32>
    %254 = math.tanh %253 : vector<8x128xf32>
    %255 = vector.extract_strided_slice %252 {offsets = [0, 0], sizes = [8, 128], strides = [1, 1]} : vector<8x384xf32> to vector<8x128xf32>
    %256 = vector.extract_strided_slice %252 {offsets = [0, 128], sizes = [8, 128], strides = [1, 1]} : vector<8x384xf32> to vector<8x128xf32>
    %257 = vector.extract_strided_slice %252 {offsets = [0, 256], sizes = [8, 128], strides = [1, 1]} : vector<8x384xf32> to vector<8x128xf32>
    %258 = arith.mulf %256, %242 : vector<8x128xf32>
    %259 = arith.mulf %255, %254 : vector<8x128xf32>
    %260 = arith.addf %258, %259 : vector<8x128xf32>
    %261 = math.tanh %260 : vector<8x128xf32>
    %262 = arith.mulf %257, %261 : vector<8x128xf32>
    %cst_41 = arith.constant dense<0.000000e+00> : vector<8x512xf32>
    %263 = tpu.matmul %262, %173, %cst_41 {dimension_numbers = #tpu.dot_dimension_numbers<[1], [0], [0], [1], [0, 0, 1, 1], [], []>} : vector<8x128xf32>, vector<128x512xf32>, vector<8x512xf32> -> vector<8x512xf32>
    %264 = arith.addf %172, %263 : vector<8x512xf32>
    %265 = vector.extract_strided_slice %264 {offsets = [0, 0], sizes = [8, 384], strides = [1, 1]} : vector<8x512xf32> to vector<8x384xf32>
    %266 = arith.negf %265 : vector<8x384xf32>
    %267 = math.exp %266 : vector<8x384xf32>
    %cst_42 = arith.constant 1.000000e+00 : f32
    %268 = vector.broadcast %cst_42 : f32 to vector<8x384xf32>
    %269 = arith.addf %268, %267 : vector<8x384xf32>
    %270 = arith.divf %268, %269 : vector<8x384xf32>
    %271 = vector.extract_strided_slice %264 {offsets = [0, 384], sizes = [8, 128], strides = [1, 1]} : vector<8x512xf32> to vector<8x128xf32>
    %272 = math.tanh %271 : vector<8x128xf32>
    %273 = vector.extract_strided_slice %270 {offsets = [0, 0], sizes = [8, 128], strides = [1, 1]} : vector<8x384xf32> to vector<8x128xf32>
    %274 = vector.extract_strided_slice %270 {offsets = [0, 128], sizes = [8, 128], strides = [1, 1]} : vector<8x384xf32> to vector<8x128xf32>
    %275 = vector.extract_strided_slice %270 {offsets = [0, 256], sizes = [8, 128], strides = [1, 1]} : vector<8x384xf32> to vector<8x128xf32>
    %276 = arith.mulf %274, %260 : vector<8x128xf32>
    %277 = arith.mulf %273, %272 : vector<8x128xf32>
    %278 = arith.addf %276, %277 : vector<8x128xf32>
    %279 = math.tanh %278 : vector<8x128xf32>
    %280 = arith.mulf %275, %279 : vector<8x128xf32>
    %cst_43 = arith.constant dense<0.000000e+00> : vector<8x512xf32>
    %281 = tpu.matmul %280, %173, %cst_43 {dimension_numbers = #tpu.dot_dimension_numbers<[1], [0], [0], [1], [0, 0, 1, 1], [], []>} : vector<8x128xf32>, vector<128x512xf32>, vector<8x512xf32> -> vector<8x512xf32>
    %282 = arith.addf %172, %281 : vector<8x512xf32>
    %283 = vector.extract_strided_slice %282 {offsets = [0, 0], sizes = [8, 384], strides = [1, 1]} : vector<8x512xf32> to vector<8x384xf32>
    %284 = arith.negf %283 : vector<8x384xf32>
    %285 = math.exp %284 : vector<8x384xf32>
    %cst_44 = arith.constant 1.000000e+00 : f32
    %286 = vector.broadcast %cst_44 : f32 to vector<8x384xf32>
    %287 = arith.addf %286, %285 : vector<8x384xf32>
    %288 = arith.divf %286, %287 : vector<8x384xf32>
    %289 = vector.extract_strided_slice %282 {offsets = [0, 384], sizes = [8, 128], strides = [1, 1]} : vector<8x512xf32> to vector<8x128xf32>
    %290 = math.tanh %289 : vector<8x128xf32>
    %291 = vector.extract_strided_slice %288 {offsets = [0, 0], sizes = [8, 128], strides = [1, 1]} : vector<8x384xf32> to vector<8x128xf32>
    %292 = vector.extract_strided_slice %288 {offsets = [0, 128], sizes = [8, 128], strides = [1, 1]} : vector<8x384xf32> to vector<8x128xf32>
    %293 = vector.extract_strided_slice %288 {offsets = [0, 256], sizes = [8, 128], strides = [1, 1]} : vector<8x384xf32> to vector<8x128xf32>
    %294 = arith.mulf %292, %278 : vector<8x128xf32>
    %295 = arith.mulf %291, %290 : vector<8x128xf32>
    %296 = arith.addf %294, %295 : vector<8x128xf32>
    %297 = math.tanh %296 : vector<8x128xf32>
    %298 = arith.mulf %293, %297 : vector<8x128xf32>
    %cst_45 = arith.constant dense<0.000000e+00> : vector<8x512xf32>
    %299 = tpu.matmul %298, %173, %cst_45 {dimension_numbers = #tpu.dot_dimension_numbers<[1], [0], [0], [1], [0, 0, 1, 1], [], []>} : vector<8x128xf32>, vector<128x512xf32>, vector<8x512xf32> -> vector<8x512xf32>
    %300 = arith.addf %172, %299 : vector<8x512xf32>
    %301 = vector.extract_strided_slice %300 {offsets = [0, 0], sizes = [8, 384], strides = [1, 1]} : vector<8x512xf32> to vector<8x384xf32>
    %302 = arith.negf %301 : vector<8x384xf32>
    %303 = math.exp %302 : vector<8x384xf32>
    %cst_46 = arith.constant 1.000000e+00 : f32
    %304 = vector.broadcast %cst_46 : f32 to vector<8x384xf32>
    %305 = arith.addf %304, %303 : vector<8x384xf32>
    %306 = arith.divf %304, %305 : vector<8x384xf32>
    %307 = vector.extract_strided_slice %300 {offsets = [0, 384], sizes = [8, 128], strides = [1, 1]} : vector<8x512xf32> to vector<8x128xf32>
    %308 = math.tanh %307 : vector<8x128xf32>
    %309 = vector.extract_strided_slice %306 {offsets = [0, 0], sizes = [8, 128], strides = [1, 1]} : vector<8x384xf32> to vector<8x128xf32>
    %310 = vector.extract_strided_slice %306 {offsets = [0, 128], sizes = [8, 128], strides = [1, 1]} : vector<8x384xf32> to vector<8x128xf32>
    %311 = vector.extract_strided_slice %306 {offsets = [0, 256], sizes = [8, 128], strides = [1, 1]} : vector<8x384xf32> to vector<8x128xf32>
    %312 = arith.mulf %310, %296 : vector<8x128xf32>
    %313 = arith.mulf %309, %308 : vector<8x128xf32>
    %314 = arith.addf %312, %313 : vector<8x128xf32>
    %315 = math.tanh %314 : vector<8x128xf32>
    %316 = arith.mulf %311, %315 : vector<8x128xf32>
    %317 = tpu.concatenate %190, %208, %226, %244, %262, %280, %298, %316 in 1 : vector<8x128xf32>, vector<8x128xf32>, vector<8x128xf32>, vector<8x128xf32>, vector<8x128xf32>, vector<8x128xf32>, vector<8x128xf32>, vector<8x128xf32> -> vector<8x1024xf32>
    %c0_47 = arith.constant 0 : index
    %c0_48 = arith.constant 0 : index
    %318 = vector.load %arg8[%c0_47, %c0_48] : memref<8x1024xf32, #tpu.memory_space<vmem>>, vector<8x1024xf32>
    tpu.vector_store %arg8[%c0_47, %c0_48], %317 {strides = array<i32>} : memref<8x1024xf32, #tpu.memory_space<vmem>>, vector<8x1024xf32>,
    return
  }
  func.func @transform_0(%arg0: i32) -> (i32, i32, i32) {
    %c0_i32 = arith.constant 0 : i32
    %c0_i32_0 = arith.constant 0 : i32
    %c0_i32_1 = arith.constant 0 : i32
    return %c0_i32, %arg0, %c0_i32_0 : i32, i32, i32
  }
  func.func @transform_1(%arg0: i32) -> (i32, i32) {
    %c0_i32 = arith.constant 0 : i32
    %c0_i32_0 = arith.constant 0 : i32
    %c0_i32_1 = arith.constant 0 : i32
    return %c0_i32, %c0_i32_0 : i32, i32
  }
  func.func @transform_2(%arg0: i32) -> (i32, i32) {
    %c0_i32 = arith.constant 0 : i32
    %c0_i32_0 = arith.constant 0 : i32
    %c0_i32_1 = arith.constant 0 : i32
    return %c0_i32, %c0_i32_0 : i32, i32
  }
  func.func @transform_3(%arg0: i32) -> (i32, i32) {
    %c0_i32 = arith.constant 0 : i32
    %c0_i32_0 = arith.constant 0 : i32
    %c0_i32_1 = arith.constant 0 : i32
    return %c0_i32, %c0_i32_0 : i32, i32
  }
  func.func @transform_4(%arg0: i32) -> (i32, i32) {
    %c0_i32 = arith.constant 0 : i32
    %c0_i32_0 = arith.constant 0 : i32
    %c0_i32_1 = arith.constant 0 : i32
    return %c0_i32, %c0_i32_0 : i32, i32
  }
  func.func @transform_5(%arg0: i32) -> (i32, i32) {
    %c0_i32 = arith.constant 0 : i32
    %c0_i32_0 = arith.constant 0 : i32
    %c0_i32_1 = arith.constant 0 : i32
    return %c0_i32, %c0_i32_0 : i32, i32
  }
  func.func @transform_6(%arg0: i32) -> (i32, i32) {
    %c0_i32 = arith.constant 0 : i32
    %c0_i32_0 = arith.constant 0 : i32
    %c0_i32_1 = arith.constant 0 : i32
    return %c0_i32, %c0_i32_0 : i32, i32
  }
  func.func @transform_7(%arg0: i32) -> (i32, i32) {
    %c0_i32 = arith.constant 0 : i32
    %c0_i32_0 = arith.constant 0 : i32
    return %arg0, %c0_i32 : i32, i32
  }
}

</mosaic_0001>

<bundles_post_ra>
// kernel: _lambda_.1
= control target key start
LH: loop header
LB: loop body
LE: loop exit
PB: predicated region body
PF: predicated region fallthrough
CT: control target
= control target key end

     0   :  { %s6116_s1 = inlined_call_operand.vmem [shape: f32[128,512], index: 1, kind: input, shape index: {}]   ;;  %s6117_s0 = inlined_call_operand.vmem [shape: f32[8,8,128], index: 0, kind: input, shape index: {}]   ;;  %s6118_s2 = inlined_call_operand.vmem [shape: f32[128,512], index: 2, kind: input, shape index: {}]   ;;  %s6119_s3 = inlined_call_operand.vmem [shape: f32[1,512], index: 3, kind: input, shape index: {}]   ;;  %s6120_s4 = inlined_call_operand.vmem [shape: f32[128,512], index: 4, kind: input, shape index: {}]   ;;  %s6121_s6 = inlined_call_operand.vmem [shape: f32[128,512], index: 6, kind: input, shape index: {}]   ;;  %s6122_s5 = inlined_call_operand.vmem [shape: f32[1,512], index: 5, kind: input, shape index: {}]   ;;  %s6123_s7 = inlined_call_operand.vmem [shape: f32[8,1024], index: 7, kind: output, shape index: {}]  }
   0x1   :  { %v86_v0 = vld [vmem:[%s6116_s1 + $0x1e0] sm:$0xff]  ;;  %v87_v1 = vld [vmem:[%s6116_s1 + $0x1e8] sm:$0xff]  ;;  %v88_v2 = vld [vmem:[%s6116_s1 + $0x1f0] sm:$0xff] }
   0x2   :  { %108 = vmatpush.msra.mxu0 %v86_v0  ;;  %149 = vmatpush.msra.mxu1 %v87_v1  ;;  %v82_v3 = vld [vmem:[%s6116_s1 + $0x1c0] sm:$0xff]  ;;  %v83_v4 = vld [vmem:[%s6116_s1 + $0x1c8] sm:$0xff]  ;;  %v84_v5 = vld [vmem:[%s6116_s1 + $0x1d0] sm:$0xff] }
   0x3   :  { %190 = vmatpush.msra.mxu2 %v88_v2  ;;  %v78_v6 = vld [vmem:[%s6116_s1 + $0x1a0] sm:$0xff]  ;;  %v79_v7 = vld [vmem:[%s6116_s1 + $0x1a8] sm:$0xff]  ;;  %v80_v8 = vld [vmem:[%s6116_s1 + $0x1b0] sm:$0xff] }
   0x4   :  { %109 = vmatpush.msra.mxu0 %v82_v3  ;;  %150 = vmatpush.msra.mxu1 %v83_v4  ;;  %v74_v9 = vld [vmem:[%s6116_s1 + $0x180] sm:$0xff]  ;;  %v75_v10 = vld [vmem:[%s6116_s1 + $0x188] sm:$0xff]  ;;  %v76_v11 = vld [vmem:[%s6116_s1 + $0x190] sm:$0xff] }
   0x5   :  { %191 = vmatpush.msra.mxu2 %v84_v5  ;;  %v70_v12 = vld [vmem:[%s6116_s1 + $0x160] sm:$0xff]  ;;  %v71_v13 = vld [vmem:[%s6116_s1 + $0x168] sm:$0xff]  ;;  %v72_v14 = vld [vmem:[%s6116_s1 + $0x170] sm:$0xff] }
   0x6   :  { %110 = vmatpush.msra.mxu0 %v78_v6  ;;  %151 = vmatpush.msra.mxu1 %v79_v7  ;;  %v66_v15 = vld [vmem:[%s6116_s1 + $0x140] sm:$0xff]  ;;  %v67_v16 = vld [vmem:[%s6116_s1 + $0x148] sm:$0xff]  ;;  %v89_v17 = vld [vmem:[%s6116_s1 + $0x1f8] sm:$0xff] }
   0x7   :  { %192 = vmatpush.msra.mxu2 %v80_v8  ;;  %v68_v18 = vld [vmem:[%s6116_s1 + $0x150] sm:$0xff]  ;;  %v85_v19 = vld [vmem:[%s6116_s1 + $0x1d8] sm:$0xff]  ;;  %v62_v20 = vld [vmem:[%s6116_s1 + $0x120] sm:$0xff]  ;;  %231 = vmatpush.msra.mxu3 %v89_v17 }
   0x8   :  { %111 = vmatpush.msra.mxu0 %v74_v9  ;;  %152 = vmatpush.msra.mxu1 %v75_v10  ;;  %v63_v21 = vld [vmem:[%s6116_s1 + $0x128] sm:$0xff]  ;;  %v64_v22 = vld [vmem:[%s6116_s1 + $0x130] sm:$0xff]  ;;  %v81_v23 = vld [vmem:[%s6116_s1 + $0x1b8] sm:$0xff] }
   0x9   :  { %193 = vmatpush.msra.mxu2 %v76_v11  ;;  %v58_v24 = vld [vmem:[%s6116_s1 + $0x100] sm:$0xff]  ;;  %v59_v25 = vld [vmem:[%s6116_s1 + $0x108] sm:$0xff]  ;;  %232 = vmatpush.msra.mxu3 %v85_v19  ;;  %v60_v26 = vld [vmem:[%s6116_s1 + $0x110] sm:$0xff] }
   0xa   :  { %112 = vmatpush.msra.mxu0 %v70_v12  ;;  %153 = vmatpush.msra.mxu1 %v71_v13  ;;  %v77_v27 = vld [vmem:[%s6116_s1 + $0x198] sm:$0xff]  ;;  %v54_v28 = vld [vmem:[%s6116_s1 + $0xe0] sm:$0xff]  ;;  %v55_v29 = vld [vmem:[%s6116_s1 + $0xe8] sm:$0xff] }
   0xb   :  { %194 = vmatpush.msra.mxu2 %v72_v14  ;;  %233 = vmatpush.msra.mxu3 %v81_v23  ;;  %v56_v30 = vld [vmem:[%s6116_s1 + $0xf0] sm:$0xff]  ;;  %v73_v31 = vld [vmem:[%s6116_s1 + $0x178] sm:$0xff]  ;;  %v50_v32 = vld [vmem:[%s6116_s1 + $0xc0] sm:$0xff] }
   0xc   :  { %113 = vmatpush.msra.mxu0 %v66_v15  ;;  %154 = vmatpush.msra.mxu1 %v67_v16  ;;  %v51_v33 = vld [vmem:[%s6116_s1 + $0xc8] sm:$0xff]  ;;  %v52_v34 = vld [vmem:[%s6116_s1 + $0xd0] sm:$0xff]  ;;  %v69_v35 = vld [vmem:[%s6116_s1 + $0x158] sm:$0xff] }
   0xd   :  { %195 = vmatpush.msra.mxu2 %v68_v18  ;;  %234 = vmatpush.msra.mxu3 %v77_v27  ;;  %v46_v36 = vld [vmem:[%s6116_s1 + $0xa0] sm:$0xff]  ;;  %v47_v37 = vld [vmem:[%s6116_s1 + $0xa8] sm:$0xff]  ;;  %v48_v38 = vld [vmem:[%s6116_s1 + $0xb0] sm:$0xff] }
   0xe   :  { %114 = vmatpush.msra.mxu0 %v62_v20  ;;  %155 = vmatpush.msra.mxu1 %v63_v21  ;;  %v65_v39 = vld [vmem:[%s6116_s1 + $0x138] sm:$0xff]  ;;  %v42_v40 = vld [vmem:[%s6116_s1 + $0x80] sm:$0xff]  ;;  %v43_v41 = vld [vmem:[%s6116_s1 + $0x88] sm:$0xff] }
   0xf   :  { %196 = vmatpush.msra.mxu2 %v64_v22  ;;  %235 = vmatpush.msra.mxu3 %v73_v31  ;;  %v44_v42 = vld [vmem:[%s6116_s1 + $0x90] sm:$0xff]  ;;  %v61_v43 = vld [vmem:[%s6116_s1 + $0x118] sm:$0xff]  ;;  %v38_v44 = vld [vmem:[%s6116_s1 + $0x60] sm:$0xff] }
  0x10   :  { %115 = vmatpush.msra.mxu0 %v58_v24  ;;  %156 = vmatpush.msra.mxu1 %v59_v25  ;;  %v39_v45 = vld [vmem:[%s6116_s1 + $0x68] sm:$0xff]  ;;  %v40_v46 = vld [vmem:[%s6116_s1 + $0x70] sm:$0xff]  ;;  %v57_v47 = vld [vmem:[%s6116_s1 + $0xf8] sm:$0xff] }
  0x11   :  { %197 = vmatpush.msra.mxu2 %v60_v26  ;;  %236 = vmatpush.msra.mxu3 %v69_v35  ;;  %v34_v48 = vld [vmem:[%s6116_s1 + $0x40] sm:$0xff]  ;;  %v35_v49 = vld [vmem:[%s6116_s1 + $0x48] sm:$0xff]  ;;  %v36_v50 = vld [vmem:[%s6116_s1 + $0x50] sm:$0xff] }
  0x12   :  { %116 = vmatpush.msra.mxu0 %v54_v28  ;;  %157 = vmatpush.msra.mxu1 %v55_v29  ;;  %v53_v51 = vld [vmem:[%s6116_s1 + $0xd8] sm:$0xff]  ;;  %v30_v52 = vld [vmem:[%s6116_s1 + $0x20] sm:$0xff]  ;;  %v31_v53 = vld [vmem:[%s6116_s1 + $0x28] sm:$0xff] }
  0x13   :  { %198 = vmatpush.msra.mxu2 %v56_v30  ;;  %237 = vmatpush.msra.mxu3 %v65_v39  ;;  %v32_v54 = vld [vmem:[%s6116_s1 + $0x30] sm:$0xff]  ;;  %v49_v55 = vld [vmem:[%s6116_s1 + $0xb8] sm:$0xff]  ;;  %v26_v56 = vld [vmem:[%s6116_s1] sm:$0xff] }
  0x14   :  { %117 = vmatpush.msra.mxu0 %v50_v32  ;;  %158 = vmatpush.msra.mxu1 %v51_v33  ;;  %v27_v57 = vld [vmem:[%s6116_s1 + $0x8] sm:$0xff]  ;;  %v28_v58 = vld [vmem:[%s6116_s1 + $0x10] sm:$0xff]  ;;  %v90_v59 = vld [vmem:[%s6117_s0] sm:$0xff] }
  0x15   :  { %199 = vmatpush.msra.mxu2 %v52_v34  ;;  %238 = vmatpush.msra.mxu3 %v61_v43  ;;  %v45_v60 = vld [vmem:[%s6116_s1 + $0x98] sm:$0xff]  ;;  %v3408_v61 = vld [vmem:[%s6118_s2 + $0x1e0] sm:$0xff]  ;;  %v3413_v62 = vld [vmem:[%s6118_s2 + $0x1e8] sm:$0xff] }
  0x16   :  { %118 = vmatpush.msra.mxu0 %v46_v36  ;;  %159 = vmatpush.msra.mxu1 %v47_v37  ;;  %6372 = vst [vmem:[#allocation2_spill] sm:$0xff] %v3408_v61  ;;  %v3418_v63 = vld [vmem:[%s6118_s2 + $0x1f0] sm:$0xff]  ;;  %v41_v0 = vld [vmem:[%s6116_s1 + $0x78] sm:$0xff]  ;;  %v3426_v1 = vld [vmem:[%s6118_s2 + $0x1c0] sm:$0xff] }
  0x17   :  { %200 = vmatpush.msra.mxu2 %v48_v38  ;;  %239 = vmatpush.msra.mxu3 %v57_v47  ;;  %6373 = vst [vmem:[#allocation3_spill] sm:$0xff] %v3413_v62  ;;  %v3432_v2 = vld [vmem:[%s6118_s2 + $0x1c8] sm:$0xff]  ;;  %v3437_v3 = vld [vmem:[%s6118_s2 + $0x1d0] sm:$0xff]  ;;  %v37_v4 = vld [vmem:[%s6116_s1 + $0x58] sm:$0xff] }
  0x18   :  { %119 = vmatpush.msra.mxu0 %v42_v40  ;;  %160 = vmatpush.msra.mxu1 %v43_v41  ;;  %6374 = vst [vmem:[#allocation4_spill] sm:$0xff] %v3432_v2  ;;  %v3447_v5 = vld [vmem:[%s6118_s2 + $0x1a0] sm:$0xff]  ;;  %v3453_v6 = vld [vmem:[%s6118_s2 + $0x1a8] sm:$0xff]  ;;  %v3458_v7 = vld [vmem:[%s6118_s2 + $0x1b0] sm:$0xff] }
  0x19   :  { %201 = vmatpush.msra.mxu2 %v44_v42  ;;  %240 = vmatpush.msra.mxu3 %v53_v51  ;;  %6375 = vst [vmem:[#allocation5_spill] sm:$0xff] %v3437_v3  ;;  %v33_v8 = vld [vmem:[%s6116_s1 + $0x38] sm:$0xff]  ;;  %v91_v9 = vld [vmem:[%s6117_s0 + $0x8] sm:$0xff]  ;;  %v3476_v11 = vld [vmem:[%s6118_s2 + $0x180] sm:$0xff] }
  0x1a   :  { %120 = vmatpush.msra.mxu0 %v38_v44  ;;  %161 = vmatpush.msra.mxu1 %v39_v45  ;;  %6376 = vst [vmem:[#allocation6_spill] sm:$0xff] %v3447_v5  ;;  %v29_v10 = vld [vmem:[%s6116_s1 + $0x18] sm:$0xff]  ;;  %v3482_v12 = vld [vmem:[%s6118_s2 + $0x188] sm:$0xff]  ;;  %v3492_v14 = vld [vmem:[%s6118_s2 + $0x160] sm:$0xff] }
  0x1b   :  { %202 = vmatpush.msra.mxu2 %v40_v46  ;;  %241 = vmatpush.msra.mxu3 %v49_v55  ;;  %6377 = vst [vmem:[#allocation7_spill] sm:$0xff] %v3482_v12  ;;  %v3487_v13 = vld [vmem:[%s6118_s2 + $0x1f8] sm:$0xff]  ;;  %v3498_v15 = vld [vmem:[%s6118_s2 + $0x168] sm:$0xff]  ;;  %v3503_v16 = vld [vmem:[%s6118_s2 + $0x190] sm:$0xff] }
  0x1c   :  { %121 = vmatpush.msra.mxu0 %v34_v48  ;;  %162 = vmatpush.msra.mxu1 %v35_v49  ;;  %6378 = vst [vmem:[#allocation8_spill] sm:$0xff] %v3492_v14  ;;  %v3509_v17 = vld [vmem:[%s6118_s2 + $0x1d8] sm:$0xff]  ;;  %v92_v18 = vld [vmem:[%s6117_s0 + $0x10] sm:$0xff]  ;;  %v94_v20 = vld [vmem:[%s6117_s0 + $0x20] sm:$0xff] }
  0x1d   :  { %203 = vmatpush.msra.mxu2 %v36_v50  ;;  %242 = vmatpush.msra.mxu3 %v45_v60  ;;  %6379 = vst [vmem:[#allocation9_spill] sm:$0xff] %v3498_v15  ;;  %v93_v19 = vld [vmem:[%s6117_s0 + $0x18] sm:$0xff]  ;;  %v95_v23 = vld [vmem:[%s6117_s0 + $0x28] sm:$0xff]  ;;  %v3543_v24 = vld [vmem:[%s6118_s2 + $0x170] sm:$0xff] }
  0x1e   :  { %122 = vmatpush.msra.mxu0 %v30_v52  ;;  %163 = vmatpush.msra.mxu1 %v31_v53  ;;  %6380 = vst [vmem:[#allocation10_spill] sm:$0xff] %v3503_v16  ;;  %v3528_v21 = vld [vmem:[%s6118_s2 + $0x1b8] sm:$0xff]  ;;  %v3555_v26 = vld [vmem:[%s6118_s2 + $0x140] sm:$0xff]  ;;  %v3560_v27 = vld [vmem:[%s6118_s2 + $0x148] sm:$0xff] }
  0x1f   :  { %204 = vmatpush.msra.mxu2 %v32_v54  ;;  %243 = vmatpush.msra.mxu3 %v41_v0  ;;  %v3534_v22 = vld [vmem:[%s6118_s2 + $0x198] sm:$0xff]  ;;  %6381 = vst [vmem:[#allocation11_spill] sm:$0xff] %v3543_v24  ;;  %v3565_v28 = vld [vmem:[%s6118_s2 + $0x150] sm:$0xff]  ;;  %v3577_v30 = vld [vmem:[%s6118_s2 + $0x120] sm:$0xff] }
  0x20   :  { %123 = vmatpush.msra.mxu0 %v26_v56  ;;  %164 = vmatpush.msra.mxu1 %v27_v57  ;;  %v3548_v25 = vld [vmem:[%s6118_s2 + $0x178] sm:$0xff]  ;;  %6382 = vst [vmem:[#allocation12_spill] sm:$0xff] %v3555_v26  ;;  %v3582_v31 = vld [vmem:[%s6118_s2 + $0x128] sm:$0xff]  ;;  %v3588_v32 = vld [vmem:[%s6118_s2 + $0x130] sm:$0xff] }
  0x21   :  { %205 = vmatpush.msra.mxu2 %v28_v58  ;;  %124 = vmatmul.f32.vlgmr.msra.gmra.mxu0 %v90_v59  ;;  %v3572_v29 = vld [vmem:[%s6118_s2 + $0x158] sm:$0xff]  ;;  %v3594_v33 = vld [vmem:[%s6119_s3] sm:$0xf]  ;;  %v3611_v36 = vld [vmem:[%s6118_s2 + $0x108] sm:$0xff] }
  0x22   :  { %165 = vmatmul.f32.vlgmr.msra.gmra.mxu1 %v90_v59  ;;  %206 = vmatmul.f32.vlgmr.msra.gmra.mxu2 %v90_v59  ;;  %v3601_v34 = vld [vmem:[%s6118_s2 + $0x138] sm:$0xff]  ;;  %v3606_v35 = vld [vmem:[%s6118_s2 + $0x100] sm:$0xff]  ;;  %v3617_v37 = vld [vmem:[%s6118_s2 + $0x110] sm:$0xff]  ;;  %v3631_v40 = vperm.slane %v3594_v33, 0  ;;  %v3651_v44 = vperm.slane %v3594_v33, 1  ;;  %v3716_v0 = vperm.slane %v3594_v33, 2 }
  0x23   :  { %399 = vmatpush.msrb.mxu0 %v3408_v61  ;;  %419 = vmatpush.msrb.mxu1 %v3413_v62  ;;  %v3625_v38 = vld [vmem:[%s6118_s2 + $0x118] sm:$0xff]  ;;  %v96_v39 = vld [vmem:[%s6117_s0 + $0x30] sm:$0xff]  ;;  %v3636_v41 = vld [vmem:[%s6118_s2 + $0xe0] sm:$0xff] }
  0x24   :  { %439 = vmatpush.msrb.mxu2 %v3418_v63  ;;  %244 = vmatpush.msra.mxu3 %v37_v4  ;;  %6383 = vst [vmem:[#allocation13_spill] sm:$0xff] %v3631_v40  ;;  %v3641_v42 = vld [vmem:[%s6118_s2 + $0xe8] sm:$0xff]  ;;  %v3647_v43 = vld [vmem:[%s6118_s2 + $0xf0] sm:$0xff]  ;;  %v3658_v45 = vld [vmem:[%s6118_s2 + $0xc0] sm:$0xff] }
  0x25   :  { %400 = vmatpush.msrb.mxu0 %v3426_v1  ;;  %420 = vmatpush.msrb.mxu1 %v3432_v2  ;;  %6384 = vst [vmem:[#allocation14_spill] sm:$0xff] %v3651_v44  ;;  %v3663_v46 = vld [vmem:[%s6118_s2 + $0xc8] sm:$0xff]  ;;  %v3668_v47 = vld [vmem:[%s6118_s2 + $0xa0] sm:$0xff]  ;;  %v3679_v49 = vld [vmem:[%s6118_s2 + $0xd0] sm:$0xff] }
  0x26   :  { %440 = vmatpush.msrb.mxu2 %v3437_v3  ;;  %245 = vmatpush.msra.mxu3 %v33_v8  ;;  %6385 = vst [vmem:[#allocation15_spill] sm:$0xff] %v3668_v47  ;;  %v3674_v48 = vld [vmem:[%s6118_s2 + $0xa8] sm:$0xff]  ;;  %v3684_v50 = vld [vmem:[%s6118_s2 + $0xf8] sm:$0xff]  ;;  %v3693_v54 = vld [vmem:[%s6118_s2 + $0xb0] sm:$0xff] }
  0x27   :  { %401 = vmatpush.msrb.mxu0 %v3447_v5  ;;  %421 = vmatpush.msrb.mxu1 %v3453_v6  ;;  %6386 = vst [vmem:[#allocation16_spill] sm:$0xff] %v3674_v48  ;;  %v3702_v57 = vld [vmem:[%s6118_s2 + $0x80] sm:$0xff]  ;;  %v3707_v58 = vld [vmem:[%s6118_s2 + $0x88] sm:$0xff] }
  0x28   :  { %441 = vmatpush.msrb.mxu2 %v3458_v7  ;;  %246 = vmatpush.msra.mxu3 %v29_v10  ;;  %6387 = vst [vmem:[#allocation17_spill] sm:$0xff] %v3693_v54  ;;  %v3723_v4 = vld [vmem:[%s6118_s2 + $0x60] sm:$0xff]  ;;  %v3728_v8 = vld [vmem:[%s6118_s2 + $0x68] sm:$0xff] }
  0x29   :  { %127 = vmatmul.f32.gmra.mxu0 %v91_v9  ;;  %247 = vmatmul.f32.vlgmr.msra.gmra.mxu3 %v90_v59  ;;  %6388 = vst [vmem:[#allocation18_spill] sm:$0xff] %v3702_v57  ;;  %v3713_v59 = vld [vmem:[%s6118_s2 + $0xd8] sm:$0xff]  ;;  %v3738_v10 = vld [vmem:[%s6118_s2 + $0x40] sm:$0xff] }
  0x2a   :  { %168 = vmatmul.f32.gmra.mxu1 %v91_v9  ;;  %209 = vmatmul.f32.gmra.mxu2 %v91_v9  ;;  %6389 = vst [vmem:[#allocation19_spill] sm:$0xff] %v3707_v58 }
  0x2b   :  { %402 = vmatpush.msrb.mxu0 %v3476_v11  ;;  %422 = vmatpush.msrb.mxu1 %v3482_v12  ;;  %6390 = vst [vmem:[#allocation20_spill] sm:$0xff] %v3713_v59 }
  0x2c   :  { %459 = vmatpush.msrb.mxu3 %v3487_v13  ;;  %442 = vmatpush.msrb.mxu2 %v3503_v16  ;;  %6391 = vst [vmem:[#allocation21_spill] sm:$0xff] %v3716_v0 }
  0x2d   :  { %403 = vmatpush.msrb.mxu0 %v3492_v14  ;;  %423 = vmatpush.msrb.mxu1 %v3498_v15  ;;  %6392 = vst [vmem:[#allocation22_spill] sm:$0xff] %v3723_v4 }
  0x2e   :  { %460 = vmatpush.msrb.mxu3 %v3509_v17  ;;  %443 = vmatpush.msrb.mxu2 %v3543_v24  ;;  %6393 = vst [vmem:[#allocation23_spill] sm:$0xff] %v3728_v8 }
  0x2f   :  { %404 = vmatpush.msrb.mxu0 %v3555_v26  ;;  %424 = vmatpush.msrb.mxu1 %v3560_v27  ;;  %6395 = vst [vmem:[#allocation25_spill] sm:$0xff] %v3738_v10 }
  0x30   :  { %461 = vmatpush.msrb.mxu3 %v3528_v21  ;;  %444 = vmatpush.msrb.mxu2 %v3565_v28 }
  0x31   :  { %130 = vmatmul.f32.gmra.mxu0 %v92_v18  ;;  %250 = vmatmul.f32.gmra.mxu3 %v91_v9  ;;  %v3733_v9 = vld [vmem:[%s6118_s2 + $0x90] sm:$0xff] }
  0x32   :  { %171 = vmatmul.f32.gmra.mxu1 %v92_v18  ;;  %212 = vmatmul.f32.gmra.mxu2 %v92_v18  ;;  %6394 = vst [vmem:[#allocation24_spill] sm:$0xff] %v3733_v9 }
  0x33   :  { %462 = vmatpush.msrb.mxu3 %v3534_v22  ;;  %405 = vmatpush.msrb.mxu0 %v3577_v30 }
  0x34   :  { %425 = vmatpush.msrb.mxu1 %v3582_v31  ;;  %445 = vmatpush.msrb.mxu2 %v3588_v32 }
  0x35   :  { %463 = vmatpush.msrb.mxu3 %v3548_v25  ;;  %406 = vmatpush.msrb.mxu0 %v3606_v35 }
  0x36   :  { %426 = vmatpush.msrb.mxu1 %v3611_v36  ;;  %446 = vmatpush.msrb.mxu2 %v3617_v37 }
  0x37   :  { %464 = vmatpush.msrb.mxu3 %v3572_v29  ;;  %407 = vmatpush.msrb.mxu0 %v3636_v41 }
  0x38   :  { %427 = vmatpush.msrb.mxu1 %v3641_v42  ;;  %447 = vmatpush.msrb.mxu2 %v3647_v43 }
  0x39   :  { %253 = vmatmul.f32.gmra.mxu3 %v92_v18  ;;  %133 = vmatmul.f32.gmra.mxu0 %v93_v19  ;;  %v3743_v18 = vld [vmem:[%s6118_s2 + $0x48] sm:$0xff] }
  0x3a   :  { %174 = vmatmul.f32.gmra.mxu1 %v93_v19  ;;  %215 = vmatmul.f32.gmra.mxu2 %v93_v19  ;;  %6396 = vst [vmem:[#allocation26_spill] sm:$0xff] %v3743_v18 }
  0x3b   :  { %465 = vmatpush.msrb.mxu3 %v3601_v34  ;;  %408 = vmatpush.msrb.mxu0 %v3658_v45 }
  0x3c   :  { %428 = vmatpush.msrb.mxu1 %v3663_v46  ;;  %448 = vmatpush.msrb.mxu2 %v3679_v49 }
  0x3d   :  { %466 = vmatpush.msrb.mxu3 %v3625_v38  ;;  %409 = vmatpush.msrb.mxu0 %v3668_v47 }
  0x3e   :  { %429 = vmatpush.msrb.mxu1 %v3674_v48  ;;  %449 = vmatpush.msrb.mxu2 %v3693_v54 }
  0x3f   :  { %467 = vmatpush.msrb.mxu3 %v3684_v50  ;;  %410 = vmatpush.msrb.mxu0 %v3702_v57 }
  0x40   :  { %430 = vmatpush.msrb.mxu1 %v3707_v58  ;;  %450 = vmatpush.msrb.mxu2 %v3733_v9 }
  0x41   :  { %256 = vmatmul.f32.gmra.mxu3 %v93_v19  ;;  %136 = vmatmul.f32.gmra.mxu0 %v94_v20  ;;  %v3750_v19 = vld [vmem:[%s6118_s2 + $0x70] sm:$0xff] }
  0x42   :  { %177 = vmatmul.f32.gmra.mxu1 %v94_v20  ;;  %218 = vmatmul.f32.gmra.mxu2 %v94_v20  ;;  %6397 = vst [vmem:[#allocation27_spill] sm:$0xff] %v3750_v19 }
  0x43   :  { %411 = vmatpush.msrb.mxu0 %v3723_v4  ;;  %431 = vmatpush.msrb.mxu1 %v3728_v8 }
  0x44   :  { %468 = vmatpush.msrb.mxu3 %v3713_v59  ;;  %451 = vmatpush.msrb.mxu2 %v3750_v19 }
  0x45   :  { %412 = vmatpush.msrb.mxu0 %v3738_v10  ;;  %432 = vmatpush.msrb.mxu1 %v3743_v18 }
  0x49   :  { %259 = vmatmul.f32.gmra.mxu3 %v94_v20  ;;  %139 = vmatmul.f32.gmra.mxu0 %v95_v23  ;;  %v3755_v20 = vld [vmem:[%s6118_s2 + $0xb8] sm:$0xff] }
  0x4a   :  { %180 = vmatmul.f32.gmra.mxu1 %v95_v23  ;;  %221 = vmatmul.f32.gmra.mxu2 %v95_v23  ;;  %6398 = vst [vmem:[#allocation28_spill] sm:$0xff] %v3755_v20 }
  0x4b   :  { %469 = vmatpush.msrb.mxu3 %v3755_v20 }
  0x51   :  { %262 = vmatmul.f32.gmra.mxu3 %v95_v23  ;;  %142 = vmatmul.f32.gmra.mxu0 %v96_v39 }
  0x52   :  { %183 = vmatmul.f32.gmra.mxu1 %v96_v39  ;;  %224 = vmatmul.f32.gmra.mxu2 %v96_v39 }
  0x59   :  { %265 = vmatmul.f32.gmra.mxu3 %v96_v39  ;;  %v97_v39 = vld [vmem:[%s6117_s0 + $0x38] sm:$0xff] }
  0x5a   :  { %145 = vmatmul.f32.gmra.mxu0 %v97_v39  ;;  %186 = vmatmul.f32.gmra.mxu1 %v97_v39 }
  0x5b   :  { %227 = vmatmul.f32.gmra.mxu2 %v97_v39 }
  0x61   :  { %268 = vmatmul.f32.gmra.mxu3 %v97_v39 }
  0x9e   :  { %v125_v51 = vpop.f32.mrf.mxu0 }
  0x9f   :  { %v126_v52 = vadd.f32 %v125_v51, %v3631_v40  ;;  %v166_v53 = vpop.f32.mrf.mxu1  ;;  %v3765_v51 = vld [vmem:[%s6118_s2 + $0x28] sm:$0xff] }
  0xa0   :  { %v167_v55 = vadd.f32 %v166_v53, %v3651_v44  ;;  %6399 = vst [vmem:[#allocation29_spill] sm:$0xff] %v3765_v51  ;;  %v3773_v53 = vld [vmem:[%s6118_s2 + $0x98] sm:$0xff]  ;;  %433 = vmatpush.msrb.mxu1 %v3765_v51  ;;  %v3797_v44 = vld [vmem:[%s6118_s2] sm:$0xff]  ;;  %v3811_v51 = vld [vmem:[%s6118_s2 + $0x30] sm:$0xff] }
  0xa1   :  { %v2750_v56 = vmul.f32 -1.442695, %v126_v52  ;;  %6400 = vst [vmem:[#allocation30_spill] sm:$0xff] %v3773_v53  ;;  %470 = vmatpush.msrb.mxu3 %v3773_v53 }
  0xa2   :  { %v2751_v60 = vmul.f32 -1.442695, %v167_v55  ;;  %v3780_v55 = vld [vmem:[%s6118_s2 + $0x20] sm:$0xff]  ;;  %6404 = vst [vmem:[#allocation34_spill] sm:$0xff] %v3797_v44 }
  0xa3   :  { %2798 = vpow2.f32 %v2750_v56  ;;  %6401 = vst [vmem:[#allocation31_spill] sm:$0xff] %v3780_v55  ;;  %v3785_v56 = vld [vmem:[%s6118_s2 + $0x50] sm:$0xff]  ;;  %413 = vmatpush.msrb.mxu0 %v3780_v55 }
  0xa4   :  { %2800 = vpow2.f32 %v2751_v60  ;;  %6402 = vst [vmem:[#allocation32_spill] sm:$0xff] %v3785_v56  ;;  %452 = vmatpush.msrb.mxu2 %v3785_v56 }
  0xa5   :  { %v207_v23 = vpop.f32.mrf.mxu2  ;;  %6406 = vst [vmem:[#allocation36_spill] sm:$0xff] %v3811_v51  ;;  %414 = vmatpush.msrb.mxu0 %v3797_v44  ;;  %v3845_v44 = vld [vmem:[%s6118_s2 + $0x18] sm:$0xff] }
  0xa6   :  { %v208_v52 = vadd.f32 %v207_v23, %v3716_v0  ;;  %v3792_v0 = vld [vmem:[%s6118_s2 + $0x78] sm:$0xff]  ;;  %453 = vmatpush.msrb.mxu2 %v3811_v51  ;;  %6411 = vst [vmem:[#allocation41_spill] sm:$0xff] %v3845_v44 }
  0xa7   :  { %6403 = vst [vmem:[#allocation33_spill] sm:$0xff] %v3792_v0  ;;  %471 = vmatpush.msrb.mxu3 %v3792_v0  ;;  %546 = vmatpush.msra.mxu0 %v3408_v61 }
  0xa8   :  { %v2752_v60 = vmul.f32 -1.442695, %v208_v52  ;;  %v3806_v52 = vld [vmem:[%s6118_s2 + $0x8] sm:$0xff] }
  0xa9   :  { %v2799_v23 = vpop.eup %2798  ;;  %6405 = vst [vmem:[#allocation35_spill] sm:$0xff] %v3806_v52  ;;  %434 = vmatpush.msrb.mxu1 %v3806_v52  ;;  %547 = vmatpush.msra.mxu0 %v3426_v1 }
  0xaa   :  { %v2801_v40 = vpop.eup %2800  ;;  %v3799_v18 = vadd.f32 1.0, %v2799_v23  ;;  %2802 = vpow2.f32 %v2752_v60  ;;  %v3818_v60 = vld [vmem:[%s6118_s2 + $0x58] sm:$0xff]  ;;  %v3822_v23 = vperm.slane %v3594_v33, 3 }
  0xab   :  { %v3813_v10 = vadd.f32 1.0, %v2801_v40  ;;  %6407 = vst [vmem:[#allocation37_spill] sm:$0xff] %v3818_v60  ;;  %v3829_v40 = vld [vmem:[%s6118_s2 + $0x10] sm:$0xff]  ;;  %v3837_v33 = vld [vmem:[%s6118_s2 + $0x38] sm:$0xff]  ;;  %472 = vmatpush.msrb.mxu3 %v3818_v60  ;;  %566 = vmatpush.msra.mxu1 %v3413_v62 }
  0xac   :  { %2804 = vrcp.f32 %v3799_v18  ;;  %6408 = vst [vmem:[#allocation38_spill] sm:$0xff] %v3822_v23  ;;  %v248_v39 = vpop.f32.mrf.mxu3  ;;  %454 = vmatpush.msrb.mxu2 %v3829_v40  ;;  %548 = vmatpush.msra.mxu0 %v3447_v5  ;;  %vm353_vm2 = vweird.f32 %v3799_v18 }
  0xad   :  { %6409 = vst [vmem:[#allocation39_spill] sm:$0xff] %v3829_v40  ;;  %2806 = vrcp.f32 %v3813_v10  ;;  %v249_v51 = vadd.f32 %v248_v39, %v3822_v23  ;;  %473 = vmatpush.msrb.mxu3 %v3837_v33  ;;  %567 = vmatpush.msra.mxu1 %v3432_v2  ;;  %v374_v5 = vand.u32 2147483648, %v3813_v10  ;;  %vm368_vm3 = vweird.f32 %v3813_v10 }
  0xae   :  { %6410 = vst [vmem:[#allocation40_spill] sm:$0xff] %v3837_v33  ;;  %586 = vmatpush.msra.mxu2 %v3418_v63  ;;  %549 = vmatpush.msra.mxu0 %v3476_v11 }
  0xaf   :  { %474 = vmatpush.msrb.mxu3 %v3845_v44  ;;  %568 = vmatpush.msra.mxu1 %v3453_v6 }
  0xb0   :  { %v2803_v52 = vpop.eup %2802  ;;  %587 = vmatpush.msra.mxu2 %v3437_v3  ;;  %v359_v3 = vand.u32 2147483648, %v3799_v18  ;;  %550 = vmatpush.msra.mxu0 %v3492_v14 }
  0xb1   :  { %v3851_v60 = vadd.f32 1.0, %v2803_v52  ;;  %606 = vmatpush.msra.mxu3 %v3487_v13  ;;  %569 = vmatpush.msra.mxu1 %v3482_v12 }
  0xb2   :  { %v2805_v61 = vpop.eup %2804  ;;  %588 = vmatpush.msra.mxu2 %v3458_v7  ;;  %551 = vmatpush.msra.mxu0 %v3555_v26 }
  0xb3   :  { %v2807_v40 = vpop.eup %2806  ;;  %v349_v62 = vmul.f32 %v2805_v61, %v3799_v18  ;;  %2808 = vrcp.f32 %v3851_v60  ;;  %607 = vmatpush.msra.mxu3 %v3509_v17  ;;  %vm354_vm0 = vweird.f32 %v2805_v61  ;;  %570 = vmatpush.msra.mxu1 %v3498_v15  ;;  %v360_v15 = vor.u32 1.1754944e-38, %v359_v3 }
  0xb4   :  { %v364_v52 = vmul.f32 %v2807_v40, %v3813_v10  ;;  %2810 = vtanh.f32 %v249_v51  ;;  %589 = vmatpush.msra.mxu2 %v3503_v16  ;;  %v357_v51 = vand.u32 2147483647, %v3799_v18  ;;  %vm369_vm1 = vweird.f32 %v2807_v40  ;;  %vm355_vm4 = vmor %vm353_vm2, %vm354_vm0  ;;  %552 = vmatpush.msra.mxu0 %v3577_v30 }
  0xb5   :  { %v350_v39 = vsub.f32 1.0, %v349_v62  ;;  %608 = vmatpush.msra.mxu3 %v3528_v21  ;;  %571 = vmatpush.msra.mxu1 %v3560_v27  ;;  %vm370_vm6 = vmor %vm368_vm3, %vm369_vm1  ;;  %vm383_vm9 = vweird.f32 %v3851_v60 }
  0xb6   :  { %v365_v23 = vsub.f32 1.0, %v364_v52  ;;  %v372_v52 = vand.u32 2147483647, %v3813_v10  ;;  %590 = vmatpush.msra.mxu2 %v3543_v24  ;;  %vm358_vm5 = vcmp.eq.f32.partialorder %v357_v51, 8.507059e+37  ;;  %553 = vmatpush.msra.mxu0 %v3606_v35 }
  0xb7   :  { %v351_v2 = vmul.f32 %v2805_v61, %v350_v39  ;;  %609 = vmatpush.msra.mxu3 %v3534_v22  ;;  %572 = vmatpush.msra.mxu1 %v3582_v31 }
  0xb8   :  { %v366_v62 = vmul.f32 %v2807_v40, %v365_v23  ;;  %591 = vmatpush.msra.mxu2 %v3565_v28  ;;  %vm373_vm7 = vcmp.eq.f32.partialorder %v372_v52, 8.507059e+37  ;;  %554 = vmatpush.msra.mxu0 %v3636_v41  ;;  %v6412_v52 = vld [vmem:[#allocation25_spill] sm:$0xff] }
  0xb9   :  { %v3876_v12 = vpop.eup %2808  ;;  %v352_v16 = vadd.f32 %v2805_v61, %v351_v2  ;;  %v375_v2 = vor.u32 1.1754944e-38, %v374_v5  ;;  %610 = vmatpush.msra.mxu3 %v3548_v25  ;;  %573 = vmatpush.msra.mxu1 %v3611_v36 }
  0xba   :  { %v2811_v39 = vpop.eup %2810  ;;  %v379_v23 = vmul.f32 %v3876_v12, %v3851_v60  ;;  %v367_v14 = vadd.f32 %v2807_v40, %v366_v62  ;;  %592 = vmatpush.msra.mxu2 %v3588_v32  ;;  %vm384_vm8 = vweird.f32 %v3876_v12  ;;  %555 = vmatpush.msra.mxu0 %v3658_v45 }
  0xbb   :  { %v356_v18 = vsel %vm355_vm4, %v2805_v61, %v352_v16  ;;  %611 = vmatpush.msra.mxu3 %v3572_v29  ;;  %574 = vmatpush.msra.mxu1 %v3641_v42  ;;  %v389_v16 = vand.u32 2147483648, %v3851_v60  ;;  %vm385_vm10 = vmor %vm383_vm9, %vm384_vm8 }
  0xbc   :  { %v380_v10 = vsub.f32 1.0, %v379_v23  ;;  %v361_v26 = vsel %vm358_vm5, %v360_v15, %v356_v18  ;;  %v371_v24 = vsel %vm370_vm6, %v2807_v40, %v367_v14  ;;  %593 = vmatpush.msra.mxu2 %v3617_v37  ;;  %556 = vmatpush.msra.mxu0 %v3668_v47  ;;  %v6414_v23 = vld [vmem:[#allocation29_spill] sm:$0xff] }
  0xbd   :  { %v376_v3 = vsel %vm373_vm7, %v375_v2, %v371_v24  ;;  %v395_v62 = vmul.f32 %v2811_v39, %v361_v26  ;;  %612 = vmatpush.msra.mxu3 %v3601_v34  ;;  %575 = vmatpush.msra.mxu1 %v3663_v46  ;;  %v387_v24 = vand.u32 2147483647, %v3851_v60  ;;  %v390_v40 = vor.u32 1.1754944e-38, %v389_v16  ;;  %v6413_v39 = vld [vmem:[#allocation26_spill] sm:$0xff]  ;;  %v6415_v2 = vld [vmem:[#allocation36_spill] sm:$0xff]  ;;  %v6416_v18 = vld [vmem:[#allocation37_spill] sm:$0xff] }
  0xbe   :  { %v394_v61 = vmul.f32 0.0, %v376_v3  ;;  %v381_v5 = vmul.f32 %v3876_v12, %v380_v10  ;;  %594 = vmatpush.msra.mxu2 %v3647_v43  ;;  %557 = vmatpush.msra.mxu0 %v3702_v57  ;;  %v6417_v10 = vld [vmem:[#allocation34_spill] sm:$0xff]  ;;  %v6418_v3 = vld [vmem:[#allocation35_spill] sm:$0xff]  ;;  %v6423_v16 = vld [vmem:[#allocation5_spill] sm:$0xff] }
  0xbf   :  { %613 = vmatpush.msra.mxu3 %v3625_v38  ;;  %576 = vmatpush.msra.mxu1 %v3674_v48  ;;  %vm388_vm11 = vcmp.eq.f32.partialorder %v387_v24, 8.507059e+37  ;;  %v6424_v24 = vld [vmem:[#allocation6_spill] sm:$0xff] }
  0xc0   :  { %v3899_v14 = vadd.f32 %v395_v62, %v394_v61  ;;  %v382_v15 = vadd.f32 %v3876_v12, %v381_v5  ;;  %595 = vmatpush.msra.mxu2 %v3679_v49  ;;  %558 = vmatpush.msra.mxu0 %v3723_v4  ;;  %v6419_v62 = vld [vmem:[#allocation39_spill] sm:$0xff]  ;;  %v6420_v61 = vld [vmem:[#allocation2_spill] sm:$0xff] }
  0xc1   :  { %614 = vmatpush.msra.mxu3 %v3684_v50  ;;  %577 = vmatpush.msra.mxu1 %v3707_v58  ;;  %v6421_v5 = vld [vmem:[#allocation3_spill] sm:$0xff] }
  0xc2   :  { %2812 = vtanh.f32 %v3899_v14  ;;  %596 = vmatpush.msra.mxu2 %v3693_v54  ;;  %v386_v26 = vsel %vm385_vm10, %v3876_v12, %v382_v15  ;;  %559 = vmatpush.msra.mxu0 %v6412_v52  ;;  %v6422_v15 = vld [vmem:[#allocation4_spill] sm:$0xff] }
  0xc3   :  { %615 = vmatpush.msra.mxu3 %v3713_v59  ;;  %v391_v51 = vsel %vm388_vm11, %v390_v40, %v386_v26  ;;  %578 = vmatpush.msra.mxu1 %v3728_v8  ;;  %v6425_v26 = vld [vmem:[#allocation7_spill] sm:$0xff]  ;;  %v6426_v40 = vld [vmem:[#allocation10_spill] sm:$0xff] }
  0xc4   :  { %597 = vmatpush.msra.mxu2 %v3733_v9  ;;  %560 = vmatpush.msra.mxu0 %v3780_v55 }
  0xc5   :  { %616 = vmatpush.msra.mxu3 %v3755_v20  ;;  %579 = vmatpush.msra.mxu1 %v6413_v39 }
  0xc6   :  { %598 = vmatpush.msra.mxu2 %v3750_v19  ;;  %561 = vmatpush.msra.mxu0 %v6417_v10 }
  0xc7   :  { %617 = vmatpush.msra.mxu3 %v3773_v53  ;;  %580 = vmatpush.msra.mxu1 %v6414_v23 }
  0xc8   :  { %v2813_v60 = vpop.eup %2812  ;;  %599 = vmatpush.msra.mxu2 %v3785_v56 }
  0xc9   :  { %v398_v12 = vmul.f32 %v2813_v60, %v391_v51  ;;  %618 = vmatpush.msra.mxu3 %v3792_v0  ;;  %581 = vmatpush.msra.mxu1 %v6418_v3  ;;  %v6427_v60 = vld [vmem:[#allocation8_spill] sm:$0xff]  ;;  %v6428_v51 = vld [vmem:[#allocation9_spill] sm:$0xff] }
  0xca   :  { %600 = vmatpush.msra.mxu2 %v6415_v2 }
  0xcb   :  { %415 = vmatmul.f32.vlgmr.msrb.gmra.mxu0 %v398_v12  ;;  %435 = vmatmul.f32.vlgmr.msrb.gmra.mxu1 %v398_v12 }
  0xcc   :  { %455 = vmatmul.f32.vlgmr.msrb.gmra.mxu2 %v398_v12  ;;  %475 = vmatmul.f32.vlgmr.msrb.gmra.mxu3 %v398_v12  ;;  %v6429_v12 = vld [vmem:[#allocation11_spill] sm:$0xff] }
  0xcd   :  { %619 = vmatpush.msra.mxu3 %v6416_v18  ;;  %601 = vmatpush.msra.mxu2 %v6419_v62 }
  0xce   :  { %693 = vmatpush.msrb.mxu0 %v6420_v61  ;;  %713 = vmatpush.msrb.mxu1 %v6421_v5 }
  0xcf   :  { %620 = vmatpush.msra.mxu3 %v3837_v33  ;;  %733 = vmatpush.msrb.mxu2 %v3418_v63 }
  0xd0   :  { %694 = vmatpush.msrb.mxu0 %v3426_v1  ;;  %714 = vmatpush.msrb.mxu1 %v6422_v15 }
  0xd1   :  { %621 = vmatpush.msra.mxu3 %v3845_v44  ;;  %734 = vmatpush.msrb.mxu2 %v6423_v16 }
  0xd2   :  { %695 = vmatpush.msrb.mxu0 %v6424_v24  ;;  %715 = vmatpush.msrb.mxu1 %v3453_v6  ;;  %v6430_v24 = vld [vmem:[#allocation12_spill] sm:$0xff] }
  0xd3   :  { %753 = vmatpush.msrb.mxu3 %v3487_v13  ;;  %735 = vmatpush.msrb.mxu2 %v3458_v7 }
  0xd4   :  { %696 = vmatpush.msrb.mxu0 %v3476_v11  ;;  %716 = vmatpush.msrb.mxu1 %v6425_v26 }
  0xd5   :  { %754 = vmatpush.msrb.mxu3 %v3509_v17  ;;  %736 = vmatpush.msrb.mxu2 %v6426_v40 }
  0xd6   :  { %697 = vmatpush.msrb.mxu0 %v6427_v60  ;;  %717 = vmatpush.msrb.mxu1 %v6428_v51 }
  0xd7   :  { %755 = vmatpush.msrb.mxu3 %v3528_v21  ;;  %737 = vmatpush.msrb.mxu2 %v6429_v12 }
  0xd8   :  { %698 = vmatpush.msrb.mxu0 %v6430_v24  ;;  %718 = vmatpush.msrb.mxu1 %v3560_v27 }
  0xd9   :  { %756 = vmatpush.msrb.mxu3 %v3534_v22  ;;  %738 = vmatpush.msrb.mxu2 %v3565_v28 }
  0xda   :  { %699 = vmatpush.msrb.mxu0 %v3577_v30  ;;  %719 = vmatpush.msrb.mxu1 %v3582_v31 }
  0xdb   :  { %757 = vmatpush.msrb.mxu3 %v3548_v25  ;;  %739 = vmatpush.msrb.mxu2 %v3588_v32 }
  0xdc   :  { %700 = vmatpush.msrb.mxu0 %v3606_v35  ;;  %720 = vmatpush.msrb.mxu1 %v3611_v36 }
  0xdd   :  { %758 = vmatpush.msrb.mxu3 %v3572_v29  ;;  %740 = vmatpush.msrb.mxu2 %v3617_v37 }
  0xde   :  { %701 = vmatpush.msrb.mxu0 %v3636_v41  ;;  %721 = vmatpush.msrb.mxu1 %v3641_v42 }
  0xdf   :  { %759 = vmatpush.msrb.mxu3 %v3601_v34  ;;  %741 = vmatpush.msrb.mxu2 %v3647_v43 }
  0xe0   :  { %702 = vmatpush.msrb.mxu0 %v3658_v45  ;;  %722 = vmatpush.msrb.mxu1 %v3663_v46 }
  0xe1   :  { %760 = vmatpush.msrb.mxu3 %v3625_v38  ;;  %742 = vmatpush.msrb.mxu2 %v3679_v49 }
  0xe2   :  { %703 = vmatpush.msrb.mxu0 %v3668_v47  ;;  %723 = vmatpush.msrb.mxu1 %v3674_v48 }
  0xe3   :  { %761 = vmatpush.msrb.mxu3 %v3684_v50  ;;  %743 = vmatpush.msrb.mxu2 %v3693_v54 }
  0xe4   :  { %704 = vmatpush.msrb.mxu0 %v3702_v57  ;;  %724 = vmatpush.msrb.mxu1 %v3707_v58 }
  0xe5   :  { %762 = vmatpush.msrb.mxu3 %v3713_v59  ;;  %744 = vmatpush.msrb.mxu2 %v3733_v9 }
  0xe6   :  { %705 = vmatpush.msrb.mxu0 %v3723_v4  ;;  %725 = vmatpush.msrb.mxu1 %v3728_v8  ;;  %v6455_v4 = vld [vmem:[#allocation14_spill] sm:$0xff] }
  0xe7   :  { %763 = vmatpush.msrb.mxu3 %v3755_v20  ;;  %745 = vmatpush.msrb.mxu2 %v3750_v19 }
  0xe8   :  { %706 = vmatpush.msrb.mxu0 %v6412_v52  ;;  %726 = vmatpush.msrb.mxu1 %v6413_v39  ;;  %v128_v39 = vpop.f32.mrf.mxu0  ;;  %v210_v52 = vpop.f32.mrf.mxu2 }
  0xe9   :  { %764 = vmatpush.msrb.mxu3 %v3773_v53  ;;  %746 = vmatpush.msrb.mxu2 %v3785_v56  ;;  %v169_v56 = vpop.f32.mrf.mxu1 }
  0xea   :  { %707 = vmatpush.msrb.mxu0 %v3780_v55  ;;  %727 = vmatpush.msrb.mxu1 %v6414_v23  ;;  %v251_v23 = vpop.f32.mrf.mxu3 }
  0xeb   :  { %765 = vmatpush.msrb.mxu3 %v3792_v0  ;;  %747 = vmatpush.msrb.mxu2 %v6415_v2 }
  0xec   :  { %708 = vmatpush.msrb.mxu0 %v6417_v10  ;;  %728 = vmatpush.msrb.mxu1 %v6418_v3 }
  0xed   :  { %766 = vmatpush.msrb.mxu3 %v6416_v18  ;;  %748 = vmatpush.msrb.mxu2 %v6419_v62 }
  0xef   :  { %767 = vmatpush.msrb.mxu3 %v3837_v33 }
  0xf0   :  { %v4004_v55 = vpop.f32.mrf.mxu0  ;;  %v4008_v0 = vpop.f32.mrf.mxu2 }
  0xf1   :  { %768 = vmatpush.msrb.mxu3 %v3845_v44  ;;  %6431 = vst [vmem:[#allocation2_spill] sm:$0xff] %v4004_v55  ;;  %v4006_v18 = vpop.f32.mrf.mxu1 }
  0xf2   :  { %6432 = vst [vmem:[#allocation3_spill] sm:$0xff] %v4006_v18  ;;  %v4014_v33 = vpop.f32.mrf.mxu3 }
  0xf3   :  { %6433 = vst [vmem:[#allocation4_spill] sm:$0xff] %v4008_v0 }
  0xf4   :  { %6436 = vst [vmem:[#allocation10_spill] sm:$0xff] %v4014_v33 }
  0xf8   :  { %v4010_v2 = vpop.f32.mrf.mxu0  ;;  %v4016_v3 = vpop.f32.mrf.mxu2 }
  0xf9   :  { %6434 = vst [vmem:[#allocation5_spill] sm:$0xff] %v4010_v2  ;;  %v4012_v10 = vpop.f32.mrf.mxu1 }
  0xfa   :  { %6435 = vst [vmem:[#allocation7_spill] sm:$0xff] %v4012_v10  ;;  %v4022_v19 = vpop.f32.mrf.mxu3 }
  0xfb   :  { %6437 = vst [vmem:[#allocation8_spill] sm:$0xff] %v4016_v3 }
  0xfc   :  { %6440 = vst [vmem:[#allocation12_spill] sm:$0xff] %v4022_v19 }
 0x100   :  { %v4018_v62 = vpop.f32.mrf.mxu0  ;;  %v4024_v55 = vpop.f32.mrf.mxu2 }
 0x101   :  { %6438 = vst [vmem:[#allocation9_spill] sm:$0xff] %v4018_v62  ;;  %v4020_v44 = vpop.f32.mrf.mxu1 }
 0x102   :  { %6439 = vst [vmem:[#allocation11_spill] sm:$0xff] %v4020_v44  ;;  %v4030_v0 = vpop.f32.mrf.mxu3 }
 0x103   :  { %6441 = vst [vmem:[#allocation42_spill] sm:$0xff] %v4024_v55 }
 0x104   :  { %6444 = vst [vmem:[#allocation45_spill] sm:$0xff] %v4030_v0 }
 0x108   :  { %v4026_v18 = vpop.f32.mrf.mxu0  ;;  %v4032_v2 = vpop.f32.mrf.mxu2 }
 0x109   :  { %6442 = vst [vmem:[#allocation43_spill] sm:$0xff] %v4026_v18  ;;  %v4028_v8 = vpop.f32.mrf.mxu1 }
 0x10a   :  { %6443 = vst [vmem:[#allocation44_spill] sm:$0xff] %v4028_v8  ;;  %v4038_v3 = vpop.f32.mrf.mxu3  ;;  %v6454_v8 = vld [vmem:[#allocation13_spill] sm:$0xff] }
 0x10b   :  { %6445 = vst [vmem:[#allocation46_spill] sm:$0xff] %v4032_v2  ;;  %v129_v0 = vadd.f32 %v128_v39, %v6454_v8  ;;  %v170_v2 = vadd.f32 %v169_v56, %v6455_v4 }
 0x10c   :  { %6448 = vst [vmem:[#allocation49_spill] sm:$0xff] %v4038_v3 }
 0x110   :  { %v4034_v10 = vpop.f32.mrf.mxu0  ;;  %v4040_v62 = vpop.f32.mrf.mxu2 }
 0x111   :  { %6446 = vst [vmem:[#allocation47_spill] sm:$0xff] %v4034_v10  ;;  %v4036_v33 = vpop.f32.mrf.mxu1 }
 0x112   :  { %6447 = vst [vmem:[#allocation48_spill] sm:$0xff] %v4036_v33  ;;  %v4046_v55 = vpop.f32.mrf.mxu3 }
 0x113   :  { %6449 = vst [vmem:[#allocation50_spill] sm:$0xff] %v4040_v62  ;;  %v6456_v62 = vld [vmem:[#allocation21_spill] sm:$0xff] }
 0x114   :  { %6452 = vst [vmem:[#allocation53_spill] sm:$0xff] %v4046_v55  ;;  %v211_v57 = vadd.f32 %v210_v52, %v6456_v62 }
 0x118   :  { %v4042_v44 = vpop.f32.mrf.mxu0  ;;  %v4048_v18 = vpop.f32.mrf.mxu2 }
 0x119   :  { %6450 = vst [vmem:[#allocation51_spill] sm:$0xff] %v4042_v44  ;;  %v4044_v19 = vpop.f32.mrf.mxu1 }
 0x11a   :  { %6451 = vst [vmem:[#allocation52_spill] sm:$0xff] %v4044_v19  ;;  %v4053_v44 = vpop.f32.mrf.mxu3 }
 0x11b   :  { %6453 = vst [vmem:[#allocation54_spill] sm:$0xff] %v4048_v18 }
 0x11c   :  { %6457 = vst [vmem:[#allocation55_spill] sm:$0xff] %v4053_v44 }
 0x148   :  { %v416_v53 = vpop.f32.mrf.mxu0  ;;  %v436_v10 = vpop.f32.mrf.mxu1 }
 0x149   :  { %v479_v9 = vadd.f32 %v416_v53, %v129_v0  ;;  %v480_v33 = vadd.f32 %v436_v10, %v170_v2 }
 0x14b   :  { %v2753_v58 = vmul.f32 -1.442695, %v479_v9  ;;  %v2754_v3 = vmul.f32 -1.442695, %v480_v33  ;;  %v6458_v9 = vld [vmem:[#allocation38_spill] sm:$0xff] }
 0x14c   :  { %v252_v33 = vadd.f32 %v251_v23, %v6458_v9 }
 0x14d   :  { %2814 = vpow2.f32 %v2753_v58 }
 0x14e   :  { %2816 = vpow2.f32 %v2754_v3 }
 0x14f   :  { %v456_v19 = vpop.f32.mrf.mxu2  ;;  %v476_v0 = vpop.f32.mrf.mxu3 }
 0x150   :  { %v481_v55 = vadd.f32 %v456_v19, %v211_v57  ;;  %v482_v52 = vadd.f32 %v476_v0, %v252_v33 }
 0x152   :  { %v2755_v20 = vmul.f32 -1.442695, %v481_v55 }
 0x153   :  { %v2815_v18 = vpop.eup %2814 }
 0x154   :  { %v2817_v54 = vpop.eup %2816  ;;  %v492_v39 = vadd.f32 1.0, %v2815_v18  ;;  %2818 = vpow2.f32 %v2755_v20 }
 0x155   :  { %v493_v56 = vadd.f32 1.0, %v2817_v54 }
 0x156   :  { %2820 = vrcp.f32 %v492_v39  ;;  %v506_v55 = vand.u32 2147483648, %v492_v39  ;;  %v504_v54 = vand.u32 2147483647, %v492_v39  ;;  %vm500_vm14 = vweird.f32 %v492_v39 }
 0x157   :  { %2822 = vrcp.f32 %v493_v56  ;;  %v521_v18 = vand.u32 2147483648, %v493_v56  ;;  %v519_v4 = vand.u32 2147483647, %v493_v56  ;;  %vm515_vm15 = vweird.f32 %v493_v56 }
 0x158   :  { %vm505_vm2 = vcmp.eq.f32.partialorder %v504_v54, 8.507059e+37 }
 0x159   :  { %vm520_vm3 = vcmp.eq.f32.partialorder %v519_v4, 8.507059e+37 }
 0x15a   :  { %v2819_v53 = vpop.eup %2818 }
 0x15b   :  { %v494_v58 = vadd.f32 1.0, %v2819_v53  ;;  %v507_v53 = vor.u32 1.1754944e-38, %v506_v55 }
 0x15c   :  { %v2821_v2 = vpop.eup %2820 }
 0x15d   :  { %v2823_v10 = vpop.eup %2822  ;;  %v496_v3 = vmul.f32 %v2821_v2, %v492_v39  ;;  %2824 = vrcp.f32 %v494_v58  ;;  %vm501_vm12 = vweird.f32 %v2821_v2  ;;  %vm530_vm5 = vweird.f32 %v494_v58 }
 0x15e   :  { %v511_v44 = vmul.f32 %v2823_v10, %v493_v56  ;;  %2826 = vtanh.f32 %v482_v52  ;;  %vm516_vm13 = vweird.f32 %v2823_v10  ;;  %vm502_vm0 = vmor %vm500_vm14, %vm501_vm12 }
 0x15f   :  { %v497_v57 = vsub.f32 1.0, %v496_v3  ;;  %vm517_vm1 = vmor %vm515_vm15, %vm516_vm13  ;;  %v522_v3 = vor.u32 1.1754944e-38, %v521_v18 }
 0x160   :  { %v512_v19 = vsub.f32 1.0, %v511_v44 }
 0x161   :  { %v498_v20 = vmul.f32 %v2821_v2, %v497_v57 }
 0x162   :  { %v513_v62 = vmul.f32 %v2823_v10, %v512_v19 }
 0x163   :  { %v2825_v8 = vpop.eup %2824  ;;  %v499_v23 = vadd.f32 %v2821_v2, %v498_v20 }
 0x164   :  { %v526_v0 = vmul.f32 %v2825_v8, %v494_v58  ;;  %v514_v33 = vadd.f32 %v2823_v10, %v513_v62  ;;  %v2827_v52 = vpop.eup %2826  ;;  %vm531_vm4 = vweird.f32 %v2825_v8  ;;  %v536_v62 = vand.u32 2147483648, %v494_v58 }
 0x165   :  { %v503_v44 = vsel %vm502_vm0, %v2821_v2, %v499_v23  ;;  %v534_v2 = vand.u32 2147483647, %v494_v58  ;;  %vm532_vm6 = vmor %vm530_vm5, %vm531_vm4 }
 0x166   :  { %v527_v9 = vsub.f32 1.0, %v526_v0  ;;  %v508_v57 = vsel %vm505_vm2, %v507_v53, %v503_v44  ;;  %v518_v48 = vsel %vm517_vm1, %v2823_v10, %v514_v33  ;;  %v537_v18 = vor.u32 1.1754944e-38, %v536_v62  ;;  %v6491_v44 = vld [vmem:[#allocation38_spill] sm:$0xff] }
 0x167   :  { %v523_v19 = vsel %vm520_vm3, %v522_v3, %v518_v48  ;;  %v542_v47 = vmul.f32 %v2827_v52, %v508_v57  ;;  %vm535_vm7 = vcmp.eq.f32.partialorder %v534_v2, 8.507059e+37  ;;  %v6492_v52 = vld [vmem:[#allocation10_spill] sm:$0xff] }
 0x168   :  { %v541_v59 = vmul.f32 %v523_v19, %v3899_v14  ;;  %v528_v20 = vmul.f32 %v2825_v8, %v527_v9  ;;  %v255_v57 = vadd.f32 %v6492_v52, %v6491_v44  ;;  %v4241_v52 = vld [vmem:[%s6118_s2 + $0x168] sm:$0xff] }
 0x16a   :  { %v4057_v39 = vadd.f32 %v542_v47, %v541_v59  ;;  %v529_v56 = vadd.f32 %v2825_v8, %v528_v20  ;;  %v6459_v47 = vld [vmem:[#allocation6_spill] sm:$0xff] }
 0x16b   :  { %v6487_v59 = vld [vmem:[#allocation14_spill] sm:$0xff] }
 0x16c   :  { %2828 = vtanh.f32 %v4057_v39  ;;  %v533_v55 = vsel %vm532_vm6, %v2825_v8, %v529_v56  ;;  %v6488_v8 = vld [vmem:[#allocation3_spill] sm:$0xff] }
 0x16d   :  { %v538_v4 = vsel %vm535_vm7, %v537_v18, %v533_v55  ;;  %v173_v14 = vadd.f32 %v6488_v8, %v6487_v59 }
 0x172   :  { %v2829_v10 = vpop.eup %2828 }
 0x173   :  { %v545_v48 = vmul.f32 %v2829_v10, %v538_v4 }
 0x175   :  { %562 = vmatmul.f32.vlgmr.msra.gmra.mxu0 %v545_v48  ;;  %582 = vmatmul.f32.vlgmr.msra.gmra.mxu1 %v545_v48 }
 0x176   :  { %602 = vmatmul.f32.vlgmr.msra.gmra.mxu2 %v545_v48  ;;  %622 = vmatmul.f32.vlgmr.msra.gmra.mxu3 %v545_v48 }
 0x177   :  { %840 = vmatpush.msra.mxu0 %v6420_v61  ;;  %860 = vmatpush.msra.mxu1 %v6421_v5 }
 0x178   :  { %880 = vmatpush.msra.mxu2 %v3418_v63  ;;  %900 = vmatpush.msra.mxu3 %v3487_v13  ;;  %v6460_v63 = vld [vmem:[#allocation20_spill] sm:$0xff]  ;;  %v6465_v13 = vld [vmem:[#allocation18_spill] sm:$0xff] }
 0x179   :  { %841 = vmatpush.msra.mxu0 %v3426_v1  ;;  %861 = vmatpush.msra.mxu1 %v6422_v15  ;;  %v6461_v1 = vld [vmem:[#allocation15_spill] sm:$0xff] }
 0x17a   :  { %881 = vmatpush.msra.mxu2 %v6423_v16  ;;  %901 = vmatpush.msra.mxu3 %v3509_v17  ;;  %v6466_v17 = vld [vmem:[#allocation19_spill] sm:$0xff] }
 0x17b   :  { %842 = vmatpush.msra.mxu0 %v6459_v47  ;;  %862 = vmatpush.msra.mxu1 %v3453_v6  ;;  %v6462_v6 = vld [vmem:[#allocation16_spill] sm:$0xff] }
 0x17c   :  { %882 = vmatpush.msra.mxu2 %v3458_v7  ;;  %902 = vmatpush.msra.mxu3 %v3528_v21  ;;  %v6463_v7 = vld [vmem:[#allocation17_spill] sm:$0xff]  ;;  %v6467_v21 = vld [vmem:[#allocation24_spill] sm:$0xff] }
 0x17d   :  { %843 = vmatpush.msra.mxu0 %v3476_v11  ;;  %863 = vmatpush.msra.mxu1 %v6425_v26  ;;  %v6464_v11 = vld [vmem:[#allocation28_spill] sm:$0xff] }
 0x17e   :  { %883 = vmatpush.msra.mxu2 %v6426_v40  ;;  %903 = vmatpush.msra.mxu3 %v3534_v22  ;;  %v6468_v22 = vld [vmem:[#allocation30_spill] sm:$0xff]  ;;  %v6489_v40 = vld [vmem:[#allocation21_spill] sm:$0xff] }
 0x17f   :  { %844 = vmatpush.msra.mxu0 %v6427_v60  ;;  %864 = vmatpush.msra.mxu1 %v6428_v51  ;;  %v6490_v60 = vld [vmem:[#allocation4_spill] sm:$0xff] }
 0x180   :  { %884 = vmatpush.msra.mxu2 %v6429_v12  ;;  %904 = vmatpush.msra.mxu3 %v3548_v25  ;;  %v6469_v25 = vld [vmem:[#allocation22_spill] sm:$0xff]  ;;  %v214_v51 = vadd.f32 %v6490_v60, %v6489_v40  ;;  %v4175_v60 = vld [vmem:[%s6118_s2 + $0x1d0] sm:$0xff] }
 0x181   :  { %845 = vmatpush.msra.mxu0 %v6430_v24  ;;  %865 = vmatpush.msra.mxu1 %v3560_v27  ;;  %v6470_v27 = vld [vmem:[#allocation23_spill] sm:$0xff] }
 0x182   :  { %885 = vmatpush.msra.mxu2 %v3565_v28  ;;  %905 = vmatpush.msra.mxu3 %v3572_v29  ;;  %v6471_v28 = vld [vmem:[#allocation27_spill] sm:$0xff]  ;;  %v6472_v29 = vld [vmem:[#allocation33_spill] sm:$0xff] }
 0x183   :  { %846 = vmatpush.msra.mxu0 %v3577_v30  ;;  %866 = vmatpush.msra.mxu1 %v3582_v31  ;;  %v6473_v30 = vld [vmem:[#allocation25_spill] sm:$0xff]  ;;  %v6474_v31 = vld [vmem:[#allocation26_spill] sm:$0xff] }
 0x184   :  { %886 = vmatpush.msra.mxu2 %v3588_v32  ;;  %906 = vmatpush.msra.mxu3 %v3601_v34  ;;  %v6475_v32 = vld [vmem:[#allocation32_spill] sm:$0xff]  ;;  %v6476_v34 = vld [vmem:[#allocation37_spill] sm:$0xff] }
 0x185   :  { %847 = vmatpush.msra.mxu0 %v3606_v35  ;;  %867 = vmatpush.msra.mxu1 %v3611_v36  ;;  %v6477_v35 = vld [vmem:[#allocation31_spill] sm:$0xff]  ;;  %v6478_v36 = vld [vmem:[#allocation29_spill] sm:$0xff] }
 0x186   :  { %887 = vmatpush.msra.mxu2 %v3617_v37  ;;  %907 = vmatpush.msra.mxu3 %v3625_v38  ;;  %v6479_v37 = vld [vmem:[#allocation36_spill] sm:$0xff] }
 0x187   :  { %848 = vmatpush.msra.mxu0 %v3636_v41  ;;  %868 = vmatpush.msra.mxu1 %v3641_v42  ;;  %v6480_v38 = vld [vmem:[#allocation40_spill] sm:$0xff]  ;;  %v6481_v41 = vld [vmem:[#allocation34_spill] sm:$0xff]  ;;  %v6482_v42 = vld [vmem:[#allocation35_spill] sm:$0xff] }
 0x188   :  { %888 = vmatpush.msra.mxu2 %v3647_v43  ;;  %908 = vmatpush.msra.mxu3 %v3684_v50  ;;  %v6483_v43 = vld [vmem:[#allocation39_spill] sm:$0xff] }
 0x189   :  { %849 = vmatpush.msra.mxu0 %v3658_v45  ;;  %869 = vmatpush.msra.mxu1 %v3663_v46  ;;  %v6484_v45 = vld [vmem:[#allocation41_spill] sm:$0xff] }
 0x18a   :  { %889 = vmatpush.msra.mxu2 %v3679_v49  ;;  %909 = vmatpush.msra.mxu3 %v6460_v63  ;;  %v6485_v46 = vld [vmem:[#allocation13_spill] sm:$0xff]  ;;  %v6486_v49 = vld [vmem:[#allocation2_spill] sm:$0xff] }
 0x18b   :  { %850 = vmatpush.msra.mxu0 %v6461_v1  ;;  %870 = vmatpush.msra.mxu1 %v6462_v6  ;;  %v132_v50 = vadd.f32 %v6486_v49, %v6485_v46 }
 0x18c   :  { %890 = vmatpush.msra.mxu2 %v6463_v7  ;;  %910 = vmatpush.msra.mxu3 %v6464_v11 }
 0x18d   :  { %851 = vmatpush.msra.mxu0 %v6465_v13  ;;  %871 = vmatpush.msra.mxu1 %v6466_v17 }
 0x18e   :  { %891 = vmatpush.msra.mxu2 %v6467_v21  ;;  %911 = vmatpush.msra.mxu3 %v6468_v22 }
 0x18f   :  { %852 = vmatpush.msra.mxu0 %v6469_v25  ;;  %872 = vmatpush.msra.mxu1 %v6470_v27 }
 0x190   :  { %892 = vmatpush.msra.mxu2 %v6471_v28  ;;  %912 = vmatpush.msra.mxu3 %v6472_v29 }
 0x191   :  { %853 = vmatpush.msra.mxu0 %v6473_v30  ;;  %873 = vmatpush.msra.mxu1 %v6474_v31 }
 0x192   :  { %893 = vmatpush.msra.mxu2 %v6475_v32  ;;  %913 = vmatpush.msra.mxu3 %v6476_v34 }
 0x193   :  { %854 = vmatpush.msra.mxu0 %v6477_v35  ;;  %874 = vmatpush.msra.mxu1 %v6478_v36 }
 0x194   :  { %894 = vmatpush.msra.mxu2 %v6479_v37  ;;  %914 = vmatpush.msra.mxu3 %v6480_v38 }
 0x195   :  { %855 = vmatpush.msra.mxu0 %v6481_v41  ;;  %875 = vmatpush.msra.mxu1 %v6482_v42 }
 0x196   :  { %895 = vmatpush.msra.mxu2 %v6483_v43  ;;  %915 = vmatpush.msra.mxu3 %v6484_v45 }
 0x1f2   :  { %v563_v61 = vpop.f32.mrf.mxu0  ;;  %v583_v5 = vpop.f32.mrf.mxu1 }
 0x1f3   :  { %v626_v15 = vadd.f32 %v563_v61, %v132_v50  ;;  %v627_v16 = vadd.f32 %v583_v5, %v173_v14  ;;  %v4145_v5 = vld [vmem:[%s6118_s2 + $0x1e8] sm:$0xff] }
 0x1f5   :  { %v2756_v24 = vmul.f32 -1.442695, %v626_v15  ;;  %v2757_v26 = vmul.f32 -1.442695, %v627_v16  ;;  %v4151_v15 = vld [vmem:[%s6118_s2 + $0x1f0] sm:$0xff]  ;;  %v4157_v16 = vld [vmem:[%s6118_s2 + $0x1f8] sm:$0xff] }
 0x1f7   :  { %2830 = vpow2.f32 %v2756_v24  ;;  %v4163_v24 = vld [vmem:[%s6118_s2 + $0x1c0] sm:$0xff] }
 0x1f8   :  { %2832 = vpow2.f32 %v2757_v26  ;;  %v4169_v26 = vld [vmem:[%s6118_s2 + $0x1c8] sm:$0xff] }
 0x1f9   :  { %v603_v12 = vpop.f32.mrf.mxu2  ;;  %v623_v33 = vpop.f32.mrf.mxu3 }
 0x1fa   :  { %v628_v9 = vadd.f32 %v603_v12, %v214_v51  ;;  %v629_v56 = vadd.f32 %v623_v33, %v255_v57  ;;  %v4181_v51 = vld [vmem:[%s6118_s2 + $0x1d8] sm:$0xff]  ;;  %v4187_v12 = vld [vmem:[%s6118_s2 + $0x1a0] sm:$0xff]  ;;  %v4247_v57 = vld [vmem:[%s6118_s2 + $0x170] sm:$0xff] }
 0x1fb   :  { %v4229_v33 = vld [vmem:[%s6118_s2 + $0x198] sm:$0xff] }
 0x1fc   :  { %v2758_v58 = vmul.f32 -1.442695, %v628_v9  ;;  %v4193_v9 = vld [vmem:[%s6118_s2 + $0x1a8] sm:$0xff] }
 0x1fd   :  { %v2831_v54 = vpop.eup %2830 }
 0x1fe   :  { %v2833_v23 = vpop.eup %2832  ;;  %v639_v0 = vadd.f32 1.0, %v2831_v54  ;;  %2834 = vpow2.f32 %v2758_v58  ;;  %v4199_v58 = vld [vmem:[%s6118_s2 + $0x1b0] sm:$0xff]  ;;  %v4205_v54 = vld [vmem:[%s6118_s2 + $0x1b8] sm:$0xff] }
 0x1ff   :  { %v640_v53 = vadd.f32 1.0, %v2833_v23  ;;  %v4211_v23 = vld [vmem:[%s6118_s2 + $0x180] sm:$0xff] }
 0x200   :  { %2836 = vrcp.f32 %v639_v0  ;;  %v653_v4 = vand.u32 2147483648, %v639_v0  ;;  %v651_v63 = vand.u32 2147483647, %v639_v0  ;;  %vm647_vm10 = vweird.f32 %v639_v0 }
 0x201   :  { %2838 = vrcp.f32 %v640_v53  ;;  %v668_v48 = vand.u32 2147483648, %v640_v53  ;;  %v666_v6 = vand.u32 2147483647, %v640_v53  ;;  %vm662_vm11 = vweird.f32 %v640_v53 }
 0x202   :  { %v654_v17 = vor.u32 1.1754944e-38, %v653_v4  ;;  %vm652_vm14 = vcmp.eq.f32.partialorder %v651_v63, 8.507059e+37  ;;  %v4301_v4 = vld [vmem:[%s6118_s2 + $0x138] sm:$0xff]  ;;  %v4319_v63 = vld [vmem:[%s6118_s2 + $0x110] sm:$0xff] }
 0x203   :  { %v669_v22 = vor.u32 1.1754944e-38, %v668_v48  ;;  %vm667_vm15 = vcmp.eq.f32.partialorder %v666_v6, 8.507059e+37  ;;  %v4307_v48 = vld [vmem:[%s6118_s2 + $0x100] sm:$0xff] }
 0x204   :  { %v2835_v3 = vpop.eup %2834  ;;  %v4331_v6 = vld [vmem:[%s6118_s2 + $0xe0] sm:$0xff] }
 0x205   :  { %v641_v19 = vadd.f32 1.0, %v2835_v3  ;;  %v4235_v3 = vld [vmem:[%s6118_s2 + $0x160] sm:$0xff] }
 0x206   :  { %v2837_v20 = vpop.eup %2836 }
 0x207   :  { %v2839_v62 = vpop.eup %2838  ;;  %v643_v2 = vmul.f32 %v2837_v20, %v639_v0  ;;  %2840 = vrcp.f32 %v641_v19  ;;  %vm648_vm8 = vweird.f32 %v2837_v20  ;;  %v683_v42 = vand.u32 2147483648, %v641_v19  ;;  %v4217_v0 = vld [vmem:[%s6118_s2 + $0x188] sm:$0xff] }
 0x208   :  { %v658_v55 = vmul.f32 %v2839_v62, %v640_v53  ;;  %2842 = vtanh.f32 %v629_v56  ;;  %vm663_vm9 = vweird.f32 %v2839_v62  ;;  %vm649_vm12 = vmor %vm647_vm10, %vm648_vm8  ;;  %vm677_vm1 = vweird.f32 %v641_v19  ;;  %v4223_v53 = vld [vmem:[%s6118_s2 + $0x190] sm:$0xff]  ;;  %v4265_v56 = vld [vmem:[%s6118_s2 + $0x148] sm:$0xff] }
 0x209   :  { %v644_v18 = vsub.f32 1.0, %v643_v2  ;;  %vm664_vm13 = vmor %vm662_vm11, %vm663_vm9  ;;  %v681_v43 = vand.u32 2147483647, %v641_v19  ;;  %v684_v50 = vor.u32 1.1754944e-38, %v683_v42  ;;  %v4277_v2 = vld [vmem:[%s6118_s2 + $0x158] sm:$0xff]  ;;  %v4433_v42 = vld [vmem:[%s6118_s2 + $0x68] sm:$0xff] }
 0x20a   :  { %v659_v10 = vsub.f32 1.0, %v658_v55  ;;  %v4283_v55 = vld [vmem:[%s6118_s2 + $0x120] sm:$0xff]  ;;  %6504 = vst [vmem:[#allocation23_spill] sm:$0xff] %v4433_v42 }
 0x20b   :  { %v645_v47 = vmul.f32 %v2837_v20, %v644_v18  ;;  %vm682_vm3 = vcmp.eq.f32.partialorder %v681_v43, 8.507059e+37  ;;  %v4289_v18 = vld [vmem:[%s6118_s2 + $0x128] sm:$0xff]  ;;  %v4439_v43 = vld [vmem:[%s6118_s2 + $0x70] sm:$0xff] }
 0x20c   :  { %v660_v1 = vmul.f32 %v2839_v62, %v659_v10  ;;  %v4295_v10 = vld [vmem:[%s6118_s2 + $0x130] sm:$0xff]  ;;  %6505 = vst [vmem:[#allocation27_spill] sm:$0xff] %v4439_v43 }
 0x20d   :  { %v2841_v7 = vpop.eup %2840  ;;  %v646_v11 = vadd.f32 %v2837_v20, %v645_v47  ;;  %v4313_v47 = vld [vmem:[%s6118_s2 + $0x108] sm:$0xff] }
 0x20e   :  { %v673_v13 = vmul.f32 %v2841_v7, %v641_v19  ;;  %v661_v21 = vadd.f32 %v2839_v62, %v660_v1  ;;  %v2843_v27 = vpop.eup %2842  ;;  %vm678_vm0 = vweird.f32 %v2841_v7  ;;  %v4253_v19 = vld [vmem:[%s6118_s2 + $0x178] sm:$0xff] }
 0x20f   :  { %v650_v25 = vsel %vm649_vm12, %v2837_v20, %v646_v11  ;;  %vm679_vm2 = vmor %vm677_vm1, %vm678_vm0  ;;  %v4259_v20 = vld [vmem:[%s6118_s2 + $0x140] sm:$0xff]  ;;  %v4325_v1 = vld [vmem:[%s6118_s2 + $0x118] sm:$0xff] }
 0x210   :  { %v674_v28 = vsub.f32 1.0, %v673_v13  ;;  %v655_v29 = vsel %vm652_vm14, %v654_v17, %v650_v25  ;;  %v665_v30 = vsel %vm664_vm13, %v2839_v62, %v661_v21  ;;  %v4271_v62 = vld [vmem:[%s6118_s2 + $0x150] sm:$0xff]  ;;  %v4349_v13 = vld [vmem:[%s6118_s2 + $0xf8] sm:$0xff]  ;;  %v4355_v17 = vld [vmem:[%s6118_s2 + $0xc0] sm:$0xff] }
 0x211   :  { %v670_v31 = vsel %vm667_vm15, %v669_v22, %v665_v30  ;;  %v689_v32 = vmul.f32 %v2843_v27, %v655_v29  ;;  %v4343_v11 = vld [vmem:[%s6118_s2 + $0xf0] sm:$0xff]  ;;  %v4361_v21 = vld [vmem:[%s6118_s2 + $0xc8] sm:$0xff]  ;;  %v4373_v25 = vld [vmem:[%s6118_s2 + $0xd8] sm:$0xff] }
 0x212   :  { %v688_v35 = vmul.f32 %v670_v31, %v4057_v39  ;;  %v675_v36 = vmul.f32 %v2841_v7, %v674_v28  ;;  %v4139_v39 = vld [vmem:[%s6118_s2 + $0x1e0] sm:$0xff]  ;;  %v4367_v22 = vld [vmem:[%s6118_s2 + $0xd0] sm:$0xff]  ;;  %6494 = vst [vmem:[#allocation20_spill] sm:$0xff] %v4373_v25  ;;  %v4385_v28 = vld [vmem:[%s6118_s2 + $0xa8] sm:$0xff] }
 0x213   :  { %6493 = vst [vmem:[#allocation6_spill] sm:$0xff] %v4367_v22  ;;  %v4379_v27 = vld [vmem:[%s6118_s2 + $0xa0] sm:$0xff]  ;;  %v4391_v29 = vld [vmem:[%s6118_s2 + $0xb0] sm:$0xff]  ;;  %v4397_v30 = vld [vmem:[%s6118_s2 + $0xb8] sm:$0xff] }
 0x214   :  { %v4133_v37 = vadd.f32 %v689_v32, %v688_v35  ;;  %v676_v41 = vadd.f32 %v2841_v7, %v675_v36  ;;  %6495 = vst [vmem:[#allocation15_spill] sm:$0xff] %v4379_v27  ;;  %v4403_v31 = vld [vmem:[%s6118_s2 + $0x80] sm:$0xff]  ;;  %v4409_v32 = vld [vmem:[%s6118_s2 + $0x88] sm:$0xff]  ;;  %v4415_v35 = vld [vmem:[%s6118_s2 + $0x90] sm:$0xff] }
 0x215   :  { %6496 = vst [vmem:[#allocation16_spill] sm:$0xff] %v4385_v28  ;;  %v4421_v36 = vld [vmem:[%s6118_s2 + $0x98] sm:$0xff] }
 0x216   :  { %2844 = vtanh.f32 %v4133_v37  ;;  %v680_v49 = vsel %vm679_vm2, %v2841_v7, %v676_v41  ;;  %v4337_v7 = vld [vmem:[%s6118_s2 + $0xe8] sm:$0xff]  ;;  %6497 = vst [vmem:[#allocation17_spill] sm:$0xff] %v4391_v29  ;;  %v4427_v41 = vld [vmem:[%s6118_s2 + $0x60] sm:$0xff] }
 0x217   :  { %v685_v14 = vsel %vm682_vm3, %v684_v50, %v680_v49  ;;  %6498 = vst [vmem:[#allocation28_spill] sm:$0xff] %v4397_v30  ;;  %v4445_v49 = vld [vmem:[%s6118_s2 + $0x78] sm:$0xff]  ;;  %v4451_v50 = vld [vmem:[%s6118_s2 + $0x40] sm:$0xff] }
 0x218   :  { %6499 = vst [vmem:[#allocation18_spill] sm:$0xff] %v4403_v31 }
 0x219   :  { %6500 = vst [vmem:[#allocation19_spill] sm:$0xff] %v4409_v32 }
 0x21a   :  { %6501 = vst [vmem:[#allocation24_spill] sm:$0xff] %v4415_v35 }
 0x21b   :  { %6502 = vst [vmem:[#allocation30_spill] sm:$0xff] %v4421_v36 }
 0x21c   :  { %v2845_v8 = vpop.eup %2844  ;;  %6503 = vst [vmem:[#allocation22_spill] sm:$0xff] %v4427_v41 }
 0x21d   :  { %v692_v61 = vmul.f32 %v2845_v8, %v685_v14  ;;  %6506 = vst [vmem:[#allocation33_spill] sm:$0xff] %v4445_v49  ;;  %v4457_v8 = vld [vmem:[%s6118_s2 + $0x48] sm:$0xff]  ;;  %v4463_v14 = vld [vmem:[%s6118_s2 + $0x50] sm:$0xff] }
 0x21e   :  { %6507 = vst [vmem:[#allocation25_spill] sm:$0xff] %v4451_v50 }
 0x21f   :  { %709 = vmatmul.f32.vlgmr.msrb.gmra.mxu0 %v692_v61  ;;  %729 = vmatmul.f32.vlgmr.msrb.gmra.mxu1 %v692_v61  ;;  %6508 = vst [vmem:[#allocation26_spill] sm:$0xff] %v4457_v8 }
 0x220   :  { %749 = vmatmul.f32.vlgmr.msrb.gmra.mxu2 %v692_v61  ;;  %769 = vmatmul.f32.vlgmr.msrb.gmra.mxu3 %v692_v61  ;;  %6509 = vst [vmem:[#allocation32_spill] sm:$0xff] %v4463_v14  ;;  %v4470_v61 = vld [vmem:[%s6118_s2 + $0x20] sm:$0xff] }
 0x221   :  { %987 = vmatpush.msrb.mxu0 %v4139_v39  ;;  %1007 = vmatpush.msrb.mxu1 %v4145_v5  ;;  %6510 = vst [vmem:[#allocation37_spill] sm:$0xff] %v4470_v61 }
 0x222   :  { %1027 = vmatpush.msrb.mxu2 %v4151_v15  ;;  %1047 = vmatpush.msrb.mxu3 %v4157_v16 }
 0x223   :  { %988 = vmatpush.msrb.mxu0 %v4163_v24  ;;  %1008 = vmatpush.msrb.mxu1 %v4169_v26 }
 0x224   :  { %1028 = vmatpush.msrb.mxu2 %v4175_v60  ;;  %1048 = vmatpush.msrb.mxu3 %v4181_v51 }
 0x225   :  { %989 = vmatpush.msrb.mxu0 %v4187_v12  ;;  %1009 = vmatpush.msrb.mxu1 %v4193_v9 }
 0x226   :  { %1029 = vmatpush.msrb.mxu2 %v4199_v58  ;;  %1049 = vmatpush.msrb.mxu3 %v4205_v54 }
 0x227   :  { %990 = vmatpush.msrb.mxu0 %v4211_v23  ;;  %1010 = vmatpush.msrb.mxu1 %v4217_v0 }
 0x228   :  { %1030 = vmatpush.msrb.mxu2 %v4223_v53  ;;  %1050 = vmatpush.msrb.mxu3 %v4229_v33 }
 0x229   :  { %991 = vmatpush.msrb.mxu0 %v4235_v3  ;;  %1011 = vmatpush.msrb.mxu1 %v4241_v52 }
 0x22a   :  { %1031 = vmatpush.msrb.mxu2 %v4247_v57  ;;  %1051 = vmatpush.msrb.mxu3 %v4253_v19 }
 0x22b   :  { %992 = vmatpush.msrb.mxu0 %v4259_v20  ;;  %1012 = vmatpush.msrb.mxu1 %v4265_v56 }
 0x22c   :  { %1032 = vmatpush.msrb.mxu2 %v4271_v62  ;;  %1052 = vmatpush.msrb.mxu3 %v4277_v2 }
 0x22d   :  { %993 = vmatpush.msrb.mxu0 %v4283_v55  ;;  %1013 = vmatpush.msrb.mxu1 %v4289_v18 }
 0x22e   :  { %1033 = vmatpush.msrb.mxu2 %v4295_v10  ;;  %1053 = vmatpush.msrb.mxu3 %v4301_v4 }
 0x22f   :  { %994 = vmatpush.msrb.mxu0 %v4307_v48  ;;  %1014 = vmatpush.msrb.mxu1 %v4313_v47 }
 0x230   :  { %1034 = vmatpush.msrb.mxu2 %v4319_v63  ;;  %1054 = vmatpush.msrb.mxu3 %v4325_v1 }
 0x231   :  { %995 = vmatpush.msrb.mxu0 %v4331_v6  ;;  %1015 = vmatpush.msrb.mxu1 %v4337_v7 }
 0x232   :  { %1035 = vmatpush.msrb.mxu2 %v4343_v11  ;;  %1055 = vmatpush.msrb.mxu3 %v4349_v13 }
 0x233   :  { %996 = vmatpush.msrb.mxu0 %v4355_v17  ;;  %1016 = vmatpush.msrb.mxu1 %v4361_v21 }
 0x234   :  { %1036 = vmatpush.msrb.mxu2 %v4367_v22  ;;  %1056 = vmatpush.msrb.mxu3 %v4373_v25 }
 0x235   :  { %997 = vmatpush.msrb.mxu0 %v4379_v27  ;;  %1017 = vmatpush.msrb.mxu1 %v4385_v28 }
 0x236   :  { %1037 = vmatpush.msrb.mxu2 %v4391_v29  ;;  %1057 = vmatpush.msrb.mxu3 %v4397_v30 }
 0x237   :  { %998 = vmatpush.msrb.mxu0 %v4403_v31  ;;  %1018 = vmatpush.msrb.mxu1 %v4409_v32 }
 0x238   :  { %1038 = vmatpush.msrb.mxu2 %v4415_v35  ;;  %1058 = vmatpush.msrb.mxu3 %v4421_v36  ;;  %v6518_v35 = vld [vmem:[#allocation8_spill] sm:$0xff] }
 0x239   :  { %999 = vmatpush.msrb.mxu0 %v4427_v41  ;;  %1019 = vmatpush.msrb.mxu1 %v4433_v42  ;;  %v217_v32 = vadd.f32 %v6518_v35, %v6489_v40 }
 0x23a   :  { %1039 = vmatpush.msrb.mxu2 %v4439_v43  ;;  %1059 = vmatpush.msrb.mxu3 %v4445_v49 }
 0x23b   :  { %1000 = vmatpush.msrb.mxu0 %v4451_v50  ;;  %1020 = vmatpush.msrb.mxu1 %v4457_v8  ;;  %v4476_v8 = vld [vmem:[%s6118_s2 + $0x28] sm:$0xff] }
 0x23c   :  { %1040 = vmatpush.msrb.mxu2 %v4463_v14  ;;  %1060 = vmatpush.msrb.mxu3 %v6476_v34  ;;  %6511 = vst [vmem:[#allocation31_spill] sm:$0xff] %v4476_v8  ;;  %v4482_v14 = vld [vmem:[%s6118_s2 + $0x30] sm:$0xff]  ;;  %v4489_v34 = vld [vmem:[%s6118_s2] sm:$0xff] }
 0x23d   :  { %1001 = vmatpush.msrb.mxu0 %v4470_v61  ;;  %1021 = vmatpush.msrb.mxu1 %v4476_v8  ;;  %6512 = vst [vmem:[#allocation29_spill] sm:$0xff] %v4482_v14  ;;  %v4495_v8 = vld [vmem:[%s6118_s2 + $0x8] sm:$0xff] }
 0x23e   :  { %1041 = vmatpush.msrb.mxu2 %v4482_v14  ;;  %1061 = vmatpush.msrb.mxu3 %v6480_v38  ;;  %6513 = vst [vmem:[#allocation36_spill] sm:$0xff] %v4489_v34  ;;  %v4501_v14 = vld [vmem:[%s6118_s2 + $0x10] sm:$0xff]  ;;  %v6516_v38 = vld [vmem:[#allocation5_spill] sm:$0xff] }
 0x23f   :  { %1002 = vmatpush.msrb.mxu0 %v4489_v34  ;;  %6514 = vst [vmem:[#allocation40_spill] sm:$0xff] %v4495_v8  ;;  %1022 = vmatpush.msrb.mxu1 %v4495_v8  ;;  %v135_v61 = vadd.f32 %v6516_v38, %v6485_v46  ;;  %v6517_v34 = vld [vmem:[#allocation7_spill] sm:$0xff] }
 0x240   :  { %6515 = vst [vmem:[#allocation34_spill] sm:$0xff] %v4501_v14  ;;  %1042 = vmatpush.msrb.mxu2 %v4501_v14  ;;  %1062 = vmatpush.msrb.mxu3 %v6484_v45  ;;  %v176_v50 = vadd.f32 %v6517_v34, %v6487_v59 }
 0x29c   :  { %v710_v49 = vpop.f32.mrf.mxu0  ;;  %v730_v43 = vpop.f32.mrf.mxu1 }
 0x29d   :  { %v773_v42 = vadd.f32 %v710_v49, %v135_v61  ;;  %v774_v41 = vadd.f32 %v730_v43, %v176_v50 }
 0x29f   :  { %v2759_v8 = vmul.f32 -1.442695, %v773_v42  ;;  %v2760_v36 = vmul.f32 -1.442695, %v774_v41  ;;  %v6519_v42 = vld [vmem:[#allocation12_spill] sm:$0xff] }
 0x2a0   :  { %v258_v41 = vadd.f32 %v6519_v42, %v6491_v44 }
 0x2a1   :  { %2846 = vpow2.f32 %v2759_v8 }
 0x2a2   :  { %2848 = vpow2.f32 %v2760_v36 }
 0x2a3   :  { %v750_v14 = vpop.f32.mrf.mxu2  ;;  %v770_v34 = vpop.f32.mrf.mxu3 }
 0x2a4   :  { %v775_v31 = vadd.f32 %v750_v14, %v217_v32  ;;  %v776_v8 = vadd.f32 %v770_v34, %v258_v41 }
 0x2a6   :  { %v2761_v45 = vmul.f32 -1.442695, %v775_v31 }
 0x2a7   :  { %v2847_v30 = vpop.eup %2846 }
 0x2a8   :  { %v2849_v29 = vpop.eup %2848  ;;  %v786_v38 = vadd.f32 1.0, %v2847_v30  ;;  %2850 = vpow2.f32 %v2761_v45 }
 0x2a9   :  { %v787_v46 = vadd.f32 1.0, %v2849_v29 }
 0x2aa   :  { %2852 = vrcp.f32 %v786_v38  ;;  %v800_v61 = vand.u32 2147483648, %v786_v38  ;;  %v798_v45 = vand.u32 2147483647, %v786_v38  ;;  %vm794_vm6 = vweird.f32 %v786_v38 }
 0x2ab   :  { %2854 = vrcp.f32 %v787_v46  ;;  %v815_v30 = vand.u32 2147483648, %v787_v46  ;;  %v813_v59 = vand.u32 2147483647, %v787_v46  ;;  %vm809_vm7 = vweird.f32 %v787_v46 }
 0x2ac   :  { %vm799_vm10 = vcmp.eq.f32.partialorder %v798_v45, 8.507059e+37  ;;  %v6526_v45 = vld [vmem:[#allocation18_spill] sm:$0xff] }
 0x2ad   :  { %vm814_vm11 = vcmp.eq.f32.partialorder %v813_v59, 8.507059e+37 }
 0x2ae   :  { %v2851_v49 = vpop.eup %2850 }
 0x2af   :  { %v788_v43 = vadd.f32 1.0, %v2851_v49  ;;  %v801_v49 = vor.u32 1.1754944e-38, %v800_v61 }
 0x2b0   :  { %v2853_v50 = vpop.eup %2852 }
 0x2b1   :  { %v2855_v35 = vpop.eup %2854  ;;  %v790_v36 = vmul.f32 %v2853_v50, %v786_v38  ;;  %2856 = vrcp.f32 %v788_v43  ;;  %vm795_vm4 = vweird.f32 %v2853_v50  ;;  %vm824_vm13 = vweird.f32 %v788_v43 }
 0x2b2   :  { %v805_v32 = vmul.f32 %v2855_v35, %v787_v46  ;;  %2858 = vtanh.f32 %v776_v8  ;;  %vm810_vm5 = vweird.f32 %v2855_v35  ;;  %vm796_vm8 = vmor %vm794_vm6, %vm795_vm4 }
 0x2b3   :  { %v791_v31 = vsub.f32 1.0, %v790_v36  ;;  %vm811_vm9 = vmor %vm809_vm7, %vm810_vm5  ;;  %v816_v36 = vor.u32 1.1754944e-38, %v815_v30 }
 0x2b4   :  { %v806_v14 = vsub.f32 1.0, %v805_v32 }
 0x2b5   :  { %v792_v29 = vmul.f32 %v2853_v50, %v791_v31 }
 0x2b6   :  { %v807_v40 = vmul.f32 %v2855_v35, %v806_v14 }
 0x2b7   :  { %v2857_v28 = vpop.eup %2856  ;;  %v793_v42 = vadd.f32 %v2853_v50, %v792_v29 }
 0x2b8   :  { %v820_v34 = vmul.f32 %v2857_v28, %v788_v43  ;;  %v808_v41 = vadd.f32 %v2855_v35, %v807_v40  ;;  %v2859_v8 = vpop.eup %2858  ;;  %vm825_vm12 = vweird.f32 %v2857_v28  ;;  %v830_v40 = vand.u32 2147483648, %v788_v43 }
 0x2b9   :  { %v797_v32 = vsel %vm796_vm8, %v2853_v50, %v793_v42  ;;  %v828_v50 = vand.u32 2147483647, %v788_v43  ;;  %vm826_vm14 = vmor %vm824_vm13, %vm825_vm12  ;;  %v6525_v43 = vld [vmem:[#allocation28_spill] sm:$0xff]  ;;  %v6527_v42 = vld [vmem:[#allocation19_spill] sm:$0xff] }
 0x2ba   :  { %v821_v44 = vsub.f32 1.0, %v820_v34  ;;  %v802_v31 = vsel %vm799_vm10, %v801_v49, %v797_v32  ;;  %v812_v27 = vsel %vm811_vm9, %v2855_v35, %v808_v41  ;;  %v831_v30 = vor.u32 1.1754944e-38, %v830_v40  ;;  %v6528_v34 = vld [vmem:[#allocation24_spill] sm:$0xff]  ;;  %v6529_v49 = vld [vmem:[#allocation30_spill] sm:$0xff]  ;;  %v6532_v32 = vld [vmem:[#allocation27_spill] sm:$0xff] }
 0x2bb   :  { %v817_v14 = vsel %vm814_vm11, %v816_v36, %v812_v27  ;;  %v836_v25 = vmul.f32 %v2859_v8, %v802_v31  ;;  %vm829_vm15 = vcmp.eq.f32.partialorder %v828_v50, 8.507059e+37  ;;  %v6530_v41 = vld [vmem:[#allocation22_spill] sm:$0xff]  ;;  %v6531_v36 = vld [vmem:[#allocation23_spill] sm:$0xff]  ;;  %v6533_v8 = vld [vmem:[#allocation33_spill] sm:$0xff] }
 0x2bc   :  { %v835_v22 = vmul.f32 %v817_v14, %v4133_v37  ;;  %v822_v29 = vmul.f32 %v2857_v28, %v821_v44  ;;  %v6520_v44 = vld [vmem:[#allocation6_spill] sm:$0xff]  ;;  %v6521_v37 = vld [vmem:[#allocation20_spill] sm:$0xff]  ;;  %v6534_v31 = vld [vmem:[#allocation25_spill] sm:$0xff] }
 0x2bd   :  { %v6535_v14 = vld [vmem:[#allocation26_spill] sm:$0xff]  ;;  %v6538_v40 = vld [vmem:[#allocation37_spill] sm:$0xff]  ;;  %v6539_v50 = vld [vmem:[#allocation31_spill] sm:$0xff] }
 0x2be   :  { %v4514_v38 = vadd.f32 %v836_v25, %v835_v22  ;;  %v823_v46 = vadd.f32 %v2857_v28, %v822_v29  ;;  %v6522_v22 = vld [vmem:[#allocation15_spill] sm:$0xff]  ;;  %v6523_v25 = vld [vmem:[#allocation16_spill] sm:$0xff] }
 0x2bf   :  { %v6536_v29 = vld [vmem:[#allocation32_spill] sm:$0xff] }
 0x2c0   :  { %2860 = vtanh.f32 %v4514_v38  ;;  %v827_v61 = vsel %vm826_vm14, %v2857_v28, %v823_v46  ;;  %v6524_v28 = vld [vmem:[#allocation17_spill] sm:$0xff] }
 0x2c1   :  { %v832_v59 = vsel %vm829_vm15, %v831_v30, %v827_v61  ;;  %v4575_v46 = vld [vmem:[%s6118_s2 + $0x58] sm:$0xff] }
 0x2c2   :  { %6537 = vst [vmem:[#allocation35_spill] sm:$0xff] %v4575_v46  ;;  %v6540_v61 = vld [vmem:[#allocation29_spill] sm:$0xff] }
 0x2c3   :  { %v4584_v30 = vld [vmem:[%s6118_s2 + $0x38] sm:$0xff] }
 0x2c4   :  { %6541 = vst [vmem:[#allocation39_spill] sm:$0xff] %v4584_v30 }
 0x2c6   :  { %v2861_v35 = vpop.eup %2860 }
 0x2c7   :  { %v839_v27 = vmul.f32 %v2861_v35, %v832_v59  ;;  %v6542_v35 = vld [vmem:[#allocation36_spill] sm:$0xff] }
 0x2c8   :  { %v6543_v59 = vld [vmem:[#allocation40_spill] sm:$0xff] }
 0x2c9   :  { %856 = vmatmul.f32.vlgmr.msra.gmra.mxu0 %v839_v27  ;;  %876 = vmatmul.f32.vlgmr.msra.gmra.mxu1 %v839_v27 }
 0x2ca   :  { %896 = vmatmul.f32.vlgmr.msra.gmra.mxu2 %v839_v27  ;;  %916 = vmatmul.f32.vlgmr.msra.gmra.mxu3 %v839_v27  ;;  %v6544_v27 = vld [vmem:[#allocation34_spill] sm:$0xff] }
 0x2cb   :  { %1134 = vmatpush.msra.mxu0 %v4139_v39  ;;  %1154 = vmatpush.msra.mxu1 %v4145_v5 }
 0x2cc   :  { %1174 = vmatpush.msra.mxu2 %v4151_v15  ;;  %1194 = vmatpush.msra.mxu3 %v4157_v16 }
 0x2cd   :  { %1135 = vmatpush.msra.mxu0 %v4163_v24  ;;  %1155 = vmatpush.msra.mxu1 %v4169_v26 }
 0x2ce   :  { %1175 = vmatpush.msra.mxu2 %v4175_v60  ;;  %1195 = vmatpush.msra.mxu3 %v4181_v51 }
 0x2cf   :  { %1136 = vmatpush.msra.mxu0 %v4187_v12  ;;  %1156 = vmatpush.msra.mxu1 %v4193_v9 }
 0x2d0   :  { %1176 = vmatpush.msra.mxu2 %v4199_v58  ;;  %1196 = vmatpush.msra.mxu3 %v4205_v54 }
 0x2d1   :  { %1137 = vmatpush.msra.mxu0 %v4211_v23  ;;  %1157 = vmatpush.msra.mxu1 %v4217_v0 }
 0x2d2   :  { %1177 = vmatpush.msra.mxu2 %v4223_v53  ;;  %1197 = vmatpush.msra.mxu3 %v4229_v33 }
 0x2d3   :  { %1138 = vmatpush.msra.mxu0 %v4235_v3  ;;  %1158 = vmatpush.msra.mxu1 %v4241_v52 }
 0x2d4   :  { %1178 = vmatpush.msra.mxu2 %v4247_v57  ;;  %1198 = vmatpush.msra.mxu3 %v4253_v19 }
 0x2d5   :  { %1139 = vmatpush.msra.mxu0 %v4259_v20  ;;  %1159 = vmatpush.msra.mxu1 %v4265_v56 }
 0x2d6   :  { %1179 = vmatpush.msra.mxu2 %v4271_v62  ;;  %1199 = vmatpush.msra.mxu3 %v4277_v2 }
 0x2d7   :  { %1140 = vmatpush.msra.mxu0 %v4283_v55  ;;  %1160 = vmatpush.msra.mxu1 %v4289_v18 }
 0x2d8   :  { %1180 = vmatpush.msra.mxu2 %v4295_v10  ;;  %1200 = vmatpush.msra.mxu3 %v4301_v4 }
 0x2d9   :  { %1141 = vmatpush.msra.mxu0 %v4307_v48  ;;  %1161 = vmatpush.msra.mxu1 %v4313_v47 }
 0x2da   :  { %1181 = vmatpush.msra.mxu2 %v4319_v63  ;;  %1201 = vmatpush.msra.mxu3 %v4325_v1 }
 0x2db   :  { %1142 = vmatpush.msra.mxu0 %v4331_v6  ;;  %1162 = vmatpush.msra.mxu1 %v4337_v7 }
 0x2dc   :  { %1182 = vmatpush.msra.mxu2 %v4343_v11  ;;  %1202 = vmatpush.msra.mxu3 %v4349_v13 }
 0x2dd   :  { %1143 = vmatpush.msra.mxu0 %v4355_v17  ;;  %1163 = vmatpush.msra.mxu1 %v4361_v21 }
 0x2de   :  { %1183 = vmatpush.msra.mxu2 %v6520_v44  ;;  %1203 = vmatpush.msra.mxu3 %v6521_v37 }
 0x2df   :  { %1144 = vmatpush.msra.mxu0 %v6522_v22  ;;  %1164 = vmatpush.msra.mxu1 %v6523_v25 }
 0x2e0   :  { %1184 = vmatpush.msra.mxu2 %v6524_v28  ;;  %1204 = vmatpush.msra.mxu3 %v6525_v43 }
 0x2e1   :  { %1145 = vmatpush.msra.mxu0 %v6526_v45  ;;  %1165 = vmatpush.msra.mxu1 %v6527_v42 }
 0x2e2   :  { %1185 = vmatpush.msra.mxu2 %v6528_v34  ;;  %1205 = vmatpush.msra.mxu3 %v6529_v49 }
 0x2e3   :  { %1146 = vmatpush.msra.mxu0 %v6530_v41  ;;  %1166 = vmatpush.msra.mxu1 %v6531_v36  ;;  %v6551_v41 = vld [vmem:[#allocation42_spill] sm:$0xff] }
 0x2e4   :  { %1186 = vmatpush.msra.mxu2 %v6532_v32  ;;  %1206 = vmatpush.msra.mxu3 %v6533_v8 }
 0x2e5   :  { %1147 = vmatpush.msra.mxu0 %v6534_v31  ;;  %1167 = vmatpush.msra.mxu1 %v6535_v14  ;;  %v6549_v14 = vld [vmem:[#allocation11_spill] sm:$0xff] }
 0x2e6   :  { %1187 = vmatpush.msra.mxu2 %v6536_v29  ;;  %1207 = vmatpush.msra.mxu3 %v4575_v46  ;;  %v6548_v29 = vld [vmem:[#allocation14_spill] sm:$0xff] }
 0x2e7   :  { %1148 = vmatpush.msra.mxu0 %v6538_v40  ;;  %1168 = vmatpush.msra.mxu1 %v6539_v50  ;;  %v4593_v40 = vld [vmem:[%s6118_s2 + $0x18] sm:$0xff]  ;;  %v179_v31 = vadd.f32 %v6549_v14, %v6548_v29 }
 0x2e8   :  { %1188 = vmatpush.msra.mxu2 %v6540_v61  ;;  %1208 = vmatpush.msra.mxu3 %v4584_v30  ;;  %6545 = vst [vmem:[#allocation41_spill] sm:$0xff] %v4593_v40  ;;  %v6546_v61 = vld [vmem:[#allocation13_spill] sm:$0xff] }
 0x2e9   :  { %1149 = vmatpush.msra.mxu0 %v6542_v35  ;;  %1169 = vmatpush.msra.mxu1 %v6543_v59  ;;  %v6547_v50 = vld [vmem:[#allocation9_spill] sm:$0xff] }
 0x2ea   :  { %1189 = vmatpush.msra.mxu2 %v6544_v27  ;;  %1209 = vmatpush.msra.mxu3 %v4593_v40  ;;  %v138_v46 = vadd.f32 %v6547_v50, %v6546_v61  ;;  %v6550_v27 = vld [vmem:[#allocation21_spill] sm:$0xff] }
 0x2eb   :  { %v220_v49 = vadd.f32 %v6551_v41, %v6550_v27 }
 0x346   :  { %v857_v30 = vpop.f32.mrf.mxu0  ;;  %v877_v8 = vpop.f32.mrf.mxu1 }
 0x347   :  { %v920_v35 = vadd.f32 %v857_v30, %v138_v46  ;;  %v921_v32 = vadd.f32 %v877_v8, %v179_v31  ;;  %v6552_v8 = vld [vmem:[#allocation38_spill] sm:$0xff]  ;;  %v6553_v31 = vld [vmem:[#allocation45_spill] sm:$0xff] }
 0x349   :  { %v2762_v59 = vmul.f32 -1.442695, %v920_v35  ;;  %v2763_v36 = vmul.f32 -1.442695, %v921_v32  ;;  %v261_v32 = vadd.f32 %v6553_v31, %v6552_v8 }
 0x34b   :  { %2862 = vpow2.f32 %v2762_v59 }
 0x34c   :  { %2864 = vpow2.f32 %v2763_v36 }
 0x34d   :  { %v897_v34 = vpop.f32.mrf.mxu2  ;;  %v917_v14 = vpop.f32.mrf.mxu3 }
 0x34e   :  { %v922_v42 = vadd.f32 %v897_v34, %v220_v49  ;;  %v923_v59 = vadd.f32 %v917_v14, %v261_v32 }
 0x350   :  { %v2764_v40 = vmul.f32 -1.442695, %v922_v42 }
 0x351   :  { %v2863_v45 = vpop.eup %2862 }
 0x352   :  { %v2865_v43 = vpop.eup %2864  ;;  %v933_v50 = vadd.f32 1.0, %v2863_v45  ;;  %2866 = vpow2.f32 %v2764_v40 }
 0x353   :  { %v934_v61 = vadd.f32 1.0, %v2865_v43 }
 0x354   :  { %2868 = vrcp.f32 %v933_v50  ;;  %v947_v27 = vand.u32 2147483648, %v933_v50  ;;  %v945_v40 = vand.u32 2147483647, %v933_v50  ;;  %vm941_vm2 = vweird.f32 %v933_v50 }
 0x355   :  { %2870 = vrcp.f32 %v934_v61  ;;  %v962_v45 = vand.u32 2147483648, %v934_v61  ;;  %v960_v28 = vand.u32 2147483647, %v934_v61  ;;  %vm956_vm3 = vweird.f32 %v934_v61 }
 0x356   :  { %vm946_vm6 = vcmp.eq.f32.partialorder %v945_v40, 8.507059e+37 }
 0x357   :  { %vm961_vm7 = vcmp.eq.f32.partialorder %v960_v28, 8.507059e+37 }
 0x358   :  { %v2867_v46 = vpop.eup %2866 }
 0x359   :  { %v935_v30 = vadd.f32 1.0, %v2867_v46  ;;  %v948_v46 = vor.u32 1.1754944e-38, %v947_v27 }
 0x35a   :  { %v2869_v35 = vpop.eup %2868 }
 0x35b   :  { %v2871_v41 = vpop.eup %2870  ;;  %v937_v36 = vmul.f32 %v2869_v35, %v933_v50  ;;  %2872 = vrcp.f32 %v935_v30  ;;  %vm942_vm0 = vweird.f32 %v2869_v35  ;;  %vm971_vm9 = vweird.f32 %v935_v30 }
 0x35c   :  { %v952_v34 = vmul.f32 %v2871_v41, %v934_v61  ;;  %2874 = vtanh.f32 %v923_v59  ;;  %vm957_vm1 = vweird.f32 %v2871_v41  ;;  %vm943_vm4 = vmor %vm941_vm2, %vm942_vm0  ;;  %v975_v27 = vand.u32 2147483647, %v935_v30 }
 0x35d   :  { %v938_v42 = vsub.f32 1.0, %v937_v36  ;;  %vm958_vm5 = vmor %vm956_vm3, %vm957_vm1  ;;  %v963_v36 = vor.u32 1.1754944e-38, %v962_v45 }
 0x35e   :  { %v953_v49 = vsub.f32 1.0, %v952_v34  ;;  %vm976_vm11 = vcmp.eq.f32.partialorder %v975_v27, 8.507059e+37 }
 0x35f   :  { %v939_v43 = vmul.f32 %v2869_v35, %v938_v42 }
 0x360   :  { %v954_v29 = vmul.f32 %v2871_v41, %v953_v49 }
 0x361   :  { %v2873_v25 = vpop.eup %2872  ;;  %v940_v31 = vadd.f32 %v2869_v35, %v939_v43 }
 0x362   :  { %v967_v14 = vmul.f32 %v2873_v25, %v935_v30  ;;  %v955_v32 = vadd.f32 %v2871_v41, %v954_v29  ;;  %v2875_v59 = vpop.eup %2874  ;;  %vm972_vm8 = vweird.f32 %v2873_v25  ;;  %v977_v29 = vand.u32 2147483648, %v935_v30 }
 0x363   :  { %v944_v34 = vsel %vm943_vm4, %v2869_v35, %v940_v31  ;;  %vm973_vm10 = vmor %vm971_vm9, %vm972_vm8 }
 0x364   :  { %v968_v8 = vsub.f32 1.0, %v967_v14  ;;  %v949_v42 = vsel %vm946_vm6, %v948_v46, %v944_v34  ;;  %v959_v22 = vsel %vm958_vm5, %v2871_v41, %v955_v32  ;;  %v978_v45 = vor.u32 1.1754944e-38, %v977_v29  ;;  %v6586_v34 = vld [vmem:[#allocation38_spill] sm:$0xff] }
 0x365   :  { %v964_v49 = vsel %vm961_vm7, %v963_v36, %v959_v22  ;;  %v983_v37 = vmul.f32 %v2875_v59, %v949_v42  ;;  %v6587_v59 = vld [vmem:[#allocation49_spill] sm:$0xff] }
 0x366   :  { %v982_v44 = vmul.f32 %v964_v49, %v4514_v38  ;;  %v969_v43 = vmul.f32 %v2873_v25, %v968_v8  ;;  %v6584_v38 = vld [vmem:[#allocation21_spill] sm:$0xff]  ;;  %v264_v42 = vadd.f32 %v6587_v59, %v6586_v34 }
 0x368   :  { %v4605_v50 = vadd.f32 %v983_v37, %v982_v44  ;;  %v970_v61 = vadd.f32 %v2873_v25, %v969_v43  ;;  %v6585_v44 = vld [vmem:[#allocation46_spill] sm:$0xff] }
 0x369   :  { %v223_v37 = vadd.f32 %v6585_v44, %v6584_v38 }
 0x36a   :  { %2876 = vtanh.f32 %v4605_v50  ;;  %v974_v35 = vsel %vm973_vm10, %v2873_v25, %v970_v61 }
 0x36b   :  { %v979_v28 = vsel %vm976_vm11, %v978_v45, %v974_v35 }
 0x370   :  { %v2877_v41 = vpop.eup %2876 }
 0x371   :  { %v986_v22 = vmul.f32 %v2877_v41, %v979_v28 }
 0x373   :  { %1003 = vmatmul.f32.vlgmr.msrb.gmra.mxu0 %v986_v22  ;;  %1023 = vmatmul.f32.vlgmr.msrb.gmra.mxu1 %v986_v22 }
 0x374   :  { %1043 = vmatmul.f32.vlgmr.msrb.gmra.mxu2 %v986_v22  ;;  %1063 = vmatmul.f32.vlgmr.msrb.gmra.mxu3 %v986_v22 }
 0x375   :  { %1281 = vmatpush.msrb.mxu0 %v4139_v39  ;;  %1301 = vmatpush.msrb.mxu1 %v4145_v5  ;;  %v6554_v39 = vld [vmem:[#allocation6_spill] sm:$0xff]  ;;  %v6555_v5 = vld [vmem:[#allocation20_spill] sm:$0xff] }
 0x376   :  { %1321 = vmatpush.msrb.mxu2 %v4151_v15  ;;  %1341 = vmatpush.msrb.mxu3 %v4157_v16  ;;  %v6556_v15 = vld [vmem:[#allocation15_spill] sm:$0xff]  ;;  %v6557_v16 = vld [vmem:[#allocation16_spill] sm:$0xff] }
 0x377   :  { %1282 = vmatpush.msrb.mxu0 %v4163_v24  ;;  %1302 = vmatpush.msrb.mxu1 %v4169_v26  ;;  %v6558_v24 = vld [vmem:[#allocation17_spill] sm:$0xff]  ;;  %v6559_v26 = vld [vmem:[#allocation28_spill] sm:$0xff] }
 0x378   :  { %1322 = vmatpush.msrb.mxu2 %v4175_v60  ;;  %1342 = vmatpush.msrb.mxu3 %v4181_v51  ;;  %v6560_v60 = vld [vmem:[#allocation18_spill] sm:$0xff]  ;;  %v6561_v51 = vld [vmem:[#allocation19_spill] sm:$0xff] }
 0x379   :  { %1283 = vmatpush.msrb.mxu0 %v4187_v12  ;;  %1303 = vmatpush.msrb.mxu1 %v4193_v9  ;;  %v6562_v12 = vld [vmem:[#allocation24_spill] sm:$0xff]  ;;  %v6563_v9 = vld [vmem:[#allocation30_spill] sm:$0xff] }
 0x37a   :  { %1323 = vmatpush.msrb.mxu2 %v4199_v58  ;;  %1343 = vmatpush.msrb.mxu3 %v4205_v54  ;;  %v6564_v58 = vld [vmem:[#allocation22_spill] sm:$0xff]  ;;  %v6565_v54 = vld [vmem:[#allocation23_spill] sm:$0xff] }
 0x37b   :  { %1284 = vmatpush.msrb.mxu0 %v4211_v23  ;;  %1304 = vmatpush.msrb.mxu1 %v4217_v0  ;;  %v6566_v23 = vld [vmem:[#allocation27_spill] sm:$0xff]  ;;  %v6567_v0 = vld [vmem:[#allocation33_spill] sm:$0xff] }
 0x37c   :  { %1324 = vmatpush.msrb.mxu2 %v4223_v53  ;;  %1344 = vmatpush.msrb.mxu3 %v4229_v33  ;;  %v6568_v53 = vld [vmem:[#allocation25_spill] sm:$0xff]  ;;  %v6569_v33 = vld [vmem:[#allocation26_spill] sm:$0xff] }
 0x37d   :  { %1285 = vmatpush.msrb.mxu0 %v4235_v3  ;;  %1305 = vmatpush.msrb.mxu1 %v4241_v52  ;;  %v6570_v3 = vld [vmem:[#allocation32_spill] sm:$0xff]  ;;  %v6571_v52 = vld [vmem:[#allocation35_spill] sm:$0xff] }
 0x37e   :  { %1325 = vmatpush.msrb.mxu2 %v4247_v57  ;;  %1345 = vmatpush.msrb.mxu3 %v4253_v19  ;;  %v6572_v57 = vld [vmem:[#allocation37_spill] sm:$0xff]  ;;  %v6573_v19 = vld [vmem:[#allocation31_spill] sm:$0xff] }
 0x37f   :  { %1286 = vmatpush.msrb.mxu0 %v4259_v20  ;;  %1306 = vmatpush.msrb.mxu1 %v4265_v56  ;;  %v6574_v20 = vld [vmem:[#allocation29_spill] sm:$0xff]  ;;  %v6575_v56 = vld [vmem:[#allocation39_spill] sm:$0xff] }
 0x380   :  { %1326 = vmatpush.msrb.mxu2 %v4271_v62  ;;  %1346 = vmatpush.msrb.mxu3 %v4277_v2  ;;  %v6576_v62 = vld [vmem:[#allocation36_spill] sm:$0xff] }
 0x381   :  { %1287 = vmatpush.msrb.mxu0 %v4283_v55  ;;  %1307 = vmatpush.msrb.mxu1 %v4289_v18  ;;  %v6577_v2 = vld [vmem:[#allocation40_spill] sm:$0xff]  ;;  %v6578_v55 = vld [vmem:[#allocation34_spill] sm:$0xff]  ;;  %v6579_v18 = vld [vmem:[#allocation41_spill] sm:$0xff] }
 0x382   :  { %1327 = vmatpush.msrb.mxu2 %v4295_v10  ;;  %1347 = vmatpush.msrb.mxu3 %v4301_v4  ;;  %v6580_v10 = vld [vmem:[#allocation13_spill] sm:$0xff]  ;;  %v6581_v4 = vld [vmem:[#allocation43_spill] sm:$0xff] }
 0x383   :  { %1288 = vmatpush.msrb.mxu0 %v4307_v48  ;;  %1308 = vmatpush.msrb.mxu1 %v4313_v47  ;;  %v141_v48 = vadd.f32 %v6581_v4, %v6580_v10  ;;  %v6582_v47 = vld [vmem:[#allocation14_spill] sm:$0xff] }
 0x384   :  { %1328 = vmatpush.msrb.mxu2 %v4319_v63  ;;  %1348 = vmatpush.msrb.mxu3 %v4325_v1  ;;  %v6583_v63 = vld [vmem:[#allocation44_spill] sm:$0xff] }
 0x385   :  { %1289 = vmatpush.msrb.mxu0 %v4331_v6  ;;  %1309 = vmatpush.msrb.mxu1 %v4337_v7  ;;  %v182_v1 = vadd.f32 %v6583_v63, %v6582_v47 }
 0x386   :  { %1329 = vmatpush.msrb.mxu2 %v4343_v11  ;;  %1349 = vmatpush.msrb.mxu3 %v4349_v13 }
 0x387   :  { %1290 = vmatpush.msrb.mxu0 %v4355_v17  ;;  %1310 = vmatpush.msrb.mxu1 %v4361_v21 }
 0x388   :  { %1330 = vmatpush.msrb.mxu2 %v6554_v39  ;;  %1350 = vmatpush.msrb.mxu3 %v6555_v5 }
 0x389   :  { %1291 = vmatpush.msrb.mxu0 %v6556_v15  ;;  %1311 = vmatpush.msrb.mxu1 %v6557_v16 }
 0x38a   :  { %1331 = vmatpush.msrb.mxu2 %v6558_v24  ;;  %1351 = vmatpush.msrb.mxu3 %v6559_v26 }
 0x38b   :  { %1292 = vmatpush.msrb.mxu0 %v6560_v60  ;;  %1312 = vmatpush.msrb.mxu1 %v6561_v51 }
 0x38c   :  { %1332 = vmatpush.msrb.mxu2 %v6562_v12  ;;  %1352 = vmatpush.msrb.mxu3 %v6563_v9 }
 0x38d   :  { %1293 = vmatpush.msrb.mxu0 %v6564_v58  ;;  %1313 = vmatpush.msrb.mxu1 %v6565_v54 }
 0x38e   :  { %1333 = vmatpush.msrb.mxu2 %v6566_v23  ;;  %1353 = vmatpush.msrb.mxu3 %v6567_v0 }
 0x38f   :  { %1294 = vmatpush.msrb.mxu0 %v6568_v53  ;;  %1314 = vmatpush.msrb.mxu1 %v6569_v33 }
 0x390   :  { %1334 = vmatpush.msrb.mxu2 %v6570_v3  ;;  %1354 = vmatpush.msrb.mxu3 %v6571_v52 }
 0x391   :  { %1295 = vmatpush.msrb.mxu0 %v6572_v57  ;;  %1315 = vmatpush.msrb.mxu1 %v6573_v19 }
 0x392   :  { %1335 = vmatpush.msrb.mxu2 %v6574_v20  ;;  %1355 = vmatpush.msrb.mxu3 %v6575_v56 }
 0x393   :  { %1296 = vmatpush.msrb.mxu0 %v6576_v62  ;;  %1316 = vmatpush.msrb.mxu1 %v6577_v2 }
 0x394   :  { %1336 = vmatpush.msrb.mxu2 %v6578_v55  ;;  %1356 = vmatpush.msrb.mxu3 %v6579_v18 }
 0x3f0   :  { %v1004_v6 = vpop.f32.mrf.mxu0  ;;  %v1024_v7 = vpop.f32.mrf.mxu1 }
 0x3f1   :  { %v1067_v11 = vadd.f32 %v1004_v6, %v141_v48  ;;  %v1068_v13 = vadd.f32 %v1024_v7, %v182_v1  ;;  %v6589_v1 = vld [vmem:[#allocation48_spill] sm:$0xff] }
 0x3f2   :  { %v185_v6 = vadd.f32 %v6589_v1, %v6582_v47  ;;  %v1489_v1 = vld [vmem:[%s6120_s4 + $0x1e8] sm:$0xff] }
 0x3f3   :  { %v2765_v17 = vmul.f32 -1.442695, %v1067_v11  ;;  %v2766_v21 = vmul.f32 -1.442695, %v1068_v13 }
 0x3f5   :  { %2878 = vpow2.f32 %v2765_v17 }
 0x3f6   :  { %2880 = vpow2.f32 %v2766_v21 }
 0x3f7   :  { %v1044_v25 = vpop.f32.mrf.mxu2  ;;  %v1064_v32 = vpop.f32.mrf.mxu3 }
 0x3f8   :  { %v1069_v8 = vadd.f32 %v1044_v25, %v223_v37  ;;  %v1070_v61 = vadd.f32 %v1064_v32, %v264_v42  ;;  %v6590_v37 = vld [vmem:[#allocation50_spill] sm:$0xff]  ;;  %v6591_v42 = vld [vmem:[#allocation53_spill] sm:$0xff] }
 0x3f9   :  { %v226_v25 = vadd.f32 %v6590_v37, %v6584_v38  ;;  %v1481_v37 = vld [vmem:[%s6120_s4 + $0x1a8] sm:$0xff] }
 0x3fa   :  { %v2767_v30 = vmul.f32 -1.442695, %v1069_v8 }
 0x3fb   :  { %v2879_v40 = vpop.eup %2878 }
 0x3fc   :  { %v2881_v31 = vpop.eup %2880  ;;  %v1080_v14 = vadd.f32 1.0, %v2879_v40  ;;  %2882 = vpow2.f32 %v2767_v30 }
 0x3fd   :  { %v1081_v46 = vadd.f32 1.0, %v2881_v31 }
 0x3fe   :  { %2884 = vrcp.f32 %v1080_v14  ;;  %v1094_v28 = vand.u32 2147483648, %v1080_v14  ;;  %v1092_v5 = vand.u32 2147483647, %v1080_v14  ;;  %vm1088_vm14 = vweird.f32 %v1080_v14 }
 0x3ff   :  { %2886 = vrcp.f32 %v1081_v46  ;;  %v1109_v22 = vand.u32 2147483648, %v1081_v46  ;;  %v1107_v16 = vand.u32 2147483647, %v1081_v46  ;;  %vm1103_vm15 = vweird.f32 %v1081_v46 }
 0x400   :  { %v1095_v51 = vor.u32 1.1754944e-38, %v1094_v28  ;;  %vm1093_vm2 = vcmp.eq.f32.partialorder %v1092_v5, 8.507059e+37 }
 0x401   :  { %v1110_v9 = vor.u32 1.1754944e-38, %v1109_v22  ;;  %vm1108_vm3 = vcmp.eq.f32.partialorder %v1107_v16, 8.507059e+37 }
 0x402   :  { %v2883_v36 = vpop.eup %2882 }
 0x403   :  { %v1082_v49 = vadd.f32 1.0, %v2883_v36 }
 0x404   :  { %v2885_v43 = vpop.eup %2884 }
 0x405   :  { %v2887_v29 = vpop.eup %2886  ;;  %v1084_v27 = vmul.f32 %v2885_v43, %v1080_v14  ;;  %2888 = vrcp.f32 %v1082_v49  ;;  %vm1089_vm12 = vweird.f32 %v2885_v43  ;;  %v1124_v56 = vand.u32 2147483648, %v1082_v49 }
 0x406   :  { %v1099_v35 = vmul.f32 %v2887_v29, %v1081_v46  ;;  %2890 = vtanh.f32 %v1070_v61  ;;  %vm1104_vm13 = vweird.f32 %v2887_v29  ;;  %vm1090_vm0 = vmor %vm1088_vm14, %vm1089_vm12  ;;  %vm1118_vm5 = vweird.f32 %v1082_v49 }
 0x407   :  { %v1085_v45 = vsub.f32 1.0, %v1084_v27  ;;  %vm1105_vm1 = vmor %vm1103_vm15, %vm1104_vm13  ;;  %v1122_v62 = vand.u32 2147483647, %v1082_v49  ;;  %v1125_v55 = vor.u32 1.1754944e-38, %v1124_v56 }
 0x408   :  { %v1100_v41 = vsub.f32 1.0, %v1099_v35 }
 0x409   :  { %v1086_v39 = vmul.f32 %v2885_v43, %v1085_v45  ;;  %vm1123_vm7 = vcmp.eq.f32.partialorder %v1122_v62, 8.507059e+37 }
 0x40a   :  { %v1101_v15 = vmul.f32 %v2887_v29, %v1100_v41 }
 0x40b   :  { %v2889_v24 = vpop.eup %2888  ;;  %v1087_v26 = vadd.f32 %v2885_v43, %v1086_v39 }
 0x40c   :  { %v1114_v60 = vmul.f32 %v2889_v24, %v1082_v49  ;;  %v1102_v12 = vadd.f32 %v2887_v29, %v1101_v15  ;;  %v2891_v54 = vpop.eup %2890  ;;  %vm1119_vm4 = vweird.f32 %v2889_v24  ;;  %v267_v49 = vadd.f32 %v6591_v42, %v6586_v34  ;;  %v1468_v42 = vld [vmem:[%s6120_s4 + $0x140] sm:$0xff] }
 0x40d   :  { %v1091_v58 = vsel %vm1090_vm0, %v2885_v43, %v1087_v26  ;;  %vm1120_vm6 = vmor %vm1118_vm5, %vm1119_vm4 }
 0x40e   :  { %v1115_v23 = vsub.f32 1.0, %v1114_v60  ;;  %v1096_v0 = vsel %vm1093_vm2, %v1095_v51, %v1091_v58  ;;  %v1106_v53 = vsel %vm1105_vm1, %v2887_v29, %v1102_v12 }
 0x40f   :  { %v1111_v33 = vsel %vm1108_vm3, %v1110_v9, %v1106_v53  ;;  %v1130_v3 = vmul.f32 %v2891_v54, %v1096_v0 }
 0x410   :  { %v1129_v52 = vmul.f32 %v1111_v33, %v4605_v50  ;;  %v1116_v57 = vmul.f32 %v2889_v24, %v1115_v23  ;;  %v6588_v50 = vld [vmem:[#allocation47_spill] sm:$0xff] }
 0x411   :  { %v144_v63 = vadd.f32 %v6588_v50, %v6580_v10 }
 0x412   :  { %v4681_v19 = vadd.f32 %v1130_v3, %v1129_v52  ;;  %v1117_v20 = vadd.f32 %v2889_v24, %v1116_v57 }
 0x414   :  { %2892 = vtanh.f32 %v4681_v19  ;;  %v1121_v2 = vsel %vm1120_vm6, %v2889_v24, %v1117_v20 }
 0x415   :  { %v1126_v4 = vsel %vm1123_vm7, %v1125_v55, %v1121_v2 }
 0x41a   :  { %v2893_v18 = vpop.eup %2892 }
 0x41b   :  { %v1133_v48 = vmul.f32 %v2893_v18, %v1126_v4 }
 0x41d   :  { %1150 = vmatmul.f32.vlgmr.msra.gmra.mxu0 %v1133_v48  ;;  %1170 = vmatmul.f32.vlgmr.msra.gmra.mxu1 %v1133_v48 }
 0x41e   :  { %1190 = vmatmul.f32.vlgmr.msra.gmra.mxu2 %v1133_v48  ;;  %1210 = vmatmul.f32.vlgmr.msra.gmra.mxu3 %v1133_v48 }
 0x41f   :  { %1522 = vmatpush.msra.mxu1 %v1489_v1  ;;  %v6594_v1 = vld [vmem:[#allocation54_spill] sm:$0xff] }
 0x49a   :  { %v1151_v7 = vpop.f32.mrf.mxu0  ;;  %v1171_v11 = vpop.f32.mrf.mxu1 }
 0x49b   :  { %v1214_v13 = vadd.f32 %v1151_v7, %v144_v63  ;;  %v1215_v17 = vadd.f32 %v1171_v11, %v185_v6  ;;  %v1490_v6 = vld [vmem:[%s6120_s4 + $0x1f0] sm:$0xff]  ;;  %v1491_v7 = vld [vmem:[%s6120_s4 + $0x1f8] sm:$0xff]  ;;  %v1484_v11 = vld [vmem:[%s6120_s4 + $0x1c0] sm:$0xff] }
 0x49c   :  { %1542 = vmatpush.msra.mxu2 %v1490_v6  ;;  %1562 = vmatpush.msra.mxu3 %v1491_v7  ;;  %v229_v6 = vadd.f32 %v6594_v1, %v6584_v38  ;;  %v1436_v7 = vld [vmem:[%s6120_s4 + $0x40] sm:$0xff]  ;;  %v1439_v38 = vld [vmem:[%s6120_s4 + $0x58] sm:$0xff]  ;;  %v4905_v1 = vld [vmem:[%s6121_s6 + $0x1e8] sm:$0xff] }
 0x49d   :  { %v2768_v21 = vmul.f32 -1.442695, %v1214_v13  ;;  %v2769_v44 = vmul.f32 -1.442695, %v1215_v17  ;;  %v1485_v13 = vld [vmem:[%s6120_s4 + $0x1c8] sm:$0xff]  ;;  %v1486_v17 = vld [vmem:[%s6120_s4 + $0x1d0] sm:$0xff] }
 0x49e   :  { %1523 = vmatpush.msra.mxu1 %v1485_v13  ;;  %1543 = vmatpush.msra.mxu2 %v1486_v17  ;;  %v1438_v13 = vld [vmem:[%s6120_s4 + $0x50] sm:$0xff] }
 0x49f   :  { %2894 = vpow2.f32 %v2768_v21  ;;  %v1487_v21 = vld [vmem:[%s6120_s4 + $0x1d8] sm:$0xff] }
 0x4a0   :  { %2896 = vpow2.f32 %v2769_v44  ;;  %1563 = vmatpush.msra.mxu3 %v1487_v21  ;;  %v1480_v44 = vld [vmem:[%s6120_s4 + $0x1a0] sm:$0xff]  ;;  %1524 = vmatpush.msra.mxu1 %v1481_v37 }
 0x4a1   :  { %v1191_v8 = vpop.f32.mrf.mxu2  ;;  %v1211_v36 = vpop.f32.mrf.mxu3  ;;  %v1432_v21 = vld [vmem:[%s6120_s4 + $0x20] sm:$0xff] }
 0x4a2   :  { %v1216_v30 = vadd.f32 %v1191_v8, %v226_v25  ;;  %v1217_v29 = vadd.f32 %v1211_v36, %v267_v49  ;;  %v1482_v25 = vld [vmem:[%s6120_s4 + $0x1b0] sm:$0xff]  ;;  %v1483_v8 = vld [vmem:[%s6120_s4 + $0x1b8] sm:$0xff]  ;;  %v1469_v49 = vld [vmem:[%s6120_s4 + $0x148] sm:$0xff] }
 0x4a3   :  { %1544 = vmatpush.msra.mxu2 %v1482_v25  ;;  %1564 = vmatpush.msra.mxu3 %v1483_v8  ;;  %v1474_v36 = vld [vmem:[%s6120_s4 + $0x170] sm:$0xff]  ;;  %v1435_v8 = vld [vmem:[%s6120_s4 + $0x38] sm:$0xff] }
 0x4a4   :  { %v2770_v40 = vmul.f32 -1.442695, %v1216_v30  ;;  %v1476_v30 = vld [vmem:[%s6120_s4 + $0x180] sm:$0xff]  ;;  %v1434_v25 = vld [vmem:[%s6120_s4 + $0x30] sm:$0xff] }
 0x4a5   :  { %v2895_v31 = vpop.eup %2894 }
 0x4a6   :  { %v2897_v14 = vpop.eup %2896  ;;  %v1227_v46 = vadd.f32 1.0, %v2895_v31  ;;  %2898 = vpow2.f32 %v2770_v40  ;;  %v1477_v40 = vld [vmem:[%s6120_s4 + $0x188] sm:$0xff]  ;;  %v1478_v31 = vld [vmem:[%s6120_s4 + $0x190] sm:$0xff] }
 0x4a7   :  { %v1228_v32 = vadd.f32 1.0, %v2897_v14  ;;  %1525 = vmatpush.msra.mxu1 %v1477_v40  ;;  %v1479_v14 = vld [vmem:[%s6120_s4 + $0x198] sm:$0xff]  ;;  %1545 = vmatpush.msra.mxu2 %v1478_v31  ;;  %v1429_v40 = vld [vmem:[%s6120_s4 + $0x8] sm:$0xff] }
 0x4a8   :  { %2900 = vrcp.f32 %v1227_v46  ;;  %v1241_v22 = vand.u32 2147483648, %v1227_v46  ;;  %v1239_v15 = vand.u32 2147483647, %v1227_v46  ;;  %vm1235_vm10 = vweird.f32 %v1227_v46  ;;  %1565 = vmatpush.msra.mxu3 %v1479_v14  ;;  %v1430_v14 = vld [vmem:[%s6120_s4 + $0x10] sm:$0xff] }
 0x4a9   :  { %2902 = vrcp.f32 %v1228_v32  ;;  %v1256_v39 = vand.u32 2147483648, %v1228_v32  ;;  %v1254_v24 = vand.u32 2147483647, %v1228_v32  ;;  %vm1250_vm11 = vweird.f32 %v1228_v32  ;;  %1546 = vmatpush.msra.mxu2 %v1474_v36 }
 0x4aa   :  { %v1242_v12 = vor.u32 1.1754944e-38, %v1241_v22  ;;  %vm1240_vm14 = vcmp.eq.f32.partialorder %v1239_v15, 8.507059e+37  ;;  %v1462_v22 = vld [vmem:[%s6120_s4 + $0x110] sm:$0xff]  ;;  %v1457_v15 = vld [vmem:[%s6120_s4 + $0xe8] sm:$0xff] }
 0x4ab   :  { %v1257_v58 = vor.u32 1.1754944e-38, %v1256_v39  ;;  %vm1255_vm15 = vcmp.eq.f32.partialorder %v1254_v24, 8.507059e+37  ;;  %v1463_v39 = vld [vmem:[%s6120_s4 + $0x118] sm:$0xff] }
 0x4ac   :  { %v2899_v59 = vpop.eup %2898  ;;  %v1459_v24 = vld [vmem:[%s6120_s4 + $0xf8] sm:$0xff] }
 0x4ad   :  { %v1229_v43 = vadd.f32 1.0, %v2899_v59  ;;  %v1475_v59 = vld [vmem:[%s6120_s4 + $0x178] sm:$0xff] }
 0x4ae   :  { %v2901_v61 = vpop.eup %2900  ;;  %1566 = vmatpush.msra.mxu3 %v1475_v59 }
 0x4af   :  { %v2903_v27 = vpop.eup %2902  ;;  %v1231_v35 = vmul.f32 %v2901_v61, %v1227_v46  ;;  %2904 = vrcp.f32 %v1229_v43  ;;  %vm1236_vm8 = vweird.f32 %v2901_v61  ;;  %v1271_v2 = vand.u32 2147483648, %v1229_v43  ;;  %v1472_v46 = vld [vmem:[%s6120_s4 + $0x160] sm:$0xff] }
 0x4b0   :  { %v1246_v45 = vmul.f32 %v2903_v27, %v1228_v32  ;;  %2906 = vtanh.f32 %v1217_v29  ;;  %vm1251_vm9 = vweird.f32 %v2903_v27  ;;  %vm1237_vm12 = vmor %vm1235_vm10, %vm1236_vm8  ;;  %vm1265_vm1 = vweird.f32 %v1229_v43  ;;  %v1473_v32 = vld [vmem:[%s6120_s4 + $0x168] sm:$0xff]  ;;  %v1464_v29 = vld [vmem:[%s6120_s4 + $0x120] sm:$0xff] }
 0x4b1   :  { %v1232_v41 = vsub.f32 1.0, %v1231_v35  ;;  %vm1252_vm13 = vmor %vm1250_vm11, %vm1251_vm9  ;;  %v1269_v55 = vand.u32 2147483647, %v1229_v43  ;;  %v1272_v4 = vor.u32 1.1754944e-38, %v1271_v2  ;;  %1526 = vmatpush.msra.mxu1 %v1473_v32  ;;  %v1466_v35 = vld [vmem:[%s6120_s4 + $0x130] sm:$0xff]  ;;  %v1444_v2 = vld [vmem:[%s6120_s4 + $0x80] sm:$0xff] }
 0x4b2   :  { %v1247_v28 = vsub.f32 1.0, %v1246_v45  ;;  %v1467_v45 = vld [vmem:[%s6120_s4 + $0x138] sm:$0xff] }
 0x4b3   :  { %v1233_v5 = vmul.f32 %v2901_v61, %v1232_v41  ;;  %vm1270_vm3 = vcmp.eq.f32.partialorder %v1269_v55, 8.507059e+37  ;;  %1527 = vmatpush.msra.mxu1 %v1469_v49  ;;  %v1460_v41 = vld [vmem:[%s6120_s4 + $0x100] sm:$0xff]  ;;  %v1445_v55 = vld [vmem:[%s6120_s4 + $0x88] sm:$0xff] }
 0x4b4   :  { %v1248_v16 = vmul.f32 %v2903_v27, %v1247_v28  ;;  %v1461_v28 = vld [vmem:[%s6120_s4 + $0x108] sm:$0xff] }
 0x4b5   :  { %v2905_v26 = vpop.eup %2904  ;;  %v1234_v60 = vadd.f32 %v2901_v61, %v1233_v5  ;;  %v1456_v5 = vld [vmem:[%s6120_s4 + $0xe0] sm:$0xff] }
 0x4b6   :  { %v1261_v51 = vmul.f32 %v2905_v26, %v1229_v43  ;;  %v1249_v9 = vadd.f32 %v2903_v27, %v1248_v16  ;;  %v2907_v23 = vpop.eup %2906  ;;  %vm1266_vm0 = vweird.f32 %v2905_v26  ;;  %v1470_v43 = vld [vmem:[%s6120_s4 + $0x150] sm:$0xff] }
 0x4b7   :  { %v1238_v54 = vsel %vm1237_vm12, %v2901_v61, %v1234_v60  ;;  %vm1267_vm2 = vmor %vm1265_vm1, %vm1266_vm0  ;;  %v1471_v61 = vld [vmem:[%s6120_s4 + $0x158] sm:$0xff]  ;;  %1547 = vmatpush.msra.mxu2 %v1470_v43  ;;  %v1458_v16 = vld [vmem:[%s6120_s4 + $0xf0] sm:$0xff] }
 0x4b8   :  { %v1262_v0 = vsub.f32 1.0, %v1261_v51  ;;  %v1243_v53 = vsel %vm1240_vm14, %v1242_v12, %v1238_v54  ;;  %v1253_v33 = vsel %vm1252_vm13, %v2903_v27, %v1249_v9  ;;  %1567 = vmatpush.msra.mxu3 %v1471_v61  ;;  %v1465_v27 = vld [vmem:[%s6120_s4 + $0x128] sm:$0xff]  ;;  %v6593_v51 = vld [vmem:[#allocation52_spill] sm:$0xff]  ;;  %v1452_v9 = vld [vmem:[%s6120_s4 + $0xc0] sm:$0xff] }
 0x4b9   :  { %v1258_v3 = vsel %vm1255_vm15, %v1257_v58, %v1253_v33  ;;  %v1277_v52 = vmul.f32 %v2907_v23, %v1243_v53  ;;  %1528 = vmatpush.msra.mxu1 %v1465_v27  ;;  %1548 = vmatpush.msra.mxu2 %v1466_v35  ;;  %v188_v12 = vadd.f32 %v6593_v51, %v6582_v47  ;;  %v1453_v58 = vld [vmem:[%s6120_s4 + $0xc8] sm:$0xff]  ;;  %v1454_v54 = vld [vmem:[%s6120_s4 + $0xd0] sm:$0xff]  ;;  %v1448_v33 = vld [vmem:[%s6120_s4 + $0xa0] sm:$0xff] }
 0x4ba   :  { %v1276_v57 = vmul.f32 %v1258_v3, %v4681_v19  ;;  %v1263_v20 = vmul.f32 %v2905_v26, %v1262_v0  ;;  %v1488_v19 = vld [vmem:[%s6120_s4 + $0x1e0] sm:$0xff]  ;;  %1568 = vmatpush.msra.mxu3 %v1467_v45  ;;  %v1449_v3 = vld [vmem:[%s6120_s4 + $0xa8] sm:$0xff] }
 0x4bb   :  { %1502 = vmatpush.msra.mxu0 %v1488_v19  ;;  %1529 = vmatpush.msra.mxu1 %v1461_v28  ;;  %v1443_v19 = vld [vmem:[%s6120_s4 + $0x78] sm:$0xff]  ;;  %v6595_v61 = vld [vmem:[#allocation55_spill] sm:$0xff] }
 0x4bc   :  { %v4693_v56 = vadd.f32 %v1277_v52, %v1276_v57  ;;  %v1264_v62 = vadd.f32 %v2905_v26, %v1263_v20  ;;  %1549 = vmatpush.msra.mxu2 %v1462_v22  ;;  %1569 = vmatpush.msra.mxu3 %v1463_v39  ;;  %v1450_v52 = vld [vmem:[%s6120_s4 + $0xb0] sm:$0xff]  ;;  %v1451_v57 = vld [vmem:[%s6120_s4 + $0xb8] sm:$0xff] }
 0x4bd   :  { %1503 = vmatpush.msra.mxu0 %v1484_v11  ;;  %1530 = vmatpush.msra.mxu1 %v1457_v15  ;;  %v1437_v11 = vld [vmem:[%s6120_s4 + $0x48] sm:$0xff] }
 0x4be   :  { %2908 = vtanh.f32 %v4693_v56  ;;  %v1268_v18 = vsel %vm1267_vm2, %v2905_v26, %v1264_v62  ;;  %v6592_v26 = vld [vmem:[#allocation51_spill] sm:$0xff]  ;;  %1550 = vmatpush.msra.mxu2 %v1458_v16  ;;  %1570 = vmatpush.msra.mxu3 %v1459_v24 }
 0x4bf   :  { %v1273_v50 = vsel %vm1270_vm3, %v1272_v4, %v1268_v18  ;;  %1504 = vmatpush.msra.mxu0 %v1480_v44  ;;  %v147_v60 = vadd.f32 %v6592_v26, %v6580_v10  ;;  %1531 = vmatpush.msra.mxu1 %v1453_v58  ;;  %v1455_v10 = vld [vmem:[%s6120_s4 + $0xd8] sm:$0xff]  ;;  %v1446_v18 = vld [vmem:[%s6120_s4 + $0x90] sm:$0xff]  ;;  %v1433_v44 = vld [vmem:[%s6120_s4 + $0x28] sm:$0xff] }
 0x4c0   :  { %1551 = vmatpush.msra.mxu2 %v1454_v54  ;;  %1571 = vmatpush.msra.mxu3 %v1455_v10  ;;  %v1447_v4 = vld [vmem:[%s6120_s4 + $0x98] sm:$0xff] }
 0x4c1   :  { %1505 = vmatpush.msra.mxu0 %v1476_v30  ;;  %1532 = vmatpush.msra.mxu1 %v1449_v3  ;;  %v1428_v30 = vld [vmem:[%s6120_s4] sm:$0xff] }
 0x4c2   :  { %1552 = vmatpush.msra.mxu2 %v1450_v52  ;;  %1572 = vmatpush.msra.mxu3 %v1451_v57 }
 0x4c3   :  { %1506 = vmatpush.msra.mxu0 %v1472_v46  ;;  %1533 = vmatpush.msra.mxu1 %v1445_v55  ;;  %v1431_v46 = vld [vmem:[%s6120_s4 + $0x18] sm:$0xff] }
 0x4c4   :  { %v2909_v48 = vpop.eup %2908  ;;  %1553 = vmatpush.msra.mxu2 %v1446_v18  ;;  %1573 = vmatpush.msra.mxu3 %v1447_v4 }
 0x4c5   :  { %v1280_v63 = vmul.f32 %v2909_v48, %v1273_v50  ;;  %1507 = vmatpush.msra.mxu0 %v1468_v42  ;;  %v1440_v48 = vld [vmem:[%s6120_s4 + $0x60] sm:$0xff]  ;;  %v1441_v50 = vld [vmem:[%s6120_s4 + $0x68] sm:$0xff] }
 0x4c6   :  { %1534 = vmatpush.msra.mxu1 %v1441_v50  ;;  %1574 = vmatpush.msra.mxu3 %v1443_v19 }
 0x4c7   :  { %1297 = vmatmul.f32.vlgmr.msrb.gmra.mxu0 %v1280_v63  ;;  %1317 = vmatmul.f32.vlgmr.msrb.gmra.mxu1 %v1280_v63 }
 0x4c8   :  { %1337 = vmatmul.f32.vlgmr.msrb.gmra.mxu2 %v1280_v63  ;;  %1357 = vmatmul.f32.vlgmr.msrb.gmra.mxu3 %v1280_v63  ;;  %v1442_v63 = vld [vmem:[%s6120_s4 + $0x70] sm:$0xff] }
 0x4c9   :  { %1508 = vmatpush.msra.mxu0 %v1464_v29  ;;  %1554 = vmatpush.msra.mxu2 %v1442_v63  ;;  %v270_v29 = vadd.f32 %v6595_v61, %v6586_v34  ;;  %v5040_v61 = vld [vmem:[%s6121_s6 + $0x120] sm:$0xff] }
 0x4ca   :  { %1535 = vmatpush.msra.mxu1 %v1437_v11  ;;  %1575 = vmatpush.msra.mxu3 %v1439_v38  ;;  %v4924_v11 = vld [vmem:[%s6121_s6 + $0x1c0] sm:$0xff]  ;;  %v4941_v38 = vld [vmem:[%s6121_s6 + $0x1d8] sm:$0xff]  ;;  %6605 = vst [vmem:[#allocation11_spill] sm:$0xff] %v5040_v61 }
 0x4cb   :  { %1509 = vmatpush.msra.mxu0 %v1460_v41  ;;  %1555 = vmatpush.msra.mxu2 %v1438_v13  ;;  %6596 = vst [vmem:[#allocation2_spill] sm:$0xff] %v4924_v11  ;;  %v4929_v13 = vld [vmem:[%s6121_s6 + $0x1c8] sm:$0xff] }
 0x4cc   :  { %1536 = vmatpush.msra.mxu1 %v1433_v44  ;;  %1576 = vmatpush.msra.mxu3 %v1435_v8  ;;  %6598 = vst [vmem:[#allocation4_spill] sm:$0xff] %v4941_v38  ;;  %v4951_v44 = vld [vmem:[%s6121_s6 + $0x1a8] sm:$0xff]  ;;  %v4968_v8 = vld [vmem:[%s6121_s6 + $0x180] sm:$0xff] }
 0x4cd   :  { %1510 = vmatpush.msra.mxu0 %v1456_v5  ;;  %1556 = vmatpush.msra.mxu2 %v1434_v25  ;;  %v4963_v25 = vld [vmem:[%s6121_s6 + $0x1b8] sm:$0xff] }
 0x4ce   :  { %1537 = vmatpush.msra.mxu1 %v1429_v40  ;;  %1577 = vmatpush.msra.mxu3 %v1431_v46  ;;  %v4980_v40 = vld [vmem:[%s6121_s6 + $0x190] sm:$0xff]  ;;  %v4997_v46 = vld [vmem:[%s6121_s6 + $0x168] sm:$0xff] }
 0x4cf   :  { %1511 = vmatpush.msra.mxu0 %v1452_v9  ;;  %1557 = vmatpush.msra.mxu2 %v1430_v14  ;;  %v4992_v14 = vld [vmem:[%s6121_s6 + $0x160] sm:$0xff]  ;;  %6602 = vst [vmem:[#allocation8_spill] sm:$0xff] %v4997_v46 }
 0x4d0   :  { %1729 = vmatpush.msrb.mxu1 %v4905_v1  ;;  %6601 = vst [vmem:[#allocation7_spill] sm:$0xff] %v4992_v14 }
 0x4d1   :  { %1512 = vmatpush.msra.mxu0 %v1448_v33 }
 0x4d2   :  { %1730 = vmatpush.msrb.mxu1 %v4929_v13 }
 0x4d3   :  { %1513 = vmatpush.msra.mxu0 %v1444_v2 }
 0x4d4   :  { %1731 = vmatpush.msrb.mxu1 %v4951_v44 }
 0x4d5   :  { %1514 = vmatpush.msra.mxu0 %v1440_v48 }
 0x4d7   :  { %1515 = vmatpush.msra.mxu0 %v1436_v7  ;;  %v4917_v7 = vld [vmem:[%s6121_s6 + $0x1f8] sm:$0xff] }
 0x4d8   :  { %1769 = vmatpush.msrb.mxu3 %v4917_v7 }
 0x4d9   :  { %1516 = vmatpush.msra.mxu0 %v1432_v21  ;;  %v4946_v21 = vld [vmem:[%s6121_s6 + $0x1a0] sm:$0xff] }
 0x4da   :  { %1770 = vmatpush.msrb.mxu3 %v4941_v38 }
 0x4db   :  { %1517 = vmatpush.msra.mxu0 %v1428_v30  ;;  %v4975_v30 = vld [vmem:[%s6121_s6 + $0x188] sm:$0xff] }
 0x4dc   :  { %6599 = vst [vmem:[#allocation10_spill] sm:$0xff] %v4975_v30  ;;  %1771 = vmatpush.msrb.mxu3 %v4963_v25  ;;  %1732 = vmatpush.msrb.mxu1 %v4975_v30 }
 0x4de   :  { %1733 = vmatpush.msrb.mxu1 %v4997_v46 }
 0x544   :  { %v1298_v23 = vpop.f32.mrf.mxu0  ;;  %v1318_v0 = vpop.f32.mrf.mxu1 }
 0x545   :  { %v1361_v47 = vadd.f32 %v1298_v23, %v147_v60  ;;  %v1362_v53 = vadd.f32 %v1318_v0, %v188_v12 }
 0x547   :  { %v2771_v20 = vmul.f32 -1.442695, %v1361_v47  ;;  %v2772_v62 = vmul.f32 -1.442695, %v1362_v53 }
 0x549   :  { %2910 = vpow2.f32 %v2771_v20 }
 0x54a   :  { %2912 = vpow2.f32 %v2772_v62 }
 0x54b   :  { %v1338_v17 = vpop.f32.mrf.mxu2  ;;  %v1358_v49 = vpop.f32.mrf.mxu3 }
 0x54c   :  { %v1363_v37 = vadd.f32 %v1338_v17, %v229_v6  ;;  %v1364_v45 = vadd.f32 %v1358_v49, %v270_v29  ;;  %v4910_v6 = vld [vmem:[%s6121_s6 + $0x1f0] sm:$0xff]  ;;  %v5045_v29 = vld [vmem:[%s6121_s6 + $0x128] sm:$0xff] }
 0x54d   :  { %1749 = vmatpush.msrb.mxu2 %v4910_v6  ;;  %v4934_v17 = vld [vmem:[%s6121_s6 + $0x1d0] sm:$0xff] }
 0x54e   :  { %v2773_v31 = vmul.f32 -1.442695, %v1363_v37  ;;  %6597 = vst [vmem:[#allocation3_spill] sm:$0xff] %v4934_v17  ;;  %v4958_v37 = vld [vmem:[%s6121_s6 + $0x1b0] sm:$0xff] }
 0x54f   :  { %v2911_v32 = vpop.eup %2910  ;;  %1750 = vmatpush.msrb.mxu2 %v4934_v17  ;;  %v5028_v49 = vld [vmem:[%s6121_s6 + $0x150] sm:$0xff] }
 0x550   :  { %v2913_v36 = vpop.eup %2912  ;;  %v1374_v59 = vadd.f32 1.0, %v2911_v32  ;;  %2914 = vpow2.f32 %v2773_v31  ;;  %v4985_v31 = vld [vmem:[%s6121_s6 + $0x198] sm:$0xff]  ;;  %v5004_v32 = vld [vmem:[%s6121_s6 + $0x170] sm:$0xff] }
 0x551   :  { %v1375_v42 = vadd.f32 1.0, %v2913_v36  ;;  %6600 = vst [vmem:[#allocation5_spill] sm:$0xff] %v4985_v31  ;;  %1751 = vmatpush.msrb.mxu2 %v4958_v37  ;;  %v5009_v36 = vld [vmem:[%s6121_s6 + $0x178] sm:$0xff]  ;;  %1772 = vmatpush.msrb.mxu3 %v4985_v31 }
 0x552   :  { %2916 = vrcp.f32 %v1374_v59  ;;  %v1388_v15 = vand.u32 2147483648, %v1374_v59  ;;  %v1386_v26 = vand.u32 2147483647, %v1374_v59  ;;  %vm1382_vm6 = vweird.f32 %v1374_v59  ;;  %6603 = vst [vmem:[#allocation12_spill] sm:$0xff] %v5004_v32 }
 0x553   :  { %2918 = vrcp.f32 %v1375_v42  ;;  %v1403_v16 = vand.u32 2147483648, %v1375_v42  ;;  %v1401_v51 = vand.u32 2147483647, %v1375_v42  ;;  %vm1397_vm7 = vweird.f32 %v1375_v42  ;;  %1752 = vmatpush.msrb.mxu2 %v4980_v40  ;;  %1773 = vmatpush.msrb.mxu3 %v5009_v36 }
 0x554   :  { %v1389_v58 = vor.u32 1.1754944e-38, %v1388_v15  ;;  %vm1387_vm10 = vcmp.eq.f32.partialorder %v1386_v26, 8.507059e+37  ;;  %v5098_v15 = vld [vmem:[%s6121_s6 + $0xe8] sm:$0xff] }
 0x555   :  { %v1404_v23 = vor.u32 1.1754944e-38, %v1403_v16  ;;  %vm1402_vm11 = vcmp.eq.f32.partialorder %v1401_v51, 8.507059e+37  ;;  %1753 = vmatpush.msrb.mxu2 %v5004_v32  ;;  %v5105_v16 = vld [vmem:[%s6121_s6 + $0xf0] sm:$0xff]  ;;  %v5119_v51 = vld [vmem:[%s6121_s6 + $0xc0] sm:$0xff] }
 0x556   :  { %v2915_v43 = vpop.eup %2914 }
 0x557   :  { %v1376_v27 = vadd.f32 1.0, %v2915_v43  ;;  %v5033_v43 = vld [vmem:[%s6121_s6 + $0x158] sm:$0xff]  ;;  %1754 = vmatpush.msrb.mxu2 %v5028_v49 }
 0x558   :  { %v2917_v35 = vpop.eup %2916  ;;  %6604 = vst [vmem:[#allocation9_spill] sm:$0xff] %v5033_v43  ;;  %1774 = vmatpush.msrb.mxu3 %v5033_v43 }
 0x559   :  { %v2919_v41 = vpop.eup %2918  ;;  %v1378_v28 = vmul.f32 %v2917_v35, %v1374_v59  ;;  %2920 = vrcp.f32 %v1376_v27  ;;  %vm1383_vm4 = vweird.f32 %v2917_v35  ;;  %v1418_v55 = vand.u32 2147483648, %v1376_v27  ;;  %v5016_v59 = vld [vmem:[%s6121_s6 + $0x140] sm:$0xff] }
 0x55a   :  { %v1393_v22 = vmul.f32 %v2919_v41, %v1375_v42  ;;  %2922 = vtanh.f32 %v1364_v45  ;;  %vm1398_vm5 = vweird.f32 %v2919_v41  ;;  %vm1384_vm8 = vmor %vm1382_vm6, %vm1383_vm4  ;;  %vm1412_vm13 = vweird.f32 %v1376_v27  ;;  %v5021_v42 = vld [vmem:[%s6121_s6 + $0x148] sm:$0xff]  ;;  %v5064_v45 = vld [vmem:[%s6121_s6 + $0x100] sm:$0xff] }
 0x55b   :  { %v1379_v39 = vsub.f32 1.0, %v1378_v28  ;;  %vm1399_vm9 = vmor %vm1397_vm7, %vm1398_vm5  ;;  %v1416_v18 = vand.u32 2147483647, %v1376_v27  ;;  %v1419_v48 = vor.u32 1.1754944e-38, %v1418_v55  ;;  %1734 = vmatpush.msrb.mxu1 %v5021_v42  ;;  %6607 = vst [vmem:[#allocation45_spill] sm:$0xff] %v5064_v45  ;;  %v5197_v55 = vld [vmem:[%s6121_s6 + $0x60] sm:$0xff] }
 0x55c   :  { %v1394_v5 = vsub.f32 1.0, %v1393_v22  ;;  %v5074_v28 = vld [vmem:[%s6122_s5] sm:$0xf]  ;;  %v5081_v22 = vld [vmem:[%s6121_s6 + $0x110] sm:$0xff]  ;;  %6620 = vst [vmem:[#allocation27_spill] sm:$0xff] %v5197_v55 }
 0x55d   :  { %v1380_v24 = vmul.f32 %v2917_v35, %v1379_v39  ;;  %vm1417_vm15 = vcmp.eq.f32.partialorder %v1416_v18, 8.507059e+37  ;;  %1735 = vmatpush.msrb.mxu1 %v5045_v29  ;;  %v5086_v39 = vld [vmem:[%s6121_s6 + $0x118] sm:$0xff]  ;;  %v1494_v26 = vperm.slane %v5074_v28, 0  ;;  %v5202_v18 = vld [vmem:[%s6121_s6 + $0x68] sm:$0xff] }
 0x55e   :  { %v1395_v60 = vmul.f32 %v2919_v41, %v1394_v5  ;;  %v5093_v5 = vld [vmem:[%s6121_s6 + $0xe0] sm:$0xff]  ;;  %6621 = vst [vmem:[#allocation33_spill] sm:$0xff] %v5202_v18 }
 0x55f   :  { %v2921_v12 = vpop.eup %2920  ;;  %v1381_v34 = vadd.f32 %v2917_v35, %v1380_v24  ;;  %v5110_v24 = vld [vmem:[%s6121_s6 + $0xf8] sm:$0xff] }
 0x560   :  { %v1408_v9 = vmul.f32 %v2921_v12, %v1376_v27  ;;  %v1396_v54 = vadd.f32 %v2919_v41, %v1395_v60  ;;  %v2923_v10 = vpop.eup %2922  ;;  %vm1413_vm12 = vweird.f32 %v2921_v12  ;;  %v5052_v27 = vld [vmem:[%s6121_s6 + $0x130] sm:$0xff]  ;;  %v1495_v60 = vperm.slane %v5074_v28, 1 }
 0x561   :  { %v1385_v0 = vsel %vm1384_vm8, %v2917_v35, %v1381_v34  ;;  %vm1414_vm14 = vmor %vm1412_vm13, %vm1413_vm12  ;;  %v5057_v35 = vld [vmem:[%s6121_s6 + $0x138] sm:$0xff]  ;;  %1755 = vmatpush.msrb.mxu2 %v5052_v27  ;;  %v5131_v34 = vld [vmem:[%s6121_s6 + $0xd0] sm:$0xff] }
 0x562   :  { %v1409_v47 = vsub.f32 1.0, %v1408_v9  ;;  %v1390_v53 = vsel %vm1387_vm10, %v1389_v58, %v1385_v0  ;;  %v1400_v33 = vsel %vm1399_vm9, %v2919_v41, %v1396_v54  ;;  %6606 = vst [vmem:[#allocation42_spill] sm:$0xff] %v5057_v35  ;;  %v5069_v41 = vld [vmem:[%s6121_s6 + $0x108] sm:$0xff]  ;;  %1775 = vmatpush.msrb.mxu3 %v5057_v35  ;;  %v5136_v9 = vld [vmem:[%s6121_s6 + $0xd8] sm:$0xff]  ;;  %v5143_v58 = vld [vmem:[%s6121_s6 + $0xa0] sm:$0xff] }
 0x563   :  { %v1405_v3 = vsel %vm1402_vm11, %v1404_v23, %v1400_v33  ;;  %v1424_v52 = vmul.f32 %v2923_v10, %v1390_v53  ;;  %6608 = vst [vmem:[#allocation6_spill] sm:$0xff] %v5069_v41  ;;  %1736 = vmatpush.msrb.mxu1 %v5069_v41  ;;  %1756 = vmatpush.msrb.mxu2 %v5081_v22  ;;  %v5148_v54 = vld [vmem:[%s6121_s6 + $0xa8] sm:$0xff]  ;;  %v5155_v10 = vld [vmem:[%s6121_s6 + $0xb0] sm:$0xff] }
 0x564   :  { %v1423_v57 = vmul.f32 %v1405_v3, %v4693_v56  ;;  %v1410_v20 = vmul.f32 %v2921_v12, %v1409_v47  ;;  %v4900_v56 = vld [vmem:[%s6121_s6 + $0x1e0] sm:$0xff]  ;;  %1776 = vmatpush.msrb.mxu3 %v5086_v39  ;;  %6609 = vst [vmem:[#allocation20_spill] sm:$0xff] %v5136_v9  ;;  %v5160_v47 = vld [vmem:[%s6121_s6 + $0xb8] sm:$0xff] }
 0x565   :  { %1709 = vmatpush.msrb.mxu0 %v4900_v56  ;;  %1737 = vmatpush.msrb.mxu1 %v5098_v15  ;;  %6610 = vst [vmem:[#allocation15_spill] sm:$0xff] %v5143_v58  ;;  %v5171_v3 = vld [vmem:[%s6121_s6 + $0x80] sm:$0xff] }
 0x566   :  { %v1425_v62 = vadd.f32 %v1424_v52, %v1423_v57  ;;  %v1411_v2 = vadd.f32 %v2921_v12, %v1410_v20  ;;  %1757 = vmatpush.msrb.mxu2 %v5105_v16  ;;  %1777 = vmatpush.msrb.mxu3 %v5110_v24  ;;  %6611 = vst [vmem:[#allocation16_spill] sm:$0xff] %v5148_v54  ;;  %v5176_v52 = vld [vmem:[%s6121_s6 + $0x88] sm:$0xff]  ;;  %v5183_v57 = vld [vmem:[%s6121_s6 + $0x90] sm:$0xff]  ;;  %v5188_v20 = vld [vmem:[%s6121_s6 + $0x98] sm:$0xff] }
 0x567   :  { %1710 = vmatpush.msrb.mxu0 %v4924_v11  ;;  %6612 = vst [vmem:[#allocation17_spill] sm:$0xff] %v5155_v10 }
 0x568   :  { %2924 = vtanh.f32 %v1425_v62  ;;  %v1415_v4 = vsel %vm1414_vm14, %v2921_v12, %v1411_v2  ;;  %v5124_v12 = vld [vmem:[%s6121_s6 + $0xc8] sm:$0xff]  ;;  %6613 = vst [vmem:[#allocation28_spill] sm:$0xff] %v5160_v47  ;;  %1758 = vmatpush.msrb.mxu2 %v5131_v34  ;;  %1778 = vmatpush.msrb.mxu3 %v5136_v9 }
 0x569   :  { %v1420_v63 = vsel %vm1417_vm15, %v1419_v48, %v1415_v4  ;;  %1711 = vmatpush.msrb.mxu0 %v4946_v21  ;;  %1738 = vmatpush.msrb.mxu1 %v5124_v12  ;;  %6616 = vst [vmem:[#allocation24_spill] sm:$0xff] %v5171_v3  ;;  %v1496_v4 = vperm.slane %v5074_v28, 2  ;;  %v5210_v48 = vld [vmem:[%s6121_s6 + $0x70] sm:$0xff] }
 0x56a   :  { %6617 = vst [vmem:[#allocation30_spill] sm:$0xff] %v5176_v52  ;;  %1759 = vmatpush.msrb.mxu2 %v5155_v10  ;;  %1779 = vmatpush.msrb.mxu3 %v5160_v47 }
 0x56b   :  { %1712 = vmatpush.msrb.mxu0 %v4968_v8  ;;  %1739 = vmatpush.msrb.mxu1 %v5148_v54  ;;  %6618 = vst [vmem:[#allocation22_spill] sm:$0xff] %v5183_v57 }
 0x56c   :  { %6619 = vst [vmem:[#allocation23_spill] sm:$0xff] %v5188_v20  ;;  %1760 = vmatpush.msrb.mxu2 %v5183_v57  ;;  %1780 = vmatpush.msrb.mxu3 %v5188_v20 }
 0x56d   :  { %1713 = vmatpush.msrb.mxu0 %v4992_v14  ;;  %1740 = vmatpush.msrb.mxu1 %v5176_v52  ;;  %6622 = vst [vmem:[#allocation25_spill] sm:$0xff] %v5210_v48 }
 0x56e   :  { %v2925_v50 = vpop.eup %2924  ;;  %1761 = vmatpush.msrb.mxu2 %v5210_v48 }
 0x56f   :  { %v1427_v19 = vmul.f32 %v2925_v50, %v1420_v63  ;;  %1714 = vmatpush.msrb.mxu0 %v5016_v59  ;;  %v5215_v50 = vld [vmem:[%s6121_s6 + $0x78] sm:$0xff]  ;;  %v5222_v63 = vld [vmem:[%s6121_s6 + $0x40] sm:$0xff]  ;;  %1741 = vmatpush.msrb.mxu1 %v5202_v18 }
 0x570   :  { %6623 = vst [vmem:[#allocation26_spill] sm:$0xff] %v5215_v50  ;;  %1781 = vmatpush.msrb.mxu3 %v5215_v50 }
 0x571   :  { %1518 = vmatmul.f32.vlgmr.msra.gmra.mxu0 %v1427_v19  ;;  %1538 = vmatmul.f32.vlgmr.msra.gmra.mxu1 %v1427_v19  ;;  %6624 = vst [vmem:[#allocation32_spill] sm:$0xff] %v5222_v63 }
 0x572   :  { %1558 = vmatmul.f32.vlgmr.msra.gmra.mxu2 %v1427_v19  ;;  %1578 = vmatmul.f32.vlgmr.msra.gmra.mxu3 %v1427_v19  ;;  %v5227_v19 = vld [vmem:[%s6121_s6 + $0x48] sm:$0xff] }
 0x573   :  { %1715 = vmatpush.msrb.mxu0 %v5040_v61  ;;  %6625 = vst [vmem:[#allocation35_spill] sm:$0xff] %v5227_v19  ;;  %1742 = vmatpush.msrb.mxu1 %v5227_v19 }
 0x575   :  { %1716 = vmatpush.msrb.mxu0 %v5064_v45 }
 0x577   :  { %1717 = vmatpush.msrb.mxu0 %v5093_v5 }
 0x579   :  { %1718 = vmatpush.msrb.mxu0 %v5119_v51 }
 0x57b   :  { %1719 = vmatpush.msrb.mxu0 %v5143_v58 }
 0x57d   :  { %1720 = vmatpush.msrb.mxu0 %v5171_v3 }
 0x57f   :  { %1721 = vmatpush.msrb.mxu0 %v5197_v55 }
 0x581   :  { %1722 = vmatpush.msrb.mxu0 %v5222_v63 }
 0x5ee   :  { %v1519_v23 = vpop.f32.mrf.mxu0  ;;  %v1539_v0 = vpop.f32.mrf.mxu1 }
 0x5ef   :  { %v5162_v53 = vadd.f32 %v1519_v23, %v1494_v26  ;;  %v5164_v33 = vadd.f32 %v1539_v0, %v1495_v60  ;;  %v5234_v26 = vld [vmem:[%s6121_s6 + $0x50] sm:$0xff]  ;;  %v5239_v60 = vld [vmem:[%s6121_s6 + $0x58] sm:$0xff]  ;;  %v5246_v0 = vld [vmem:[%s6121_s6 + $0x20] sm:$0xff] }
 0x5f0   :  { %6626 = vst [vmem:[#allocation37_spill] sm:$0xff] %v5234_v26  ;;  %1762 = vmatpush.msrb.mxu2 %v5234_v26  ;;  %1782 = vmatpush.msrb.mxu3 %v5239_v60  ;;  %v5284_v26 = vld [vmem:[%s6121_s6 + $0x10] sm:$0xff] }
 0x5f1   :  { %6614 = vst [vmem:[#allocation18_spill] sm:$0xff] %v5162_v53  ;;  %v2774_v62 = vmul.f32 -1.442695, %v5162_v53  ;;  %v2775_v2 = vmul.f32 -1.442695, %v5164_v33  ;;  %v5265_v53 = vld [vmem:[%s6121_s6 + $0x38] sm:$0xff]  ;;  %1723 = vmatpush.msrb.mxu0 %v5246_v0 }
 0x5f2   :  { %6615 = vst [vmem:[#allocation19_spill] sm:$0xff] %v5164_v33  ;;  %v5260_v33 = vld [vmem:[%s6121_s6 + $0x30] sm:$0xff]  ;;  %1783 = vmatpush.msrb.mxu3 %v5265_v53 }
 0x5f3   :  { %2926 = vpow2.f32 %v2774_v62  ;;  %6627 = vst [vmem:[#allocation31_spill] sm:$0xff] %v5239_v60  ;;  %v5251_v62 = vld [vmem:[%s6121_s6 + $0x28] sm:$0xff]  ;;  %v5289_v60 = vld [vmem:[%s6121_s6 + $0x18] sm:$0xff]  ;;  %1763 = vmatpush.msrb.mxu2 %v5260_v33 }
 0x5f4   :  { %2928 = vpow2.f32 %v2775_v2  ;;  %6628 = vst [vmem:[#allocation29_spill] sm:$0xff] %v5246_v0  ;;  %1743 = vmatpush.msrb.mxu1 %v5251_v62  ;;  %1784 = vmatpush.msrb.mxu3 %v5289_v60 }
 0x5f5   :  { %v1559_v23 = vpop.f32.mrf.mxu2  ;;  %6629 = vst [vmem:[#allocation39_spill] sm:$0xff] %v5251_v62  ;;  %1764 = vmatpush.msrb.mxu2 %v5284_v26 }
 0x5f6   :  { %v5253_v2 = vadd.f32 %v1559_v23, %v1496_v4  ;;  %6631 = vst [vmem:[#allocation40_spill] sm:$0xff] %v5260_v33  ;;  %v5272_v4 = vld [vmem:[%s6121_s6] sm:$0xff]  ;;  %v5277_v23 = vld [vmem:[%s6121_s6 + $0x8] sm:$0xff]  ;;  %1916 = vmatpush.msra.mxu3 %v4917_v7 }
 0x5f7   :  { %6632 = vst [vmem:[#allocation34_spill] sm:$0xff] %v5265_v53  ;;  %1724 = vmatpush.msrb.mxu0 %v5272_v4  ;;  %1744 = vmatpush.msrb.mxu1 %v5277_v23 }
 0x5f8   :  { %6630 = vst [vmem:[#allocation36_spill] sm:$0xff] %v5253_v2  ;;  %v2776_v19 = vmul.f32 -1.442695, %v5253_v2  ;;  %1896 = vmatpush.msra.mxu2 %v4910_v6  ;;  %1917 = vmatpush.msra.mxu3 %v4941_v38 }
 0x5f9   :  { %6633 = vst [vmem:[#allocation41_spill] sm:$0xff] %v5272_v4  ;;  %v2927_v63 = vpop.eup %2926  ;;  %1856 = vmatpush.msra.mxu0 %v4900_v56  ;;  %1876 = vmatpush.msra.mxu1 %v4905_v1 }
 0x5fa   :  { %6634 = vst [vmem:[#allocation13_spill] sm:$0xff] %v5277_v23  ;;  %v2929_v0 = vpop.eup %2928  ;;  %v5294_v50 = vadd.f32 1.0, %v2927_v63  ;;  %2930 = vpow2.f32 %v2776_v19  ;;  %v1497_v63 = vperm.slane %v5074_v28, 3  ;;  %v1579_v19 = vpop.f32.mrf.mxu3  ;;  %1897 = vmatpush.msra.mxu2 %v4934_v17  ;;  %1918 = vmatpush.msra.mxu3 %v4963_v25 }
 0x5fb   :  { %6635 = vst [vmem:[#allocation43_spill] sm:$0xff] %v5284_v26  ;;  %v5298_v62 = vadd.f32 1.0, %v2929_v0  ;;  %1857 = vmatpush.msra.mxu0 %v4924_v11  ;;  %1877 = vmatpush.msra.mxu1 %v4929_v13 }
 0x5fc   :  { %6636 = vst [vmem:[#allocation14_spill] sm:$0xff] %v5289_v60  ;;  %2932 = vrcp.f32 %v5294_v50  ;;  %1898 = vmatpush.msra.mxu2 %v4958_v37  ;;  %v5319_v11 = vadd.f32 %v1579_v19, %v1497_v63  ;;  %1919 = vmatpush.msra.mxu3 %v4985_v31  ;;  %v1669_v19 = vand.u32 2147483648, %v5294_v50  ;;  %vm1663_vm2 = vweird.f32 %v5294_v50 }
 0x5fd   :  { %2934 = vrcp.f32 %v5298_v62  ;;  %1858 = vmatpush.msra.mxu0 %v4946_v21  ;;  %1878 = vmatpush.msra.mxu1 %v4951_v44  ;;  %vm1678_vm4 = vweird.f32 %v5298_v62 }
 0x5fe   :  { %6637 = vst [vmem:[#allocation44_spill] sm:$0xff] %v5319_v11  ;;  %1899 = vmatpush.msra.mxu2 %v4980_v40  ;;  %1920 = vmatpush.msra.mxu3 %v5009_v36 }
 0x5ff   :  { %1859 = vmatpush.msra.mxu0 %v4968_v8  ;;  %1879 = vmatpush.msra.mxu1 %v4975_v30 }
 0x600   :  { %v2931_v0 = vpop.eup %2930  ;;  %1900 = vmatpush.msra.mxu2 %v5004_v32  ;;  %1921 = vmatpush.msra.mxu3 %v5033_v43  ;;  %v1670_v43 = vor.u32 1.1754944e-38, %v1669_v19 }
 0x601   :  { %v5315_v2 = vadd.f32 1.0, %v2931_v0  ;;  %1860 = vmatpush.msra.mxu0 %v4992_v14  ;;  %1880 = vmatpush.msra.mxu1 %v4997_v46  ;;  %v1667_v14 = vand.u32 2147483647, %v5294_v50  ;;  %v1684_v46 = vand.u32 2147483648, %v5298_v62 }
 0x602   :  { %v2933_v28 = vpop.eup %2932  ;;  %1901 = vmatpush.msra.mxu2 %v5028_v49  ;;  %1922 = vmatpush.msra.mxu3 %v5057_v35 }
 0x603   :  { %v2935_v17 = vpop.eup %2934  ;;  %v1659_v38 = vmul.f32 %v2933_v28, %v5294_v50  ;;  %2936 = vrcp.f32 %v5315_v2  ;;  %1861 = vmatpush.msra.mxu0 %v5016_v59  ;;  %1881 = vmatpush.msra.mxu1 %v5021_v42  ;;  %vm1664_vm0 = vweird.f32 %v2933_v28  ;;  %vm1668_vm5 = vcmp.eq.f32.partialorder %v1667_v14, 8.507059e+37 }
 0x604   :  { %v1674_v0 = vmul.f32 %v2935_v17, %v5298_v62  ;;  %2938 = vtanh.f32 %v5319_v11  ;;  %vm1679_vm1 = vweird.f32 %v2935_v17  ;;  %1902 = vmatpush.msra.mxu2 %v5052_v27  ;;  %vm1665_vm3 = vmor %vm1663_vm2, %vm1664_vm0  ;;  %v1685_v50 = vor.u32 1.1754944e-38, %v1684_v46  ;;  %1923 = vmatpush.msra.mxu3 %v5086_v39 }
 0x605   :  { %v1660_v63 = vsub.f32 1.0, %v1659_v38  ;;  %1862 = vmatpush.msra.mxu0 %v5040_v61  ;;  %1882 = vmatpush.msra.mxu1 %v5045_v29  ;;  %vm1680_vm6 = vmor %vm1678_vm4, %vm1679_vm1  ;;  %vm1693_vm9 = vweird.f32 %v5315_v2 }
 0x606   :  { %v1675_v30 = vsub.f32 1.0, %v1674_v0  ;;  %v1682_v0 = vand.u32 2147483647, %v5298_v62  ;;  %1903 = vmatpush.msra.mxu2 %v5081_v22  ;;  %1924 = vmatpush.msra.mxu3 %v5110_v24 }
 0x607   :  { %v1661_v31 = vmul.f32 %v2933_v28, %v1660_v63  ;;  %1863 = vmatpush.msra.mxu0 %v5064_v45  ;;  %1883 = vmatpush.msra.mxu1 %v5069_v41 }
 0x608   :  { %v1676_v38 = vmul.f32 %v2935_v17, %v1675_v30  ;;  %vm1683_vm7 = vcmp.eq.f32.partialorder %v1682_v0, 8.507059e+37  ;;  %1904 = vmatpush.msra.mxu2 %v5105_v16  ;;  %1925 = vmatpush.msra.mxu3 %v5136_v9  ;;  %v6639_v0 = vld [vmem:[#allocation32_spill] sm:$0xff] }
 0x609   :  { %v5343_v11 = vpop.eup %2936  ;;  %v1662_v63 = vadd.f32 %v2933_v28, %v1661_v31  ;;  %1864 = vmatpush.msra.mxu0 %v5093_v5  ;;  %1884 = vmatpush.msra.mxu1 %v5098_v15 }
 0x60a   :  { %v1677_v30 = vadd.f32 %v2935_v17, %v1676_v38  ;;  %v1689_v61 = vmul.f32 %v5343_v11, %v5315_v2  ;;  %v2939_v19 = vpop.eup %2938  ;;  %1905 = vmatpush.msra.mxu2 %v5131_v34  ;;  %vm1694_vm8 = vweird.f32 %v5343_v11  ;;  %1926 = vmatpush.msra.mxu3 %v5160_v47 }
 0x60b   :  { %v1666_v31 = vsel %vm1665_vm3, %v2933_v28, %v1662_v63  ;;  %1865 = vmatpush.msra.mxu0 %v5119_v51  ;;  %1885 = vmatpush.msra.mxu1 %v5124_v12  ;;  %vm1695_vm10 = vmor %vm1693_vm9, %vm1694_vm8  ;;  %v6640_v63 = vld [vmem:[#allocation35_spill] sm:$0xff] }
 0x60c   :  { %v1671_v38 = vsel %vm1668_vm5, %v1670_v43, %v1666_v31  ;;  %v1681_v35 = vsel %vm1680_vm6, %v2935_v17, %v1677_v30  ;;  %v1690_v62 = vsub.f32 1.0, %v1689_v61  ;;  %1906 = vmatpush.msra.mxu2 %v5155_v10  ;;  %v1699_v61 = vand.u32 2147483648, %v5315_v2  ;;  %1927 = vmatpush.msra.mxu3 %v5188_v20  ;;  %v6642_v30 = vld [vmem:[#allocation31_spill] sm:$0xff] }
 0x60d   :  { %v1686_v45 = vsel %vm1683_vm7, %v1685_v50, %v1681_v35  ;;  %v1705_v41 = vmul.f32 %v2939_v19, %v1671_v38  ;;  %1866 = vmatpush.msra.mxu0 %v5143_v58  ;;  %1886 = vmatpush.msra.mxu1 %v5148_v54  ;;  %v1697_v35 = vand.u32 2147483647, %v5315_v2  ;;  %v6641_v2 = vld [vmem:[#allocation37_spill] sm:$0xff]  ;;  %v6644_v38 = vld [vmem:[#allocation39_spill] sm:$0xff] }
 0x60e   :  { %v1691_v14 = vmul.f32 %v5343_v11, %v1690_v62  ;;  %v1704_v46 = vmul.f32 0.0, %v1686_v45  ;;  %1907 = vmatpush.msra.mxu2 %v5183_v57  ;;  %v1700_v28 = vor.u32 1.1754944e-38, %v1699_v61  ;;  %v6643_v19 = vld [vmem:[#allocation29_spill] sm:$0xff]  ;;  %v6645_v62 = vld [vmem:[#allocation2_spill] sm:$0xff] }
 0x60f   :  { %1867 = vmatpush.msra.mxu0 %v5171_v3  ;;  %1887 = vmatpush.msra.mxu1 %v5176_v52  ;;  %vm1698_vm11 = vcmp.eq.f32.partialorder %v1697_v35, 8.507059e+37  ;;  %v6649_v61 = vld [vmem:[#allocation5_spill] sm:$0xff]  ;;  %v6650_v35 = vld [vmem:[#allocation7_spill] sm:$0xff] }
 0x610   :  { %v5366_v17 = vadd.f32 %v1705_v41, %v1704_v46  ;;  %v1692_v43 = vadd.f32 %v5343_v11, %v1691_v14  ;;  %1908 = vmatpush.msra.mxu2 %v5210_v48  ;;  %v6638_v41 = vld [vmem:[#allocation26_spill] sm:$0xff]  ;;  %v6646_v14 = vld [vmem:[#allocation3_spill] sm:$0xff]  ;;  %v6647_v46 = vld [vmem:[#allocation4_spill] sm:$0xff] }
 0x611   :  { %1868 = vmatpush.msra.mxu0 %v5197_v55  ;;  %1888 = vmatpush.msra.mxu1 %v5202_v18 }
 0x612   :  { %2940 = vtanh.f32 %v5366_v17  ;;  %v1696_v45 = vsel %vm1695_vm10, %v5343_v11, %v1692_v43  ;;  %1928 = vmatpush.msra.mxu3 %v6638_v41  ;;  %1909 = vmatpush.msra.mxu2 %v6641_v2  ;;  %v6648_v43 = vld [vmem:[#allocation10_spill] sm:$0xff] }
 0x613   :  { %1869 = vmatpush.msra.mxu0 %v6639_v0  ;;  %1889 = vmatpush.msra.mxu1 %v6640_v63  ;;  %v1701_v50 = vsel %vm1698_vm11, %v1700_v28, %v1696_v45  ;;  %v6651_v45 = vld [vmem:[#allocation8_spill] sm:$0xff]  ;;  %v6652_v28 = vld [vmem:[#allocation9_spill] sm:$0xff] }
 0x614   :  { %1929 = vmatpush.msra.mxu3 %v6642_v30  ;;  %1910 = vmatpush.msra.mxu2 %v5260_v33 }
 0x615   :  { %1870 = vmatpush.msra.mxu0 %v6643_v19  ;;  %1890 = vmatpush.msra.mxu1 %v6644_v38 }
 0x616   :  { %1930 = vmatpush.msra.mxu3 %v5265_v53  ;;  %1911 = vmatpush.msra.mxu2 %v5284_v26 }
 0x617   :  { %1871 = vmatpush.msra.mxu0 %v5272_v4  ;;  %1891 = vmatpush.msra.mxu1 %v5277_v23 }
 0x618   :  { %v2941_v31 = vpop.eup %2940  ;;  %1931 = vmatpush.msra.mxu3 %v5289_v60 }
 0x619   :  { %v1708_v11 = vmul.f32 %v2941_v31, %v1701_v50  ;;  %v6653_v31 = vld [vmem:[#allocation11_spill] sm:$0xff]  ;;  %v6654_v50 = vld [vmem:[#allocation42_spill] sm:$0xff] }
 0x61b   :  { %1725 = vmatmul.f32.vlgmr.msrb.gmra.mxu0 %v1708_v11  ;;  %2738 = vst [vmem:[%s6123_s7] sm:$0xff] %v1708_v11  ;;  %1745 = vmatmul.f32.vlgmr.msrb.gmra.mxu1 %v1708_v11 }
 0x61c   :  { %1765 = vmatmul.f32.vlgmr.msrb.gmra.mxu2 %v1708_v11  ;;  %1785 = vmatmul.f32.vlgmr.msrb.gmra.mxu3 %v1708_v11  ;;  %v6655_v11 = vld [vmem:[#allocation45_spill] sm:$0xff] }
 0x61d   :  { %2003 = vmatpush.msrb.mxu0 %v4900_v56  ;;  %2023 = vmatpush.msrb.mxu1 %v4905_v1 }
 0x61e   :  { %2043 = vmatpush.msrb.mxu2 %v4910_v6  ;;  %2063 = vmatpush.msrb.mxu3 %v4917_v7 }
 0x61f   :  { %2004 = vmatpush.msrb.mxu0 %v6645_v62  ;;  %2024 = vmatpush.msrb.mxu1 %v4929_v13 }
 0x620   :  { %2044 = vmatpush.msrb.mxu2 %v6646_v14  ;;  %2064 = vmatpush.msrb.mxu3 %v6647_v46 }
 0x621   :  { %2005 = vmatpush.msrb.mxu0 %v4946_v21  ;;  %2025 = vmatpush.msrb.mxu1 %v4951_v44 }
 0x622   :  { %2045 = vmatpush.msrb.mxu2 %v4958_v37  ;;  %2065 = vmatpush.msrb.mxu3 %v4963_v25 }
 0x623   :  { %2006 = vmatpush.msrb.mxu0 %v4968_v8  ;;  %2026 = vmatpush.msrb.mxu1 %v6648_v43 }
 0x624   :  { %2046 = vmatpush.msrb.mxu2 %v4980_v40  ;;  %2066 = vmatpush.msrb.mxu3 %v6649_v61 }
 0x625   :  { %2007 = vmatpush.msrb.mxu0 %v6650_v35  ;;  %2027 = vmatpush.msrb.mxu1 %v6651_v45 }
 0x626   :  { %2047 = vmatpush.msrb.mxu2 %v5004_v32  ;;  %2067 = vmatpush.msrb.mxu3 %v5009_v36  ;;  %v6656_v32 = vld [vmem:[#allocation6_spill] sm:$0xff] }
 0x627   :  { %2008 = vmatpush.msrb.mxu0 %v5016_v59  ;;  %2028 = vmatpush.msrb.mxu1 %v5021_v42 }
 0x628   :  { %2048 = vmatpush.msrb.mxu2 %v5028_v49  ;;  %2068 = vmatpush.msrb.mxu3 %v6652_v28 }
 0x629   :  { %2009 = vmatpush.msrb.mxu0 %v6653_v31  ;;  %2029 = vmatpush.msrb.mxu1 %v5045_v29 }
 0x62a   :  { %2049 = vmatpush.msrb.mxu2 %v5052_v27  ;;  %2069 = vmatpush.msrb.mxu3 %v6654_v50 }
 0x62b   :  { %2010 = vmatpush.msrb.mxu0 %v6655_v11  ;;  %2030 = vmatpush.msrb.mxu1 %v6656_v32 }
 0x62c   :  { %2050 = vmatpush.msrb.mxu2 %v5081_v22  ;;  %2070 = vmatpush.msrb.mxu3 %v5086_v39 }
 0x62d   :  { %2011 = vmatpush.msrb.mxu0 %v5093_v5  ;;  %2031 = vmatpush.msrb.mxu1 %v5098_v15 }
 0x62e   :  { %2051 = vmatpush.msrb.mxu2 %v5105_v16  ;;  %2071 = vmatpush.msrb.mxu3 %v5110_v24 }
 0x62f   :  { %2012 = vmatpush.msrb.mxu0 %v5119_v51  ;;  %2032 = vmatpush.msrb.mxu1 %v5124_v12 }
 0x630   :  { %2052 = vmatpush.msrb.mxu2 %v5131_v34  ;;  %2072 = vmatpush.msrb.mxu3 %v5136_v9 }
 0x631   :  { %2013 = vmatpush.msrb.mxu0 %v5143_v58  ;;  %2033 = vmatpush.msrb.mxu1 %v5148_v54 }
 0x632   :  { %2053 = vmatpush.msrb.mxu2 %v5155_v10  ;;  %2073 = vmatpush.msrb.mxu3 %v5160_v47 }
 0x633   :  { %2014 = vmatpush.msrb.mxu0 %v5171_v3  ;;  %2034 = vmatpush.msrb.mxu1 %v5176_v52 }
 0x634   :  { %2054 = vmatpush.msrb.mxu2 %v5183_v57  ;;  %2074 = vmatpush.msrb.mxu3 %v5188_v20 }
 0x635   :  { %2015 = vmatpush.msrb.mxu0 %v5197_v55  ;;  %2035 = vmatpush.msrb.mxu1 %v5202_v18 }
 0x636   :  { %2055 = vmatpush.msrb.mxu2 %v5210_v48  ;;  %2075 = vmatpush.msrb.mxu3 %v6638_v41  ;;  %v6658_v41 = vld [vmem:[#allocation19_spill] sm:$0xff] }
 0x637   :  { %2016 = vmatpush.msrb.mxu0 %v6639_v0  ;;  %2036 = vmatpush.msrb.mxu1 %v6640_v63  ;;  %v6657_v0 = vld [vmem:[#allocation18_spill] sm:$0xff] }
 0x638   :  { %2056 = vmatpush.msrb.mxu2 %v6641_v2  ;;  %2076 = vmatpush.msrb.mxu3 %v6642_v30 }
 0x639   :  { %2017 = vmatpush.msrb.mxu0 %v6643_v19  ;;  %2037 = vmatpush.msrb.mxu1 %v6644_v38 }
 0x63a   :  { %2057 = vmatpush.msrb.mxu2 %v5260_v33  ;;  %2077 = vmatpush.msrb.mxu3 %v5265_v53  ;;  %v6659_v53 = vld [vmem:[#allocation36_spill] sm:$0xff] }
 0x63b   :  { %2018 = vmatpush.msrb.mxu0 %v5272_v4  ;;  %2038 = vmatpush.msrb.mxu1 %v5277_v23 }
 0x63c   :  { %2058 = vmatpush.msrb.mxu2 %v5284_v26  ;;  %2078 = vmatpush.msrb.mxu3 %v5289_v60 }
 0x698   :  { %v1726_v63 = vpop.f32.mrf.mxu0  ;;  %v1746_v2 = vpop.f32.mrf.mxu1 }
 0x699   :  { %v1789_v30 = vadd.f32 %v1726_v63, %v6657_v0  ;;  %v1790_v19 = vadd.f32 %v1746_v2, %v6658_v41  ;;  %v6660_v2 = vld [vmem:[#allocation44_spill] sm:$0xff] }
 0x69b   :  { %v2777_v48 = vmul.f32 -1.442695, %v1789_v30  ;;  %v2778_v38 = vmul.f32 -1.442695, %v1790_v19 }
 0x69d   :  { %2942 = vpow2.f32 %v2777_v48 }
 0x69e   :  { %2944 = vpow2.f32 %v2778_v38 }
 0x69f   :  { %v1766_v33 = vpop.f32.mrf.mxu2  ;;  %v1786_v60 = vpop.f32.mrf.mxu3 }
 0x6a0   :  { %v1791_v18 = vadd.f32 %v1766_v33, %v6659_v53  ;;  %v1792_v30 = vadd.f32 %v1786_v60, %v6660_v2 }
 0x6a2   :  { %v2779_v4 = vmul.f32 -1.442695, %v1791_v18 }
 0x6a3   :  { %v2943_v55 = vpop.eup %2942 }
 0x6a4   :  { %v2945_v23 = vpop.eup %2944  ;;  %v1802_v20 = vadd.f32 1.0, %v2943_v55  ;;  %2946 = vpow2.f32 %v2779_v4 }
 0x6a5   :  { %v1803_v26 = vadd.f32 1.0, %v2945_v23 }
 0x6a6   :  { %2948 = vrcp.f32 %v1802_v20  ;;  %v1816_v18 = vand.u32 2147483648, %v1802_v20  ;;  %v1814_v4 = vand.u32 2147483647, %v1802_v20  ;;  %vm1810_vm14 = vweird.f32 %v1802_v20 }
 0x6a7   :  { %2950 = vrcp.f32 %v1803_v26  ;;  %v1831_v53 = vand.u32 2147483648, %v1803_v26  ;;  %v1829_v52 = vand.u32 2147483647, %v1803_v26  ;;  %vm1825_vm15 = vweird.f32 %v1803_v26 }
 0x6a8   :  { %v1817_v2 = vor.u32 1.1754944e-38, %v1816_v18  ;;  %vm1815_vm2 = vcmp.eq.f32.partialorder %v1814_v4, 8.507059e+37 }
 0x6a9   :  { %vm1830_vm3 = vcmp.eq.f32.partialorder %v1829_v52, 8.507059e+37 }
 0x6aa   :  { %v2947_v57 = vpop.eup %2946 }
 0x6ab   :  { %v1804_v63 = vadd.f32 1.0, %v2947_v57 }
 0x6ac   :  { %v2949_v0 = vpop.eup %2948 }
 0x6ad   :  { %v2951_v19 = vpop.eup %2950  ;;  %v1806_v48 = vmul.f32 %v2949_v0, %v1802_v20  ;;  %2952 = vrcp.f32 %v1804_v63  ;;  %vm1811_vm12 = vweird.f32 %v2949_v0  ;;  %v1846_v18 = vand.u32 2147483648, %v1804_v63 }
 0x6ae   :  { %v1821_v38 = vmul.f32 %v2951_v19, %v1803_v26  ;;  %2954 = vtanh.f32 %v1792_v30  ;;  %vm1826_vm13 = vweird.f32 %v2951_v19  ;;  %vm1812_vm0 = vmor %vm1810_vm14, %vm1811_vm12  ;;  %vm1840_vm5 = vweird.f32 %v1804_v63 }
 0x6af   :  { %v1807_v41 = vsub.f32 1.0, %v1806_v48  ;;  %vm1827_vm1 = vmor %vm1825_vm15, %vm1826_vm13  ;;  %v1832_v48 = vor.u32 1.1754944e-38, %v1831_v53  ;;  %v1844_v53 = vand.u32 2147483647, %v1804_v63  ;;  %v1847_v4 = vor.u32 1.1754944e-38, %v1846_v18 }
 0x6b0   :  { %v1822_v33 = vsub.f32 1.0, %v1821_v38 }
 0x6b1   :  { %v1808_v55 = vmul.f32 %v2949_v0, %v1807_v41  ;;  %vm1845_vm7 = vcmp.eq.f32.partialorder %v1844_v53, 8.507059e+37 }
 0x6b2   :  { %v1823_v23 = vmul.f32 %v2951_v19, %v1822_v33 }
 0x6b3   :  { %v2953_v3 = vpop.eup %2952  ;;  %v1809_v57 = vadd.f32 %v2949_v0, %v1808_v55 }
 0x6b4   :  { %v1836_v60 = vmul.f32 %v2953_v3, %v1804_v63  ;;  %v1824_v47 = vadd.f32 %v2951_v19, %v1823_v23  ;;  %v2955_v30 = vpop.eup %2954  ;;  %vm1841_vm4 = vweird.f32 %v2953_v3  ;;  %v6690_v23 = vld [vmem:[#allocation44_spill] sm:$0xff] }
 0x6b5   :  { %v1813_v38 = vsel %vm1812_vm0, %v2949_v0, %v1809_v57  ;;  %vm1842_vm6 = vmor %vm1840_vm5, %vm1841_vm4 }
 0x6b6   :  { %v1837_v10 = vsub.f32 1.0, %v1836_v60  ;;  %v1818_v41 = vsel %vm1815_vm2, %v1817_v2, %v1813_v38  ;;  %v1828_v54 = vsel %vm1827_vm1, %v2951_v19, %v1824_v47 }
 0x6b7   :  { %v1833_v33 = vsel %vm1830_vm3, %v1832_v48, %v1828_v54  ;;  %v1852_v58 = vmul.f32 %v2955_v30, %v1818_v41 }
 0x6b8   :  { %v1838_v9 = vmul.f32 %v2953_v3, %v1837_v10  ;;  %v1851_v55 = vmul.f32 %v1833_v33, %v5366_v17 }
 0x6ba   :  { %v5471_v20 = vadd.f32 %v1852_v58, %v1851_v55  ;;  %v1839_v26 = vadd.f32 %v2953_v3, %v1838_v9  ;;  %v6687_v58 = vld [vmem:[#allocation18_spill] sm:$0xff] }
 0x6bc   :  { %2956 = vtanh.f32 %v5471_v20  ;;  %v1843_v0 = vsel %vm1842_vm6, %v2953_v3, %v1839_v26  ;;  %v6688_v3 = vld [vmem:[#allocation19_spill] sm:$0xff] }
 0x6bd   :  { %v1848_v52 = vsel %vm1845_vm7, %v1847_v4, %v1843_v0 }
 0x6c2   :  { %v2957_v47 = vpop.eup %2956 }
 0x6c3   :  { %v1855_v54 = vmul.f32 %v2957_v47, %v1848_v52 }
 0x6c5   :  { %1872 = vmatmul.f32.vlgmr.msra.gmra.mxu0 %v1855_v54  ;;  %2739 = vst [vmem:[%s6123_s7 + $0x8] sm:$0xff] %v1855_v54  ;;  %1892 = vmatmul.f32.vlgmr.msra.gmra.mxu1 %v1855_v54 }
 0x6c6   :  { %1912 = vmatmul.f32.vlgmr.msra.gmra.mxu2 %v1855_v54  ;;  %1932 = vmatmul.f32.vlgmr.msra.gmra.mxu3 %v1855_v54 }
 0x6c7   :  { %2150 = vmatpush.msra.mxu0 %v4900_v56  ;;  %2170 = vmatpush.msra.mxu1 %v4905_v1  ;;  %v6661_v56 = vld [vmem:[#allocation12_spill] sm:$0xff] }
 0x6c8   :  { %2190 = vmatpush.msra.mxu2 %v4910_v6  ;;  %2210 = vmatpush.msra.mxu3 %v4917_v7  ;;  %v6662_v1 = vld [vmem:[#allocation20_spill] sm:$0xff]  ;;  %v6663_v6 = vld [vmem:[#allocation15_spill] sm:$0xff] }
 0x6c9   :  { %2151 = vmatpush.msra.mxu0 %v6645_v62  ;;  %2171 = vmatpush.msra.mxu1 %v4929_v13  ;;  %v6664_v7 = vld [vmem:[#allocation16_spill] sm:$0xff]  ;;  %v6665_v13 = vld [vmem:[#allocation17_spill] sm:$0xff] }
 0x6ca   :  { %2191 = vmatpush.msra.mxu2 %v6646_v14  ;;  %2211 = vmatpush.msra.mxu3 %v6647_v46 }
 0x6cb   :  { %2152 = vmatpush.msra.mxu0 %v4946_v21  ;;  %2172 = vmatpush.msra.mxu1 %v4951_v44  ;;  %v6666_v21 = vld [vmem:[#allocation28_spill] sm:$0xff] }
 0x6cc   :  { %2192 = vmatpush.msra.mxu2 %v4958_v37  ;;  %2212 = vmatpush.msra.mxu3 %v4963_v25  ;;  %v6667_v44 = vld [vmem:[#allocation24_spill] sm:$0xff]  ;;  %v6668_v37 = vld [vmem:[#allocation30_spill] sm:$0xff] }
 0x6cd   :  { %2153 = vmatpush.msra.mxu0 %v4968_v8  ;;  %2173 = vmatpush.msra.mxu1 %v6648_v43  ;;  %v6669_v25 = vld [vmem:[#allocation22_spill] sm:$0xff]  ;;  %v6670_v8 = vld [vmem:[#allocation23_spill] sm:$0xff]  ;;  %v6689_v43 = vld [vmem:[#allocation36_spill] sm:$0xff] }
 0x6ce   :  { %2193 = vmatpush.msra.mxu2 %v4980_v40  ;;  %2213 = vmatpush.msra.mxu3 %v6649_v61  ;;  %v6671_v40 = vld [vmem:[#allocation27_spill] sm:$0xff] }
 0x6cf   :  { %2154 = vmatpush.msra.mxu0 %v6650_v35  ;;  %2174 = vmatpush.msra.mxu1 %v6651_v45 }
 0x6d0   :  { %2194 = vmatpush.msra.mxu2 %v6661_v56  ;;  %2214 = vmatpush.msra.mxu3 %v5009_v36  ;;  %v6673_v36 = vld [vmem:[#allocation25_spill] sm:$0xff] }
 0x6d1   :  { %2155 = vmatpush.msra.mxu0 %v5016_v59  ;;  %2175 = vmatpush.msra.mxu1 %v5021_v42  ;;  %v6674_v59 = vld [vmem:[#allocation26_spill] sm:$0xff]  ;;  %v6675_v42 = vld [vmem:[#allocation32_spill] sm:$0xff] }
 0x6d2   :  { %2195 = vmatpush.msra.mxu2 %v5028_v49  ;;  %2215 = vmatpush.msra.mxu3 %v6652_v28  ;;  %v6676_v49 = vld [vmem:[#allocation35_spill] sm:$0xff] }
 0x6d3   :  { %2156 = vmatpush.msra.mxu0 %v6653_v31  ;;  %2176 = vmatpush.msra.mxu1 %v5045_v29  ;;  %v6677_v29 = vld [vmem:[#allocation37_spill] sm:$0xff] }
 0x6d4   :  { %2196 = vmatpush.msra.mxu2 %v5052_v27  ;;  %2216 = vmatpush.msra.mxu3 %v6654_v50  ;;  %v6678_v27 = vld [vmem:[#allocation31_spill] sm:$0xff] }
 0x6d5   :  { %2157 = vmatpush.msra.mxu0 %v6655_v11  ;;  %2177 = vmatpush.msra.mxu1 %v6656_v32  ;;  %v6672_v32 = vld [vmem:[#allocation33_spill] sm:$0xff] }
 0x6d6   :  { %2197 = vmatpush.msra.mxu2 %v5081_v22  ;;  %2217 = vmatpush.msra.mxu3 %v5086_v39  ;;  %v6679_v22 = vld [vmem:[#allocation29_spill] sm:$0xff]  ;;  %v6680_v39 = vld [vmem:[#allocation39_spill] sm:$0xff] }
 0x6d7   :  { %2158 = vmatpush.msra.mxu0 %v5093_v5  ;;  %2178 = vmatpush.msra.mxu1 %v5098_v15  ;;  %v6681_v5 = vld [vmem:[#allocation40_spill] sm:$0xff]  ;;  %v6682_v15 = vld [vmem:[#allocation34_spill] sm:$0xff] }
 0x6d8   :  { %2198 = vmatpush.msra.mxu2 %v5105_v16  ;;  %2218 = vmatpush.msra.mxu3 %v5110_v24  ;;  %v6683_v16 = vld [vmem:[#allocation41_spill] sm:$0xff] }
 0x6d9   :  { %2159 = vmatpush.msra.mxu0 %v5119_v51  ;;  %2179 = vmatpush.msra.mxu1 %v5124_v12  ;;  %v6684_v24 = vld [vmem:[#allocation13_spill] sm:$0xff]  ;;  %v6685_v51 = vld [vmem:[#allocation43_spill] sm:$0xff]  ;;  %v6686_v12 = vld [vmem:[#allocation14_spill] sm:$0xff] }
 0x6da   :  { %2199 = vmatpush.msra.mxu2 %v5131_v34  ;;  %2219 = vmatpush.msra.mxu3 %v6662_v1 }
 0x6db   :  { %2160 = vmatpush.msra.mxu0 %v6663_v6  ;;  %2180 = vmatpush.msra.mxu1 %v6664_v7 }
 0x6dc   :  { %2200 = vmatpush.msra.mxu2 %v6665_v13  ;;  %2220 = vmatpush.msra.mxu3 %v6666_v21 }
 0x6dd   :  { %2161 = vmatpush.msra.mxu0 %v6667_v44  ;;  %2181 = vmatpush.msra.mxu1 %v6668_v37 }
 0x6de   :  { %2201 = vmatpush.msra.mxu2 %v6669_v25  ;;  %2221 = vmatpush.msra.mxu3 %v6670_v8 }
 0x6df   :  { %2162 = vmatpush.msra.mxu0 %v6671_v40  ;;  %2182 = vmatpush.msra.mxu1 %v6672_v32 }
 0x6e0   :  { %2202 = vmatpush.msra.mxu2 %v6673_v36  ;;  %2222 = vmatpush.msra.mxu3 %v6674_v59 }
 0x6e1   :  { %2163 = vmatpush.msra.mxu0 %v6675_v42  ;;  %2183 = vmatpush.msra.mxu1 %v6676_v49 }
 0x6e2   :  { %2203 = vmatpush.msra.mxu2 %v6677_v29  ;;  %2223 = vmatpush.msra.mxu3 %v6678_v27 }
 0x6e3   :  { %2164 = vmatpush.msra.mxu0 %v6679_v22  ;;  %2184 = vmatpush.msra.mxu1 %v6680_v39 }
 0x6e4   :  { %2204 = vmatpush.msra.mxu2 %v6681_v5  ;;  %2224 = vmatpush.msra.mxu3 %v6682_v15 }
 0x6e5   :  { %2165 = vmatpush.msra.mxu0 %v6683_v16  ;;  %2185 = vmatpush.msra.mxu1 %v6684_v24 }
 0x6e6   :  { %2205 = vmatpush.msra.mxu2 %v6685_v51  ;;  %2225 = vmatpush.msra.mxu3 %v6686_v12 }
 0x742   :  { %v1873_v34 = vpop.f32.mrf.mxu0  ;;  %v1893_v9 = vpop.f32.mrf.mxu1 }
 0x743   :  { %v1936_v10 = vadd.f32 %v1873_v34, %v6687_v58  ;;  %v1937_v17 = vadd.f32 %v1893_v9, %v6688_v3 }
 0x745   :  { %v2780_v62 = vmul.f32 -1.442695, %v1936_v10  ;;  %v2781_v14 = vmul.f32 -1.442695, %v1937_v17 }
 0x747   :  { %2958 = vpow2.f32 %v2780_v62 }
 0x748   :  { %2960 = vpow2.f32 %v2781_v14 }
 0x749   :  { %v1913_v46 = vpop.f32.mrf.mxu2  ;;  %v1933_v11 = vpop.f32.mrf.mxu3 }
 0x74a   :  { %v1938_v61 = vadd.f32 %v1913_v46, %v6689_v43  ;;  %v1939_v57 = vadd.f32 %v1933_v11, %v6690_v23  ;;  %v5567_v11 = vld [vmem:[%s6121_s6 + $0x1f0] sm:$0xff] }
 0x74c   :  { %v2782_v35 = vmul.f32 -1.442695, %v1938_v61 }
 0x74d   :  { %v2959_v45 = vpop.eup %2958 }
 0x74e   :  { %v2961_v28 = vpop.eup %2960  ;;  %v1949_v31 = vadd.f32 1.0, %v2959_v45  ;;  %2962 = vpow2.f32 %v2782_v35 }
 0x74f   :  { %v1950_v50 = vadd.f32 1.0, %v2961_v28 }
 0x750   :  { %2964 = vrcp.f32 %v1949_v31  ;;  %v1963_v33 = vand.u32 2147483648, %v1949_v31  ;;  %v1961_v18 = vand.u32 2147483647, %v1949_v31  ;;  %vm1957_vm10 = vweird.f32 %v1949_v31 }
 0x751   :  { %2966 = vrcp.f32 %v1950_v50  ;;  %v1978_v55 = vand.u32 2147483648, %v1950_v50  ;;  %v1976_v0 = vand.u32 2147483647, %v1950_v50  ;;  %vm1972_vm11 = vweird.f32 %v1950_v50 }
 0x752   :  { %v1964_v54 = vor.u32 1.1754944e-38, %v1963_v33  ;;  %vm1962_vm14 = vcmp.eq.f32.partialorder %v1961_v18, 8.507059e+37  ;;  %v5627_v33 = vld [vmem:[%s6121_s6 + $0x180] sm:$0xff]  ;;  %v5645_v18 = vld [vmem:[%s6121_s6 + $0x198] sm:$0xff] }
 0x753   :  { %v1979_v1 = vor.u32 1.1754944e-38, %v1978_v55  ;;  %vm1977_vm15 = vcmp.eq.f32.partialorder %v1976_v0, 8.507059e+37  ;;  %v5633_v55 = vld [vmem:[%s6121_s6 + $0x188] sm:$0xff] }
 0x754   :  { %v2963_v63 = vpop.eup %2962  ;;  %v5657_v0 = vld [vmem:[%s6121_s6 + $0x168] sm:$0xff] }
 0x755   :  { %v1951_v2 = vadd.f32 1.0, %v2963_v63  ;;  %v5573_v63 = vld [vmem:[%s6121_s6 + $0x1f8] sm:$0xff] }
 0x756   :  { %v2965_v19 = vpop.eup %2964 }
 0x757   :  { %v2967_v60 = vpop.eup %2966  ;;  %v1953_v48 = vmul.f32 %v2965_v19, %v1949_v31  ;;  %2968 = vrcp.f32 %v1951_v2  ;;  %vm1958_vm8 = vweird.f32 %v2965_v19  ;;  %v1993_v14 = vand.u32 2147483648, %v1951_v2 }
 0x758   :  { %v1968_v38 = vmul.f32 %v2967_v60, %v1950_v50  ;;  %2970 = vtanh.f32 %v1939_v57  ;;  %vm1973_vm9 = vweird.f32 %v2967_v60  ;;  %vm1959_vm12 = vmor %vm1957_vm10, %vm1958_vm8  ;;  %vm1987_vm1 = vweird.f32 %v1951_v2  ;;  %v5561_v50 = vld [vmem:[%s6121_s6 + $0x1e8] sm:$0xff]  ;;  %v5591_v57 = vld [vmem:[%s6121_s6 + $0x1d0] sm:$0xff] }
 0x759   :  { %v1954_v30 = vsub.f32 1.0, %v1953_v48  ;;  %vm1974_vm13 = vmor %vm1972_vm11, %vm1973_vm9  ;;  %v1991_v46 = vand.u32 2147483647, %v1951_v2  ;;  %v1994_v35 = vor.u32 1.1754944e-38, %v1993_v14  ;;  %v5603_v48 = vld [vmem:[%s6121_s6 + $0x1a0] sm:$0xff]  ;;  %v5759_v14 = vld [vmem:[%s6121_s6 + $0xf0] sm:$0xff] }
 0x75a   :  { %v1969_v41 = vsub.f32 1.0, %v1968_v38  ;;  %v5609_v38 = vld [vmem:[%s6121_s6 + $0x1a8] sm:$0xff] }
 0x75b   :  { %v1955_v26 = vmul.f32 %v2965_v19, %v1954_v30  ;;  %vm1992_vm3 = vcmp.eq.f32.partialorder %v1991_v46, 8.507059e+37  ;;  %v5615_v30 = vld [vmem:[%s6121_s6 + $0x1b0] sm:$0xff]  ;;  %v5765_v46 = vld [vmem:[%s6121_s6 + $0xf8] sm:$0xff] }
 0x75c   :  { %v1970_v53 = vmul.f32 %v2967_v60, %v1969_v41  ;;  %v5621_v41 = vld [vmem:[%s6121_s6 + $0x1b8] sm:$0xff] }
 0x75d   :  { %v2969_v4 = vpop.eup %2968  ;;  %v1956_v47 = vadd.f32 %v2965_v19, %v1955_v26  ;;  %v5639_v26 = vld [vmem:[%s6121_s6 + $0x190] sm:$0xff] }
 0x75e   :  { %v1983_v52 = vmul.f32 %v2969_v4, %v1951_v2  ;;  %v1971_v56 = vadd.f32 %v2967_v60, %v1970_v53  ;;  %v2971_v7 = vpop.eup %2970  ;;  %vm1988_vm0 = vweird.f32 %v2969_v4  ;;  %v5579_v2 = vld [vmem:[%s6121_s6 + $0x1c0] sm:$0xff] }
 0x75f   :  { %v1960_v6 = vsel %vm1959_vm12, %v2965_v19, %v1956_v47  ;;  %vm1989_vm2 = vmor %vm1987_vm1, %vm1988_vm0  ;;  %v5585_v19 = vld [vmem:[%s6121_s6 + $0x1c8] sm:$0xff]  ;;  %v5651_v53 = vld [vmem:[%s6121_s6 + $0x160] sm:$0xff] }
 0x760   :  { %v1984_v13 = vsub.f32 1.0, %v1983_v52  ;;  %v1965_v21 = vsel %vm1962_vm14, %v1964_v54, %v1960_v6  ;;  %v1975_v44 = vsel %vm1974_vm13, %v2967_v60, %v1971_v56  ;;  %v5597_v60 = vld [vmem:[%s6121_s6 + $0x1d8] sm:$0xff]  ;;  %v5675_v52 = vld [vmem:[%s6121_s6 + $0x140] sm:$0xff]  ;;  %v5681_v54 = vld [vmem:[%s6121_s6 + $0x148] sm:$0xff] }
 0x761   :  { %v1980_v37 = vsel %vm1977_vm15, %v1979_v1, %v1975_v44  ;;  %v1999_v34 = vmul.f32 %v2971_v7, %v1965_v21  ;;  %v5669_v47 = vld [vmem:[%s6121_s6 + $0x178] sm:$0xff]  ;;  %v5687_v56 = vld [vmem:[%s6121_s6 + $0x150] sm:$0xff]  ;;  %v5699_v6 = vld [vmem:[%s6121_s6 + $0x120] sm:$0xff] }
 0x762   :  { %v1985_v9 = vmul.f32 %v2969_v4, %v1984_v13  ;;  %v1998_v10 = vmul.f32 %v1980_v37, %v5471_v20  ;;  %v5555_v20 = vld [vmem:[%s6121_s6 + $0x1e0] sm:$0xff]  ;;  %v5693_v1 = vld [vmem:[%s6121_s6 + $0x158] sm:$0xff]  ;;  %v5705_v7 = vld [vmem:[%s6121_s6 + $0x128] sm:$0xff] }
 0x763   :  { %v5711_v13 = vld [vmem:[%s6121_s6 + $0x130] sm:$0xff]  ;;  %v5717_v21 = vld [vmem:[%s6121_s6 + $0x138] sm:$0xff]  ;;  %v5723_v44 = vld [vmem:[%s6121_s6 + $0x100] sm:$0xff] }
 0x764   :  { %v5546_v17 = vadd.f32 %v1999_v34, %v1998_v10  ;;  %v1986_v62 = vadd.f32 %v2969_v4, %v1985_v9  ;;  %v5729_v37 = vld [vmem:[%s6121_s6 + $0x108] sm:$0xff]  ;;  %v5735_v34 = vld [vmem:[%s6121_s6 + $0x110] sm:$0xff]  ;;  %v5741_v9 = vld [vmem:[%s6121_s6 + $0x118] sm:$0xff] }
 0x765   :  { %v5747_v10 = vld [vmem:[%s6121_s6 + $0xe0] sm:$0xff] }
 0x766   :  { %2972 = vtanh.f32 %v5546_v17  ;;  %v1990_v61 = vsel %vm1989_vm2, %v2969_v4, %v1986_v62  ;;  %v5663_v4 = vld [vmem:[%s6121_s6 + $0x170] sm:$0xff]  ;;  %v5753_v62 = vld [vmem:[%s6121_s6 + $0xe8] sm:$0xff] }
 0x767   :  { %v1995_v28 = vsel %vm1992_vm3, %v1994_v35, %v1990_v61  ;;  %v5771_v61 = vld [vmem:[%s6121_s6 + $0xc0] sm:$0xff]  ;;  %v5777_v35 = vld [vmem:[%s6121_s6 + $0xc8] sm:$0xff] }
 0x768   :  { %6691 = vst [vmem:[#allocation21_spill] sm:$0xff] %v5777_v35 }
 0x76c   :  { %v2973_v45 = vpop.eup %2972 }
 0x76d   :  { %v2002_v31 = vmul.f32 %v2973_v45, %v1995_v28  ;;  %v5783_v45 = vld [vmem:[%s6121_s6 + $0xd0] sm:$0xff]  ;;  %v5789_v28 = vld [vmem:[%s6121_s6 + $0xd8] sm:$0xff] }
 0x76e   :  { %6692 = vst [vmem:[#allocation46_spill] sm:$0xff] %v5783_v45 }
 0x76f   :  { %2019 = vmatmul.f32.vlgmr.msrb.gmra.mxu0 %v2002_v31  ;;  %2740 = vst [vmem:[%s6123_s7 + $0x10] sm:$0xff] %v2002_v31  ;;  %2039 = vmatmul.f32.vlgmr.msrb.gmra.mxu1 %v2002_v31 }
 0x770   :  { %2059 = vmatmul.f32.vlgmr.msrb.gmra.mxu2 %v2002_v31  ;;  %2079 = vmatmul.f32.vlgmr.msrb.gmra.mxu3 %v2002_v31  ;;  %6693 = vst [vmem:[#allocation38_spill] sm:$0xff] %v5789_v28  ;;  %v5795_v31 = vld [vmem:[%s6121_s6 + $0xa0] sm:$0xff] }
 0x771   :  { %2297 = vmatpush.msrb.mxu0 %v5555_v20  ;;  %2317 = vmatpush.msrb.mxu1 %v5561_v50  ;;  %6694 = vst [vmem:[#allocation49_spill] sm:$0xff] %v5795_v31 }
 0x772   :  { %2337 = vmatpush.msrb.mxu2 %v5567_v11  ;;  %2357 = vmatpush.msrb.mxu3 %v5573_v63 }
 0x773   :  { %2298 = vmatpush.msrb.mxu0 %v5579_v2  ;;  %2318 = vmatpush.msrb.mxu1 %v5585_v19 }
 0x774   :  { %2338 = vmatpush.msrb.mxu2 %v5591_v57  ;;  %2358 = vmatpush.msrb.mxu3 %v5597_v60 }
 0x775   :  { %2299 = vmatpush.msrb.mxu0 %v5603_v48  ;;  %2319 = vmatpush.msrb.mxu1 %v5609_v38 }
 0x776   :  { %2339 = vmatpush.msrb.mxu2 %v5615_v30  ;;  %2359 = vmatpush.msrb.mxu3 %v5621_v41 }
 0x777   :  { %2300 = vmatpush.msrb.mxu0 %v5627_v33  ;;  %2320 = vmatpush.msrb.mxu1 %v5633_v55 }
 0x778   :  { %2340 = vmatpush.msrb.mxu2 %v5639_v26  ;;  %2360 = vmatpush.msrb.mxu3 %v5645_v18 }
 0x779   :  { %2301 = vmatpush.msrb.mxu0 %v5651_v53  ;;  %2321 = vmatpush.msrb.mxu1 %v5657_v0 }
 0x77a   :  { %2341 = vmatpush.msrb.mxu2 %v5663_v4  ;;  %2361 = vmatpush.msrb.mxu3 %v5669_v47 }
 0x77b   :  { %2302 = vmatpush.msrb.mxu0 %v5675_v52  ;;  %2322 = vmatpush.msrb.mxu1 %v5681_v54 }
 0x77c   :  { %2342 = vmatpush.msrb.mxu2 %v5687_v56  ;;  %2362 = vmatpush.msrb.mxu3 %v5693_v1 }
 0x77d   :  { %2303 = vmatpush.msrb.mxu0 %v5699_v6  ;;  %2323 = vmatpush.msrb.mxu1 %v5705_v7 }
 0x77e   :  { %2343 = vmatpush.msrb.mxu2 %v5711_v13  ;;  %2363 = vmatpush.msrb.mxu3 %v5717_v21 }
 0x77f   :  { %2304 = vmatpush.msrb.mxu0 %v5723_v44  ;;  %2324 = vmatpush.msrb.mxu1 %v5729_v37 }
 0x780   :  { %2344 = vmatpush.msrb.mxu2 %v5735_v34  ;;  %2364 = vmatpush.msrb.mxu3 %v5741_v9 }
 0x781   :  { %2305 = vmatpush.msrb.mxu0 %v5747_v10  ;;  %2325 = vmatpush.msrb.mxu1 %v5753_v62 }
 0x782   :  { %2345 = vmatpush.msrb.mxu2 %v5759_v14  ;;  %2365 = vmatpush.msrb.mxu3 %v5765_v46 }
 0x783   :  { %2306 = vmatpush.msrb.mxu0 %v5771_v61  ;;  %2326 = vmatpush.msrb.mxu1 %v5777_v35  ;;  %v5801_v35 = vld [vmem:[%s6121_s6 + $0xa8] sm:$0xff] }
 0x784   :  { %2346 = vmatpush.msrb.mxu2 %v5783_v45  ;;  %2366 = vmatpush.msrb.mxu3 %v5789_v28  ;;  %6695 = vst [vmem:[#allocation47_spill] sm:$0xff] %v5801_v35  ;;  %v5807_v45 = vld [vmem:[%s6121_s6 + $0xb0] sm:$0xff]  ;;  %v5813_v28 = vld [vmem:[%s6121_s6 + $0xb8] sm:$0xff] }
 0x785   :  { %2307 = vmatpush.msrb.mxu0 %v5795_v31  ;;  %2327 = vmatpush.msrb.mxu1 %v5801_v35  ;;  %6696 = vst [vmem:[#allocation48_spill] sm:$0xff] %v5807_v45  ;;  %v5819_v31 = vld [vmem:[%s6121_s6 + $0x80] sm:$0xff]  ;;  %v5825_v35 = vld [vmem:[%s6121_s6 + $0x88] sm:$0xff] }
 0x786   :  { %2347 = vmatpush.msrb.mxu2 %v5807_v45  ;;  %6697 = vst [vmem:[#allocation50_spill] sm:$0xff] %v5813_v28  ;;  %2367 = vmatpush.msrb.mxu3 %v5813_v28 }
 0x787   :  { %6698 = vst [vmem:[#allocation53_spill] sm:$0xff] %v5819_v31  ;;  %2308 = vmatpush.msrb.mxu0 %v5819_v31  ;;  %2328 = vmatpush.msrb.mxu1 %v5825_v35 }
 0x788   :  { %6699 = vst [vmem:[#allocation51_spill] sm:$0xff] %v5825_v35  ;;  %2348 = vmatpush.msrb.mxu2 %v6669_v25  ;;  %2368 = vmatpush.msrb.mxu3 %v6670_v8 }
 0x789   :  { %2309 = vmatpush.msrb.mxu0 %v6671_v40  ;;  %2329 = vmatpush.msrb.mxu1 %v6672_v32 }
 0x78a   :  { %2349 = vmatpush.msrb.mxu2 %v6673_v36  ;;  %2369 = vmatpush.msrb.mxu3 %v6674_v59 }
 0x78b   :  { %2310 = vmatpush.msrb.mxu0 %v6675_v42  ;;  %2330 = vmatpush.msrb.mxu1 %v6676_v49 }
 0x78c   :  { %2350 = vmatpush.msrb.mxu2 %v6677_v29  ;;  %2370 = vmatpush.msrb.mxu3 %v6678_v27 }
 0x78d   :  { %2311 = vmatpush.msrb.mxu0 %v6679_v22  ;;  %2331 = vmatpush.msrb.mxu1 %v6680_v39 }
 0x78e   :  { %2351 = vmatpush.msrb.mxu2 %v6681_v5  ;;  %2371 = vmatpush.msrb.mxu3 %v6682_v15 }
 0x78f   :  { %2312 = vmatpush.msrb.mxu0 %v6683_v16  ;;  %2332 = vmatpush.msrb.mxu1 %v6684_v24 }
 0x790   :  { %2352 = vmatpush.msrb.mxu2 %v6685_v51  ;;  %2372 = vmatpush.msrb.mxu3 %v6686_v12 }
 0x7ec   :  { %v2020_v25 = vpop.f32.mrf.mxu0  ;;  %v2040_v8 = vpop.f32.mrf.mxu1 }
 0x7ed   :  { %v2083_v40 = vadd.f32 %v2020_v25, %v6687_v58  ;;  %v2084_v32 = vadd.f32 %v2040_v8, %v6688_v3 }
 0x7ef   :  { %v2783_v36 = vmul.f32 -1.442695, %v2083_v40  ;;  %v2784_v59 = vmul.f32 -1.442695, %v2084_v32 }
 0x7f1   :  { %2974 = vpow2.f32 %v2783_v36 }
 0x7f2   :  { %2976 = vpow2.f32 %v2784_v59 }
 0x7f3   :  { %v2060_v42 = vpop.f32.mrf.mxu2  ;;  %v2080_v15 = vpop.f32.mrf.mxu3 }
 0x7f4   :  { %v2085_v49 = vadd.f32 %v2060_v42, %v6689_v43  ;;  %v2086_v12 = vadd.f32 %v2080_v15, %v6690_v23 }
 0x7f6   :  { %v2785_v29 = vmul.f32 -1.442695, %v2085_v49 }
 0x7f7   :  { %v2975_v27 = vpop.eup %2974 }
 0x7f8   :  { %v2977_v22 = vpop.eup %2976  ;;  %v2096_v39 = vadd.f32 1.0, %v2975_v27  ;;  %2978 = vpow2.f32 %v2785_v29 }
 0x7f9   :  { %v2097_v5 = vadd.f32 1.0, %v2977_v22 }
 0x7fa   :  { %2980 = vrcp.f32 %v2096_v39  ;;  %v2110_v59 = vand.u32 2147483648, %v2096_v39  ;;  %v2108_v29 = vand.u32 2147483647, %v2096_v39  ;;  %vm2104_vm6 = vweird.f32 %v2096_v39 }
 0x7fb   :  { %2982 = vrcp.f32 %v2097_v5  ;;  %v2125_v42 = vand.u32 2147483648, %v2097_v5  ;;  %v2123_v22 = vand.u32 2147483647, %v2097_v5  ;;  %vm2119_vm7 = vweird.f32 %v2097_v5 }
 0x7fc   :  { %v2111_v23 = vor.u32 1.1754944e-38, %v2110_v59  ;;  %vm2109_vm10 = vcmp.eq.f32.partialorder %v2108_v29, 8.507059e+37 }
 0x7fd   :  { %vm2124_vm11 = vcmp.eq.f32.partialorder %v2123_v22, 8.507059e+37  ;;  %v5906_v22 = vld [vmem:[%s6121_s6 + $0x90] sm:$0xff] }
 0x7fe   :  { %v2979_v16 = vpop.eup %2978  ;;  %6708 = vst [vmem:[#allocation52_spill] sm:$0xff] %v5906_v22 }
 0x7ff   :  { %v2098_v24 = vadd.f32 1.0, %v2979_v16 }
 0x800   :  { %v2981_v51 = vpop.eup %2980 }
 0x801   :  { %v2983_v25 = vpop.eup %2982  ;;  %v2100_v8 = vmul.f32 %v2981_v51, %v2096_v39  ;;  %2984 = vrcp.f32 %v2098_v24  ;;  %vm2105_vm4 = vweird.f32 %v2981_v51  ;;  %v2140_v59 = vand.u32 2147483648, %v2098_v24 }
 0x802   :  { %v2115_v40 = vmul.f32 %v2983_v25, %v2097_v5  ;;  %2986 = vtanh.f32 %v2086_v12  ;;  %vm2120_vm5 = vweird.f32 %v2983_v25  ;;  %vm2106_vm8 = vmor %vm2104_vm6, %vm2105_vm4  ;;  %vm2134_vm13 = vweird.f32 %v2098_v24 }
 0x803   :  { %v2101_v32 = vsub.f32 1.0, %v2100_v8  ;;  %vm2121_vm9 = vmor %vm2119_vm7, %vm2120_vm5  ;;  %v2126_v8 = vor.u32 1.1754944e-38, %v2125_v42  ;;  %v2141_v29 = vor.u32 1.1754944e-38, %v2140_v59  ;;  %v5966_v59 = vld [vmem:[%s6121_s6 + $0x20] sm:$0xff] }
 0x804   :  { %v2116_v36 = vsub.f32 1.0, %v2115_v40  ;;  %6718 = vst [vmem:[#allocation9_spill] sm:$0xff] %v5966_v59 }
 0x805   :  { %v2102_v49 = vmul.f32 %v2981_v51, %v2101_v32 }
 0x806   :  { %v2117_v27 = vmul.f32 %v2983_v25, %v2116_v36 }
 0x807   :  { %v2985_v43 = vpop.eup %2984  ;;  %v2103_v16 = vadd.f32 %v2981_v51, %v2102_v49 }
 0x808   :  { %v2130_v15 = vmul.f32 %v2985_v43, %v2098_v24  ;;  %v2118_v3 = vadd.f32 %v2983_v25, %v2117_v27  ;;  %v2987_v12 = vpop.eup %2986  ;;  %vm2135_vm12 = vweird.f32 %v2985_v43  ;;  %v6707_v27 = vld [vmem:[#allocation51_spill] sm:$0xff] }
 0x809   :  { %v2107_v40 = vsel %vm2106_vm8, %v2981_v51, %v2103_v16  ;;  %v2138_v51 = vand.u32 2147483647, %v2098_v24  ;;  %vm2136_vm14 = vmor %vm2134_vm13, %vm2135_vm12  ;;  %v6705_v24 = vld [vmem:[#allocation50_spill] sm:$0xff]  ;;  %v5912_v16 = vld [vmem:[%s6121_s6 + $0x98] sm:$0xff] }
 0x80a   :  { %v2131_v58 = vsub.f32 1.0, %v2130_v15  ;;  %v2112_v32 = vsel %vm2109_vm10, %v2111_v23, %v2107_v40  ;;  %v2122_v35 = vsel %vm2121_vm9, %v2983_v25, %v2118_v3  ;;  %v6706_v25 = vld [vmem:[#allocation53_spill] sm:$0xff]  ;;  %6709 = vst [vmem:[#allocation54_spill] sm:$0xff] %v5912_v16  ;;  %v5918_v15 = vld [vmem:[%s6121_s6 + $0x60] sm:$0xff]  ;;  %v5930_v40 = vld [vmem:[%s6121_s6 + $0x70] sm:$0xff] }
 0x80b   :  { %v2127_v36 = vsel %vm2124_vm11, %v2126_v8, %v2122_v35  ;;  %v2146_v31 = vmul.f32 %v2987_v12, %v2112_v32  ;;  %vm2139_vm15 = vcmp.eq.f32.partialorder %v2138_v51, 8.507059e+37  ;;  %6710 = vst [vmem:[#allocation55_spill] sm:$0xff] %v5918_v15  ;;  %v5924_v8 = vld [vmem:[%s6121_s6 + $0x68] sm:$0xff]  ;;  %v5936_v12 = vld [vmem:[%s6121_s6 + $0x78] sm:$0xff]  ;;  %v5942_v32 = vld [vmem:[%s6121_s6 + $0x40] sm:$0xff] }
 0x80c   :  { %v2132_v28 = vmul.f32 %v2985_v43, %v2131_v58  ;;  %v2145_v49 = vmul.f32 %v2127_v36, %v5546_v17  ;;  %v6700_v58 = vld [vmem:[#allocation21_spill] sm:$0xff]  ;;  %v6702_v17 = vld [vmem:[#allocation38_spill] sm:$0xff]  ;;  %6711 = vst [vmem:[#allocation2_spill] sm:$0xff] %v5924_v8  ;;  %v5948_v36 = vld [vmem:[%s6121_s6 + $0x48] sm:$0xff] }
 0x80d   :  { %6712 = vst [vmem:[#allocation3_spill] sm:$0xff] %v5930_v40  ;;  %v5972_v51 = vld [vmem:[%s6121_s6 + $0x28] sm:$0xff] }
 0x80e   :  { %v5851_v39 = vadd.f32 %v2146_v31, %v2145_v49  ;;  %v2133_v5 = vadd.f32 %v2985_v43, %v2132_v28  ;;  %v6703_v28 = vld [vmem:[#allocation49_spill] sm:$0xff]  ;;  %v6704_v31 = vld [vmem:[#allocation47_spill] sm:$0xff]  ;;  %6713 = vst [vmem:[#allocation4_spill] sm:$0xff] %v5936_v12  ;;  %v5954_v49 = vld [vmem:[%s6121_s6 + $0x50] sm:$0xff] }
 0x80f   :  { %6714 = vst [vmem:[#allocation10_spill] sm:$0xff] %v5942_v32 }
 0x810   :  { %2988 = vtanh.f32 %v5851_v39  ;;  %v2137_v42 = vsel %vm2136_vm14, %v2985_v43, %v2133_v5  ;;  %v6701_v43 = vld [vmem:[#allocation46_spill] sm:$0xff]  ;;  %6715 = vst [vmem:[#allocation5_spill] sm:$0xff] %v5948_v36  ;;  %v5960_v5 = vld [vmem:[%s6121_s6 + $0x58] sm:$0xff] }
 0x811   :  { %v2142_v23 = vsel %vm2139_vm15, %v2141_v29, %v2137_v42  ;;  %6716 = vst [vmem:[#allocation7_spill] sm:$0xff] %v5954_v49  ;;  %v5978_v42 = vld [vmem:[%s6121_s6 + $0x30] sm:$0xff]  ;;  %v5984_v29 = vld [vmem:[%s6121_s6 + $0x38] sm:$0xff] }
 0x812   :  { %6717 = vst [vmem:[#allocation8_spill] sm:$0xff] %v5960_v5 }
 0x813   :  { %6719 = vst [vmem:[#allocation11_spill] sm:$0xff] %v5972_v51 }
 0x814   :  { %6720 = vst [vmem:[#allocation42_spill] sm:$0xff] %v5978_v42 }
 0x815   :  { %6721 = vst [vmem:[#allocation45_spill] sm:$0xff] %v5984_v29 }
 0x816   :  { %v2989_v3 = vpop.eup %2988 }
 0x817   :  { %v2149_v35 = vmul.f32 %v2989_v3, %v2142_v23  ;;  %v5990_v3 = vld [vmem:[%s6121_s6] sm:$0xff]  ;;  %v5996_v23 = vld [vmem:[%s6121_s6 + $0x8] sm:$0xff] }
 0x818   :  { %6722 = vst [vmem:[#allocation6_spill] sm:$0xff] %v5990_v3 }
 0x819   :  { %2166 = vmatmul.f32.vlgmr.msra.gmra.mxu0 %v2149_v35  ;;  %2741 = vst [vmem:[%s6123_s7 + $0x18] sm:$0xff] %v2149_v35  ;;  %2186 = vmatmul.f32.vlgmr.msra.gmra.mxu1 %v2149_v35 }
 0x81a   :  { %2206 = vmatmul.f32.vlgmr.msra.gmra.mxu2 %v2149_v35  ;;  %2226 = vmatmul.f32.vlgmr.msra.gmra.mxu3 %v2149_v35  ;;  %6723 = vst [vmem:[#allocation12_spill] sm:$0xff] %v5996_v23  ;;  %v6002_v35 = vld [vmem:[%s6121_s6 + $0x10] sm:$0xff] }
 0x81b   :  { %2444 = vmatpush.msra.mxu0 %v5555_v20  ;;  %2464 = vmatpush.msra.mxu1 %v5561_v50  ;;  %6724 = vst [vmem:[#allocation20_spill] sm:$0xff] %v6002_v35 }
 0x81c   :  { %2484 = vmatpush.msra.mxu2 %v5567_v11  ;;  %2504 = vmatpush.msra.mxu3 %v5573_v63 }
 0x81d   :  { %2445 = vmatpush.msra.mxu0 %v5579_v2  ;;  %2465 = vmatpush.msra.mxu1 %v5585_v19 }
 0x81e   :  { %2485 = vmatpush.msra.mxu2 %v5591_v57  ;;  %2505 = vmatpush.msra.mxu3 %v5597_v60 }
 0x81f   :  { %2446 = vmatpush.msra.mxu0 %v5603_v48  ;;  %2466 = vmatpush.msra.mxu1 %v5609_v38 }
 0x820   :  { %2486 = vmatpush.msra.mxu2 %v5615_v30  ;;  %2506 = vmatpush.msra.mxu3 %v5621_v41 }
 0x821   :  { %2447 = vmatpush.msra.mxu0 %v5627_v33  ;;  %2467 = vmatpush.msra.mxu1 %v5633_v55 }
 0x822   :  { %2487 = vmatpush.msra.mxu2 %v5639_v26  ;;  %2507 = vmatpush.msra.mxu3 %v5645_v18 }
 0x823   :  { %2448 = vmatpush.msra.mxu0 %v5651_v53  ;;  %2468 = vmatpush.msra.mxu1 %v5657_v0 }
 0x824   :  { %2488 = vmatpush.msra.mxu2 %v5663_v4  ;;  %2508 = vmatpush.msra.mxu3 %v5669_v47 }
 0x825   :  { %2449 = vmatpush.msra.mxu0 %v5675_v52  ;;  %2469 = vmatpush.msra.mxu1 %v5681_v54 }
 0x826   :  { %2489 = vmatpush.msra.mxu2 %v5687_v56  ;;  %2509 = vmatpush.msra.mxu3 %v5693_v1 }
 0x827   :  { %2450 = vmatpush.msra.mxu0 %v5699_v6  ;;  %2470 = vmatpush.msra.mxu1 %v5705_v7 }
 0x828   :  { %2490 = vmatpush.msra.mxu2 %v5711_v13  ;;  %2510 = vmatpush.msra.mxu3 %v5717_v21 }
 0x829   :  { %2451 = vmatpush.msra.mxu0 %v5723_v44  ;;  %2471 = vmatpush.msra.mxu1 %v5729_v37 }
 0x82a   :  { %2491 = vmatpush.msra.mxu2 %v5735_v34  ;;  %2511 = vmatpush.msra.mxu3 %v5741_v9 }
 0x82b   :  { %2452 = vmatpush.msra.mxu0 %v5747_v10  ;;  %2472 = vmatpush.msra.mxu1 %v5753_v62 }
 0x82c   :  { %2492 = vmatpush.msra.mxu2 %v5759_v14  ;;  %2512 = vmatpush.msra.mxu3 %v5765_v46 }
 0x82d   :  { %2453 = vmatpush.msra.mxu0 %v5771_v61  ;;  %2473 = vmatpush.msra.mxu1 %v6700_v58 }
 0x82e   :  { %2493 = vmatpush.msra.mxu2 %v6701_v43  ;;  %2513 = vmatpush.msra.mxu3 %v6702_v17 }
 0x82f   :  { %2454 = vmatpush.msra.mxu0 %v6703_v28  ;;  %2474 = vmatpush.msra.mxu1 %v6704_v31 }
 0x830   :  { %2494 = vmatpush.msra.mxu2 %v5807_v45  ;;  %2514 = vmatpush.msra.mxu3 %v6705_v24 }
 0x831   :  { %2455 = vmatpush.msra.mxu0 %v6706_v25  ;;  %2475 = vmatpush.msra.mxu1 %v6707_v27 }
 0x832   :  { %2495 = vmatpush.msra.mxu2 %v5906_v22  ;;  %2515 = vmatpush.msra.mxu3 %v5912_v16 }
 0x833   :  { %2456 = vmatpush.msra.mxu0 %v5918_v15  ;;  %2476 = vmatpush.msra.mxu1 %v5924_v8 }
 0x834   :  { %2496 = vmatpush.msra.mxu2 %v5930_v40  ;;  %2516 = vmatpush.msra.mxu3 %v5936_v12  ;;  %v6728_v12 = vld [vmem:[#allocation36_spill] sm:$0xff] }
 0x835   :  { %2457 = vmatpush.msra.mxu0 %v5942_v32  ;;  %2477 = vmatpush.msra.mxu1 %v5948_v36 }
 0x836   :  { %2497 = vmatpush.msra.mxu2 %v5954_v49  ;;  %2517 = vmatpush.msra.mxu3 %v5960_v5  ;;  %v6727_v5 = vld [vmem:[#allocation19_spill] sm:$0xff] }
 0x837   :  { %2458 = vmatpush.msra.mxu0 %v5966_v59  ;;  %2478 = vmatpush.msra.mxu1 %v5972_v51  ;;  %v6726_v51 = vld [vmem:[#allocation18_spill] sm:$0xff] }
 0x838   :  { %2498 = vmatpush.msra.mxu2 %v5978_v42  ;;  %2518 = vmatpush.msra.mxu3 %v5984_v29  ;;  %v6008_v29 = vld [vmem:[%s6121_s6 + $0x18] sm:$0xff] }
 0x839   :  { %2459 = vmatpush.msra.mxu0 %v5990_v3  ;;  %2479 = vmatpush.msra.mxu1 %v5996_v23  ;;  %6725 = vst [vmem:[#allocation15_spill] sm:$0xff] %v6008_v29 }
 0x83a   :  { %2499 = vmatpush.msra.mxu2 %v6002_v35  ;;  %2519 = vmatpush.msra.mxu3 %v6008_v29 }
 0x896   :  { %v2167_v3 = vpop.f32.mrf.mxu0  ;;  %v2187_v42 = vpop.f32.mrf.mxu1 }
 0x897   :  { %v2230_v59 = vadd.f32 %v2167_v3, %v6726_v51  ;;  %v2231_v23 = vadd.f32 %v2187_v42, %v6727_v5  ;;  %v6729_v42 = vld [vmem:[#allocation44_spill] sm:$0xff] }
 0x899   :  { %v2786_v49 = vmul.f32 -1.442695, %v2230_v59  ;;  %v2787_v36 = vmul.f32 -1.442695, %v2231_v23 }
 0x89b   :  { %2990 = vpow2.f32 %v2786_v49 }
 0x89c   :  { %2992 = vpow2.f32 %v2787_v36 }
 0x89d   :  { %v2207_v32 = vpop.f32.mrf.mxu2  ;;  %v2227_v29 = vpop.f32.mrf.mxu3 }
 0x89e   :  { %v2232_v35 = vadd.f32 %v2207_v32, %v6728_v12  ;;  %v2233_v59 = vadd.f32 %v2227_v29, %v6729_v42 }
 0x8a0   :  { %v2788_v40 = vmul.f32 -1.442695, %v2232_v35 }
 0x8a1   :  { %v2991_v8 = vpop.eup %2990 }
 0x8a2   :  { %v2993_v15 = vpop.eup %2992  ;;  %v2243_v16 = vadd.f32 1.0, %v2991_v8  ;;  %2994 = vpow2.f32 %v2788_v40 }
 0x8a3   :  { %v2244_v22 = vadd.f32 1.0, %v2993_v15 }
 0x8a4   :  { %2996 = vrcp.f32 %v2243_v16  ;;  %v2257_v35 = vand.u32 2147483648, %v2243_v16  ;;  %v2255_v15 = vand.u32 2147483647, %v2243_v16  ;;  %vm2251_vm2 = vweird.f32 %v2243_v16 }
 0x8a5   :  { %2998 = vrcp.f32 %v2244_v22  ;;  %v2272_v12 = vand.u32 2147483648, %v2244_v22  ;;  %v2270_v25 = vand.u32 2147483647, %v2244_v22  ;;  %vm2266_vm3 = vweird.f32 %v2244_v22 }
 0x8a6   :  { %v2258_v42 = vor.u32 1.1754944e-38, %v2257_v35  ;;  %vm2256_vm6 = vcmp.eq.f32.partialorder %v2255_v15, 8.507059e+37 }
 0x8a7   :  { %vm2271_vm7 = vcmp.eq.f32.partialorder %v2270_v25, 8.507059e+37 }
 0x8a8   :  { %v2995_v27 = vpop.eup %2994 }
 0x8a9   :  { %v2245_v3 = vadd.f32 1.0, %v2995_v27 }
 0x8aa   :  { %v2997_v51 = vpop.eup %2996 }
 0x8ab   :  { %v2999_v23 = vpop.eup %2998  ;;  %v2247_v49 = vmul.f32 %v2997_v51, %v2243_v16  ;;  %3000 = vrcp.f32 %v2245_v3  ;;  %vm2252_vm0 = vweird.f32 %v2997_v51  ;;  %v2287_v35 = vand.u32 2147483648, %v2245_v3 }
 0x8ac   :  { %v2262_v36 = vmul.f32 %v2999_v23, %v2244_v22  ;;  %3002 = vtanh.f32 %v2233_v59  ;;  %vm2267_vm1 = vweird.f32 %v2999_v23  ;;  %vm2253_vm4 = vmor %vm2251_vm2, %vm2252_vm0  ;;  %vm2281_vm9 = vweird.f32 %v2245_v3 }
 0x8ad   :  { %v2248_v5 = vsub.f32 1.0, %v2247_v49  ;;  %vm2268_vm5 = vmor %vm2266_vm3, %vm2267_vm1  ;;  %v2273_v49 = vor.u32 1.1754944e-38, %v2272_v12  ;;  %v2285_v12 = vand.u32 2147483647, %v2245_v3  ;;  %v2288_v15 = vor.u32 1.1754944e-38, %v2287_v35 }
 0x8ae   :  { %v2263_v32 = vsub.f32 1.0, %v2262_v36 }
 0x8af   :  { %v2249_v8 = vmul.f32 %v2997_v51, %v2248_v5  ;;  %vm2286_vm11 = vcmp.eq.f32.partialorder %v2285_v12, 8.507059e+37 }
 0x8b0   :  { %v2264_v40 = vmul.f32 %v2999_v23, %v2263_v32 }
 0x8b1   :  { %v3001_v24 = vpop.eup %3000  ;;  %v2250_v27 = vadd.f32 %v2997_v51, %v2249_v8 }
 0x8b2   :  { %v2277_v29 = vmul.f32 %v3001_v24, %v2245_v3  ;;  %v2265_v45 = vadd.f32 %v2999_v23, %v2264_v40  ;;  %v3003_v59 = vpop.eup %3002  ;;  %vm2282_vm8 = vweird.f32 %v3001_v24  ;;  %v6759_v40 = vld [vmem:[#allocation44_spill] sm:$0xff] }
 0x8b3   :  { %v2254_v36 = vsel %vm2253_vm4, %v2997_v51, %v2250_v27  ;;  %vm2283_vm10 = vmor %vm2281_vm9, %vm2282_vm8 }
 0x8b4   :  { %v2278_v31 = vsub.f32 1.0, %v2277_v29  ;;  %v2259_v5 = vsel %vm2256_vm6, %v2258_v42, %v2254_v36  ;;  %v2269_v28 = vsel %vm2268_vm5, %v2999_v23, %v2265_v45 }
 0x8b5   :  { %v2274_v32 = vsel %vm2271_vm7, %v2273_v49, %v2269_v28  ;;  %v2293_v17 = vmul.f32 %v3003_v59, %v2259_v5 }
 0x8b6   :  { %v2279_v43 = vmul.f32 %v3001_v24, %v2278_v31  ;;  %v2292_v8 = vmul.f32 %v2274_v32, %v5851_v39 }
 0x8b8   :  { %v6016_v16 = vadd.f32 %v2293_v17, %v2292_v8  ;;  %v2280_v22 = vadd.f32 %v3001_v24, %v2279_v43 }
 0x8ba   :  { %3004 = vtanh.f32 %v6016_v16  ;;  %v2284_v51 = vsel %vm2283_vm10, %v3001_v24, %v2280_v22 }
 0x8bb   :  { %v2289_v25 = vsel %vm2286_vm11, %v2288_v15, %v2284_v51 }
 0x8c0   :  { %v3005_v45 = vpop.eup %3004 }
 0x8c1   :  { %v2296_v28 = vmul.f32 %v3005_v45, %v2289_v25 }
 0x8c3   :  { %2313 = vmatmul.f32.vlgmr.msrb.gmra.mxu0 %v2296_v28  ;;  %2742 = vst [vmem:[%s6123_s7 + $0x20] sm:$0xff] %v2296_v28  ;;  %2333 = vmatmul.f32.vlgmr.msrb.gmra.mxu1 %v2296_v28 }
 0x8c4   :  { %2353 = vmatmul.f32.vlgmr.msrb.gmra.mxu2 %v2296_v28  ;;  %2373 = vmatmul.f32.vlgmr.msrb.gmra.mxu3 %v2296_v28 }
 0x8c5   :  { %2591 = vmatpush.msrb.mxu0 %v5555_v20  ;;  %2611 = vmatpush.msrb.mxu1 %v5561_v50  ;;  %v6730_v20 = vld [vmem:[#allocation46_spill] sm:$0xff] }
 0x8c6   :  { %2631 = vmatpush.msrb.mxu2 %v5567_v11  ;;  %2651 = vmatpush.msrb.mxu3 %v5573_v63  ;;  %v6731_v50 = vld [vmem:[#allocation38_spill] sm:$0xff]  ;;  %v6732_v11 = vld [vmem:[#allocation49_spill] sm:$0xff]  ;;  %v6733_v63 = vld [vmem:[#allocation47_spill] sm:$0xff] }
 0x8c7   :  { %2592 = vmatpush.msrb.mxu0 %v5579_v2  ;;  %2612 = vmatpush.msrb.mxu1 %v5585_v19  ;;  %v6734_v2 = vld [vmem:[#allocation48_spill] sm:$0xff]  ;;  %v6735_v19 = vld [vmem:[#allocation50_spill] sm:$0xff] }
 0x8c8   :  { %2632 = vmatpush.msrb.mxu2 %v5591_v57  ;;  %2652 = vmatpush.msrb.mxu3 %v5597_v60  ;;  %v6736_v57 = vld [vmem:[#allocation53_spill] sm:$0xff]  ;;  %v6737_v60 = vld [vmem:[#allocation51_spill] sm:$0xff] }
 0x8c9   :  { %2593 = vmatpush.msrb.mxu0 %v5603_v48  ;;  %2613 = vmatpush.msrb.mxu1 %v5609_v38  ;;  %v6738_v48 = vld [vmem:[#allocation52_spill] sm:$0xff]  ;;  %v6739_v38 = vld [vmem:[#allocation54_spill] sm:$0xff] }
 0x8ca   :  { %2633 = vmatpush.msrb.mxu2 %v5615_v30  ;;  %2653 = vmatpush.msrb.mxu3 %v5621_v41  ;;  %v6740_v30 = vld [vmem:[#allocation55_spill] sm:$0xff]  ;;  %v6741_v41 = vld [vmem:[#allocation2_spill] sm:$0xff] }
 0x8cb   :  { %2594 = vmatpush.msrb.mxu0 %v5627_v33  ;;  %2614 = vmatpush.msrb.mxu1 %v5633_v55  ;;  %v6742_v33 = vld [vmem:[#allocation3_spill] sm:$0xff]  ;;  %v6743_v55 = vld [vmem:[#allocation4_spill] sm:$0xff] }
 0x8cc   :  { %2634 = vmatpush.msrb.mxu2 %v5639_v26  ;;  %2654 = vmatpush.msrb.mxu3 %v5645_v18  ;;  %v6744_v26 = vld [vmem:[#allocation10_spill] sm:$0xff]  ;;  %v6745_v18 = vld [vmem:[#allocation5_spill] sm:$0xff] }
 0x8cd   :  { %2595 = vmatpush.msrb.mxu0 %v5651_v53  ;;  %2615 = vmatpush.msrb.mxu1 %v5657_v0  ;;  %v6746_v53 = vld [vmem:[#allocation7_spill] sm:$0xff]  ;;  %v6747_v0 = vld [vmem:[#allocation8_spill] sm:$0xff] }
 0x8ce   :  { %2635 = vmatpush.msrb.mxu2 %v5663_v4  ;;  %2655 = vmatpush.msrb.mxu3 %v5669_v47  ;;  %v6748_v4 = vld [vmem:[#allocation9_spill] sm:$0xff]  ;;  %v6749_v47 = vld [vmem:[#allocation11_spill] sm:$0xff] }
 0x8cf   :  { %2596 = vmatpush.msrb.mxu0 %v5675_v52  ;;  %2616 = vmatpush.msrb.mxu1 %v5681_v54  ;;  %v6750_v52 = vld [vmem:[#allocation42_spill] sm:$0xff]  ;;  %v6751_v54 = vld [vmem:[#allocation45_spill] sm:$0xff] }
 0x8d0   :  { %2636 = vmatpush.msrb.mxu2 %v5687_v56  ;;  %2656 = vmatpush.msrb.mxu3 %v5693_v1  ;;  %v6752_v56 = vld [vmem:[#allocation6_spill] sm:$0xff]  ;;  %v6753_v1 = vld [vmem:[#allocation12_spill] sm:$0xff] }
 0x8d1   :  { %2597 = vmatpush.msrb.mxu0 %v5699_v6  ;;  %2617 = vmatpush.msrb.mxu1 %v5705_v7  ;;  %v6754_v6 = vld [vmem:[#allocation20_spill] sm:$0xff]  ;;  %v6755_v7 = vld [vmem:[#allocation15_spill] sm:$0xff] }
 0x8d2   :  { %2637 = vmatpush.msrb.mxu2 %v5711_v13  ;;  %2657 = vmatpush.msrb.mxu3 %v5717_v21 }
 0x8d3   :  { %2598 = vmatpush.msrb.mxu0 %v5723_v44  ;;  %2618 = vmatpush.msrb.mxu1 %v5729_v37  ;;  %v6756_v44 = vld [vmem:[#allocation18_spill] sm:$0xff] }
 0x8d4   :  { %2638 = vmatpush.msrb.mxu2 %v5735_v34  ;;  %2658 = vmatpush.msrb.mxu3 %v5741_v9  ;;  %v6757_v34 = vld [vmem:[#allocation19_spill] sm:$0xff] }
 0x8d5   :  { %2599 = vmatpush.msrb.mxu0 %v5747_v10  ;;  %2619 = vmatpush.msrb.mxu1 %v5753_v62 }
 0x8d6   :  { %2639 = vmatpush.msrb.mxu2 %v5759_v14  ;;  %2659 = vmatpush.msrb.mxu3 %v5765_v46  ;;  %v6758_v46 = vld [vmem:[#allocation36_spill] sm:$0xff] }
 0x8d7   :  { %2600 = vmatpush.msrb.mxu0 %v5771_v61  ;;  %2620 = vmatpush.msrb.mxu1 %v6700_v58 }
 0x8d8   :  { %2640 = vmatpush.msrb.mxu2 %v6730_v20  ;;  %2660 = vmatpush.msrb.mxu3 %v6731_v50 }
 0x8d9   :  { %2601 = vmatpush.msrb.mxu0 %v6732_v11  ;;  %2621 = vmatpush.msrb.mxu1 %v6733_v63 }
 0x8da   :  { %2641 = vmatpush.msrb.mxu2 %v6734_v2  ;;  %2661 = vmatpush.msrb.mxu3 %v6735_v19 }
 0x8db   :  { %2602 = vmatpush.msrb.mxu0 %v6736_v57  ;;  %2622 = vmatpush.msrb.mxu1 %v6737_v60 }
 0x8dc   :  { %2642 = vmatpush.msrb.mxu2 %v6738_v48  ;;  %2662 = vmatpush.msrb.mxu3 %v6739_v38 }
 0x8dd   :  { %2603 = vmatpush.msrb.mxu0 %v6740_v30  ;;  %2623 = vmatpush.msrb.mxu1 %v6741_v41 }
 0x8de   :  { %2643 = vmatpush.msrb.mxu2 %v6742_v33  ;;  %2663 = vmatpush.msrb.mxu3 %v6743_v55 }
 0x8df   :  { %2604 = vmatpush.msrb.mxu0 %v6744_v26  ;;  %2624 = vmatpush.msrb.mxu1 %v6745_v18 }
 0x8e0   :  { %2644 = vmatpush.msrb.mxu2 %v6746_v53  ;;  %2664 = vmatpush.msrb.mxu3 %v6747_v0 }
 0x8e1   :  { %2605 = vmatpush.msrb.mxu0 %v6748_v4  ;;  %2625 = vmatpush.msrb.mxu1 %v6749_v47 }
 0x8e2   :  { %2645 = vmatpush.msrb.mxu2 %v6750_v52  ;;  %2665 = vmatpush.msrb.mxu3 %v6751_v54 }
 0x8e3   :  { %2606 = vmatpush.msrb.mxu0 %v6752_v56  ;;  %2626 = vmatpush.msrb.mxu1 %v6753_v1 }
 0x8e4   :  { %2646 = vmatpush.msrb.mxu2 %v6754_v6  ;;  %2666 = vmatpush.msrb.mxu3 %v6755_v7 }
 0x940   :  { %v2314_v13 = vpop.f32.mrf.mxu0  ;;  %v2334_v21 = vpop.f32.mrf.mxu1 }
 0x941   :  { %v2377_v37 = vadd.f32 %v2314_v13, %v6756_v44  ;;  %v2378_v9 = vadd.f32 %v2334_v21, %v6757_v34 }
 0x943   :  { %v2789_v10 = vmul.f32 -1.442695, %v2377_v37  ;;  %v2790_v62 = vmul.f32 -1.442695, %v2378_v9 }
 0x945   :  { %3006 = vpow2.f32 %v2789_v10 }
 0x946   :  { %3008 = vpow2.f32 %v2790_v62 }
 0x947   :  { %v2354_v14 = vpop.f32.mrf.mxu2  ;;  %v2374_v24 = vpop.f32.mrf.mxu3 }
 0x948   :  { %v2379_v61 = vadd.f32 %v2354_v14, %v6758_v46  ;;  %v2380_v27 = vadd.f32 %v2374_v24, %v6759_v40 }
 0x94a   :  { %v2791_v39 = vmul.f32 -1.442695, %v2379_v61 }
 0x94b   :  { %v3007_v58 = vpop.eup %3006 }
 0x94c   :  { %v3009_v43 = vpop.eup %3008  ;;  %v2390_v17 = vadd.f32 1.0, %v3007_v58  ;;  %3010 = vpow2.f32 %v2791_v39 }
 0x94d   :  { %v2391_v31 = vadd.f32 1.0, %v3009_v43 }
 0x94e   :  { %3012 = vrcp.f32 %v2390_v17  ;;  %v2404_v32 = vand.u32 2147483648, %v2390_v17  ;;  %v2402_v35 = vand.u32 2147483647, %v2390_v17  ;;  %vm2398_vm14 = vweird.f32 %v2390_v17 }
 0x94f   :  { %3014 = vrcp.f32 %v2391_v31  ;;  %v2419_v8 = vand.u32 2147483648, %v2391_v31  ;;  %v2417_v51 = vand.u32 2147483647, %v2391_v31  ;;  %vm2413_vm15 = vweird.f32 %v2391_v31 }
 0x950   :  { %v2405_v28 = vor.u32 1.1754944e-38, %v2404_v32  ;;  %vm2403_vm2 = vcmp.eq.f32.partialorder %v2402_v35, 8.507059e+37 }
 0x951   :  { %v2420_v50 = vor.u32 1.1754944e-38, %v2419_v8  ;;  %vm2418_vm3 = vcmp.eq.f32.partialorder %v2417_v51, 8.507059e+37 }
 0x952   :  { %v3011_v3 = vpop.eup %3010 }
 0x953   :  { %v2392_v42 = vadd.f32 1.0, %v3011_v3 }
 0x954   :  { %v3013_v23 = vpop.eup %3012 }
 0x955   :  { %v3015_v29 = vpop.eup %3014  ;;  %v2394_v49 = vmul.f32 %v3013_v23, %v2390_v17  ;;  %3016 = vrcp.f32 %v2392_v42  ;;  %vm2399_vm12 = vweird.f32 %v3013_v23  ;;  %v2434_v55 = vand.u32 2147483648, %v2392_v42 }
 0x956   :  { %v2409_v36 = vmul.f32 %v3015_v29, %v2391_v31  ;;  %3018 = vtanh.f32 %v2380_v27  ;;  %vm2414_vm13 = vweird.f32 %v3015_v29  ;;  %vm2400_vm0 = vmor %vm2398_vm14, %vm2399_vm12  ;;  %vm2428_vm5 = vweird.f32 %v2392_v42 }
 0x957   :  { %v2395_v59 = vsub.f32 1.0, %v2394_v49  ;;  %vm2415_vm1 = vmor %vm2413_vm15, %vm2414_vm13  ;;  %v2432_v26 = vand.u32 2147483647, %v2392_v42  ;;  %v2435_v53 = vor.u32 1.1754944e-38, %v2434_v55 }
 0x958   :  { %v2410_v5 = vsub.f32 1.0, %v2409_v36 }
 0x959   :  { %v2396_v22 = vmul.f32 %v3013_v23, %v2395_v59  ;;  %vm2433_vm7 = vcmp.eq.f32.partialorder %v2432_v26, 8.507059e+37 }
 0x95a   :  { %v2411_v12 = vmul.f32 %v3015_v29, %v2410_v5 }
 0x95b   :  { %v3017_v15 = vpop.eup %3016  ;;  %v2397_v45 = vadd.f32 %v3013_v23, %v2396_v22 }
 0x95c   :  { %v2424_v25 = vmul.f32 %v3017_v15, %v2392_v42  ;;  %v2412_v20 = vadd.f32 %v3015_v29, %v2411_v12  ;;  %v3019_v63 = vpop.eup %3018  ;;  %vm2429_vm4 = vweird.f32 %v3017_v15 }
 0x95d   :  { %v2401_v11 = vsel %vm2400_vm0, %v3013_v23, %v2397_v45  ;;  %vm2430_vm6 = vmor %vm2428_vm5, %vm2429_vm4 }
 0x95e   :  { %v2425_v2 = vsub.f32 1.0, %v2424_v25  ;;  %v2406_v19 = vsel %vm2403_vm2, %v2405_v28, %v2401_v11  ;;  %v2416_v57 = vsel %vm2415_vm1, %v3015_v29, %v2412_v20 }
 0x95f   :  { %v2421_v60 = vsel %vm2418_vm3, %v2420_v50, %v2416_v57  ;;  %v2440_v48 = vmul.f32 %v3019_v63, %v2406_v19 }
 0x960   :  { %v2426_v38 = vmul.f32 %v3017_v15, %v2425_v2  ;;  %v2439_v30 = vmul.f32 %v2421_v60, %v6016_v16 }
 0x962   :  { %v6091_v41 = vadd.f32 %v2440_v48, %v2439_v30  ;;  %v2427_v33 = vadd.f32 %v3017_v15, %v2426_v38 }
 0x964   :  { %3020 = vtanh.f32 %v6091_v41  ;;  %v2431_v18 = vsel %vm2430_vm6, %v3017_v15, %v2427_v33 }
 0x965   :  { %v2436_v4 = vsel %vm2433_vm7, %v2435_v53, %v2431_v18 }
 0x96a   :  { %v3021_v0 = vpop.eup %3020 }
 0x96b   :  { %v2443_v47 = vmul.f32 %v3021_v0, %v2436_v4 }
 0x96d   :  { %2460 = vmatmul.f32.vlgmr.msra.gmra.mxu0 %v2443_v47  ;;  %2743 = vst [vmem:[%s6123_s7 + $0x28] sm:$0xff] %v2443_v47  ;;  %2480 = vmatmul.f32.vlgmr.msra.gmra.mxu1 %v2443_v47 }
 0x96e   :  { %2500 = vmatmul.f32.vlgmr.msra.gmra.mxu2 %v2443_v47  ;;  %2520 = vmatmul.f32.vlgmr.msra.gmra.mxu3 %v2443_v47 }
 0x9ea   :  { %v2461_v16 = vpop.f32.mrf.mxu0  ;;  %v2481_v52 = vpop.f32.mrf.mxu1 }
 0x9eb   :  { %v2524_v54 = vadd.f32 %v2461_v16, %v6756_v44  ;;  %v2525_v56 = vadd.f32 %v2481_v52, %v6757_v34 }
 0x9ed   :  { %v2792_v1 = vmul.f32 -1.442695, %v2524_v54  ;;  %v2793_v6 = vmul.f32 -1.442695, %v2525_v56 }
 0x9ef   :  { %3022 = vpow2.f32 %v2792_v1 }
 0x9f0   :  { %3024 = vpow2.f32 %v2793_v6 }
 0x9f1   :  { %v2501_v7 = vpop.f32.mrf.mxu2  ;;  %v2521_v14 = vpop.f32.mrf.mxu3 }
 0x9f2   :  { %v2526_v13 = vadd.f32 %v2501_v7, %v6758_v46  ;;  %v2527_v43 = vadd.f32 %v2521_v14, %v6759_v40 }
 0x9f4   :  { %v2794_v21 = vmul.f32 -1.442695, %v2526_v13 }
 0x9f5   :  { %v3023_v37 = vpop.eup %3022 }
 0x9f6   :  { %v3025_v9 = vpop.eup %3024  ;;  %v2537_v10 = vadd.f32 1.0, %v3023_v37  ;;  %3026 = vpow2.f32 %v2794_v21 }
 0x9f7   :  { %v2538_v62 = vadd.f32 1.0, %v3025_v9 }
 0x9f8   :  { %3028 = vrcp.f32 %v2537_v10  ;;  %v2551_v23 = vand.u32 2147483648, %v2537_v10  ;;  %v2549_v49 = vand.u32 2147483647, %v2537_v10  ;;  %vm2545_vm10 = vweird.f32 %v2537_v10 }
 0x9f9   :  { %3030 = vrcp.f32 %v2538_v62  ;;  %v2566_v27 = vand.u32 2147483648, %v2538_v62  ;;  %v2564_v59 = vand.u32 2147483647, %v2538_v62  ;;  %vm2560_vm11 = vweird.f32 %v2538_v62 }
 0x9fa   :  { %v2552_v22 = vor.u32 1.1754944e-38, %v2551_v23  ;;  %vm2550_vm14 = vcmp.eq.f32.partialorder %v2549_v49, 8.507059e+37 }
 0x9fb   :  { %v2567_v12 = vor.u32 1.1754944e-38, %v2566_v27  ;;  %vm2565_vm15 = vcmp.eq.f32.partialorder %v2564_v59, 8.507059e+37 }
 0x9fc   :  { %v3027_v61 = vpop.eup %3026 }
 0x9fd   :  { %v2539_v39 = vadd.f32 1.0, %v3027_v61 }
 0x9fe   :  { %v3029_v58 = vpop.eup %3028 }
 0x9ff   :  { %v3031_v17 = vpop.eup %3030  ;;  %v2541_v31 = vmul.f32 %v3029_v58, %v2537_v10  ;;  %3032 = vrcp.f32 %v2539_v39  ;;  %vm2546_vm8 = vweird.f32 %v3029_v58  ;;  %v2581_v57 = vand.u32 2147483648, %v2539_v39 }
 0xa00   :  { %v2556_v24 = vmul.f32 %v3031_v17, %v2538_v62  ;;  %3034 = vtanh.f32 %v2527_v43  ;;  %vm2561_vm9 = vweird.f32 %v3031_v17  ;;  %vm2547_vm12 = vmor %vm2545_vm10, %vm2546_vm8  ;;  %vm2575_vm1 = vweird.f32 %v2539_v39 }
 0xa01   :  { %v2542_v3 = vsub.f32 1.0, %v2541_v31  ;;  %vm2562_vm13 = vmor %vm2560_vm11, %vm2561_vm9  ;;  %v2579_v60 = vand.u32 2147483647, %v2539_v39  ;;  %v2582_v38 = vor.u32 1.1754944e-38, %v2581_v57 }
 0xa02   :  { %v2557_v42 = vsub.f32 1.0, %v2556_v24 }
 0xa03   :  { %v2543_v29 = vmul.f32 %v3029_v58, %v2542_v3  ;;  %vm2580_vm3 = vcmp.eq.f32.partialorder %v2579_v60, 8.507059e+37 }
 0xa04   :  { %v2558_v36 = vmul.f32 %v3031_v17, %v2557_v42 }
 0xa05   :  { %v3033_v5 = vpop.eup %3032  ;;  %v2544_v32 = vadd.f32 %v3029_v58, %v2543_v29 }
 0xa06   :  { %v2571_v8 = vmul.f32 %v3033_v5, %v2539_v39  ;;  %v2559_v35 = vadd.f32 %v3031_v17, %v2558_v36  ;;  %v3035_v15 = vpop.eup %3034  ;;  %vm2576_vm0 = vweird.f32 %v3033_v5 }
 0xa07   :  { %v2548_v51 = vsel %vm2547_vm12, %v3029_v58, %v2544_v32  ;;  %vm2577_vm2 = vmor %vm2575_vm1, %vm2576_vm0 }
 0xa08   :  { %v2572_v45 = vsub.f32 1.0, %v2571_v8  ;;  %v2553_v25 = vsel %vm2550_vm14, %v2552_v22, %v2548_v51  ;;  %v2563_v28 = vsel %vm2562_vm13, %v3031_v17, %v2559_v35 }
 0xa09   :  { %v2568_v20 = vsel %vm2565_vm15, %v2567_v12, %v2563_v28  ;;  %v2587_v50 = vmul.f32 %v3035_v15, %v2553_v25 }
 0xa0a   :  { %v2573_v11 = vmul.f32 %v3033_v5, %v2572_v45  ;;  %v2586_v63 = vmul.f32 %v2568_v20, %v6091_v41 }
 0xa0c   :  { %v6102_v2 = vadd.f32 %v2587_v50, %v2586_v63  ;;  %v2574_v19 = vadd.f32 %v3033_v5, %v2573_v11 }
 0xa0e   :  { %3036 = vtanh.f32 %v6102_v2  ;;  %v2578_v48 = vsel %vm2577_vm2, %v3033_v5, %v2574_v19 }
 0xa0f   :  { %v2583_v33 = vsel %vm2580_vm3, %v2582_v38, %v2578_v48 }
 0xa14   :  { %v3037_v30 = vpop.eup %3036 }
 0xa15   :  { %v2590_v55 = vmul.f32 %v3037_v30, %v2583_v33 }
 0xa17   :  { %2607 = vmatmul.f32.vlgmr.msrb.gmra.mxu0 %v2590_v55  ;;  %2744 = vst [vmem:[%s6123_s7 + $0x30] sm:$0xff] %v2590_v55  ;;  %2627 = vmatmul.f32.vlgmr.msrb.gmra.mxu1 %v2590_v55 }
 0xa18   :  { %2647 = vmatmul.f32.vlgmr.msrb.gmra.mxu2 %v2590_v55  ;;  %2667 = vmatmul.f32.vlgmr.msrb.gmra.mxu3 %v2590_v55 }
 0xa94   :  { %v2608_v41 = vpop.f32.mrf.mxu0  ;;  %v2628_v26 = vpop.f32.mrf.mxu1 }
 0xa95   :  { %v2671_v18 = vadd.f32 %v2608_v41, %v6756_v44  ;;  %v2672_v53 = vadd.f32 %v2628_v26, %v6757_v34 }
 0xa97   :  { %v2795_v0 = vmul.f32 -1.442695, %v2671_v18  ;;  %v2796_v4 = vmul.f32 -1.442695, %v2672_v53 }
 0xa99   :  { %3038 = vpow2.f32 %v2795_v0 }
 0xa9a   :  { %3040 = vpow2.f32 %v2796_v4 }
 0xa9b   :  { %v2648_v47 = vpop.f32.mrf.mxu2  ;;  %v2668_v7 = vpop.f32.mrf.mxu3 }
 0xa9c   :  { %v2673_v16 = vadd.f32 %v2648_v47, %v6758_v46  ;;  %v2674_v34 = vadd.f32 %v2668_v7, %v6759_v40 }
 0xa9e   :  { %v2797_v52 = vmul.f32 -1.442695, %v2673_v16 }
 0xa9f   :  { %v3039_v54 = vpop.eup %3038 }
 0xaa0   :  { %v3041_v56 = vpop.eup %3040  ;;  %v2684_v1 = vadd.f32 1.0, %v3039_v54  ;;  %3042 = vpow2.f32 %v2797_v52 }
 0xaa1   :  { %v2685_v6 = vadd.f32 1.0, %v3041_v56 }
 0xaa2   :  { %3044 = vrcp.f32 %v2684_v1  ;;  %v2698_v14 = vand.u32 2147483648, %v2684_v1  ;;  %v2696_v58 = vand.u32 2147483647, %v2684_v1  ;;  %vm2692_vm6 = vweird.f32 %v2684_v1 }
 0xaa3   :  { %3046 = vrcp.f32 %v2685_v6  ;;  %v2713_v61 = vand.u32 2147483648, %v2685_v6  ;;  %v2711_v17 = vand.u32 2147483647, %v2685_v6  ;;  %vm2707_vm7 = vweird.f32 %v2685_v6 }
 0xaa4   :  { %v2699_v3 = vor.u32 1.1754944e-38, %v2698_v14  ;;  %vm2697_vm10 = vcmp.eq.f32.partialorder %v2696_v58, 8.507059e+37 }
 0xaa5   :  { %v2714_v23 = vor.u32 1.1754944e-38, %v2713_v61  ;;  %vm2712_vm11 = vcmp.eq.f32.partialorder %v2711_v17, 8.507059e+37 }
 0xaa6   :  { %v3043_v13 = vpop.eup %3042 }
 0xaa7   :  { %v2686_v44 = vadd.f32 1.0, %v3043_v13 }
 0xaa8   :  { %v3045_v21 = vpop.eup %3044 }
 0xaa9   :  { %v3047_v37 = vpop.eup %3046  ;;  %v2688_v9 = vmul.f32 %v3045_v21, %v2684_v1  ;;  %3048 = vrcp.f32 %v2686_v44  ;;  %vm2693_vm4 = vweird.f32 %v3045_v21  ;;  %v2728_v51 = vand.u32 2147483648, %v2686_v44 }
 0xaaa   :  { %v2703_v10 = vmul.f32 %v3047_v37, %v2685_v6  ;;  %3050 = vtanh.f32 %v2674_v34  ;;  %vm2708_vm5 = vweird.f32 %v3047_v37  ;;  %vm2694_vm8 = vmor %vm2692_vm6, %vm2693_vm4  ;;  %vm2722_vm13 = vweird.f32 %v2686_v44 }
 0xaab   :  { %v2689_v62 = vsub.f32 1.0, %v2688_v9  ;;  %vm2709_vm9 = vmor %vm2707_vm7, %vm2708_vm5  ;;  %v2726_v15 = vand.u32 2147483647, %v2686_v44  ;;  %v2729_v25 = vor.u32 1.1754944e-38, %v2728_v51 }
 0xaac   :  { %v2704_v46 = vsub.f32 1.0, %v2703_v10 }
 0xaad   :  { %v2690_v39 = vmul.f32 %v3045_v21, %v2689_v62  ;;  %vm2727_vm15 = vcmp.eq.f32.partialorder %v2726_v15, 8.507059e+37 }
 0xaae   :  { %v2705_v43 = vmul.f32 %v3047_v37, %v2704_v46 }
 0xaaf   :  { %v3049_v31 = vpop.eup %3048  ;;  %v2691_v24 = vadd.f32 %v3045_v21, %v2690_v39 }
 0xab0   :  { %v2718_v40 = vmul.f32 %v3049_v31, %v2686_v44  ;;  %v2706_v42 = vadd.f32 %v3047_v37, %v2705_v43  ;;  %v3051_v29 = vpop.eup %3050  ;;  %vm2723_vm12 = vweird.f32 %v3049_v31 }
 0xab1   :  { %v2695_v27 = vsel %vm2694_vm8, %v3045_v21, %v2691_v24  ;;  %vm2724_vm14 = vmor %vm2722_vm13, %vm2723_vm12 }
 0xab2   :  { %v2719_v49 = vsub.f32 1.0, %v2718_v40  ;;  %v2700_v36 = vsel %vm2697_vm10, %v2699_v3, %v2695_v27  ;;  %v2710_v59 = vsel %vm2709_vm9, %v3047_v37, %v2706_v42 }
 0xab3   :  { %v2715_v5 = vsel %vm2712_vm11, %v2714_v23, %v2710_v59  ;;  %v2734_v32 = vmul.f32 %v3051_v29, %v2700_v36 }
 0xab4   :  { %v2720_v8 = vmul.f32 %v3049_v31, %v2719_v49  ;;  %v2733_v22 = vmul.f32 %v2715_v5, %v6102_v2 }
 0xab6   :  { %v2735_v35 = vadd.f32 %v2734_v32, %v2733_v22  ;;  %v2721_v12 = vadd.f32 %v3049_v31, %v2720_v8 }
 0xab8   :  { %3052 = vtanh.f32 %v2735_v35  ;;  %v2725_v45 = vsel %vm2724_vm14, %v3049_v31, %v2721_v12 }
 0xab9   :  { %v2730_v20 = vsel %vm2727_vm15, %v2729_v25, %v2725_v45 }
 0xabe   :  { %v3053_v28 = vpop.eup %3052 }
 0xabf   :  { %v2737_v50 = vmul.f32 %v3053_v28, %v2730_v20 }
 0xac1   :  { %2745 = vst [vmem:[%s6123_s7 + $0x38] sm:$0xff] %v2737_v50 }

</bundles_post_ra>
